<compile_context>
chip_gen: v6e
topology: v6e:2x2x1
jax: 0.10.0
libtpu: 0.0.40
codegen_flags: <defaults>
</compile_context>

<pallas_src>
import functools

import jax
import jax.numpy as jnp
import numpy as np
from jax import lax
from jax.experimental import pallas as pl
from jax.experimental.pallas import tpu as pltpu


# (name, kernel size, dilation) in packing order.  The last two operate on the
# zero-bordered (H+2, W+2) frame used for branch 3.
_SPATIAL_CONVS = (("b1c2", 3, 1), ("b2c2", 3, 1), ("b2c3", 5, 3),
                  ("b3c2", 5, 1), ("b3c3", 3, 5))
_FRAME_CONVS = ("b3c2", "b3c3")


def _tap_offsets():
    off, out = 0, {}
    for name, k, _ in _SPATIAL_CONVS:
        out[name] = off
        off += k * k
    return out, off


# ------------------------------ fused kernel ------------------------------- #

def _rfam_kernel(x_ref, msk_ref, w1_ref, b1_ref, wsp_ref, bsp_ref,
                 wo_ref, bo_ref, emb_ref, crop_ref, o_ref,
                 stack_ref, cat_ref, *, H, W, E, B, scale):
    f32 = jnp.float32
    HF, WF = H + 2, W + 2
    n16 = B * H * W                        # lanes of the HxW maps (B images)
    n18 = crop_ref.shape[0]                # lane-padded frame width

    tap_off, _ = _tap_offsets()
    cfg = {name: (k, d) for name, k, d in _SPATIAL_CONVS}
    conv_ix = {name: i for i, (name, _, _) in enumerate(_SPATIAL_CONVS)}

    x = x_ref[...]                         # (C, n16): batch+spatial on lanes

    def same_conv(xf, name, Wc, n):
        """KxK 'same' conv (dilation d) on row-major maps of width Wc packed on
        the lane axis.  All K*K taps are staged (shift on the XLU, 0/1 mask
        multiply on the VPU, masked vst into the stack scratch) and contracted
        in ONE MXU matmul.  The precomputed masks also kill cross-image and
        lane-tail leakage of the rolls."""
        K, dil = cfg[name]
        base = tap_off[name]
        ci = conv_ix[name]
        c = (K - 1) // 2
        for i in range(K):
            for j in range(K):
                t = i * K + j
                s = (i - c) * dil * Wc + (j - c) * dil    # flat source offset
                shifted = xf if s == 0 else pltpu.roll(xf, (-s) % n, axis=1)
                m = msk_ref[base + t:base + t + 1, 0:n]   # (1, n) 0/1 mask
                stack_ref[t * E:(t + 1) * E, 0:n] = shifted * m
        kke = K * K * E
        acc = jnp.dot(wsp_ref[ci][:, 0:kke], stack_ref[0:kke, 0:n],
                      preferred_element_type=f32)
        return acc + bsp_ref[ci * E:(ci + 1) * E, :]      # bias added once

    # heads: the three leading 1x1 convs as one (3E, C) @ (C, n16) matmul
    h = jnp.dot(w1_ref[...], x, preferred_element_type=f32) + b1_ref[...]

    # ---- branch 1: 1x1 -> 3x3 (same) ---------------------------------------
    cat_ref[0:E, :] = same_conv(h[0:E, :], "b1c2", W, n16)

    # ---- branch 2: 1x1 -> 3x3 (same) -> 5x5 d3 (same) ----------------------
    x2 = same_conv(h[E:2 * E, :], "b2c2", W, n16)
    cat_ref[E:2 * E, :] = same_conv(x2, "b2c3", W, n16)

    # ---- branch 3: 1x1 -> 5x5 p3 -> 3x3 d5 p4 ------------------------------
    # Equivalent formulation: embed the 1x1 result into the zero-bordered
    # (H+2, W+2) frame (constant 0/1 matmul), run both convs as 'same' convs
    # in-frame, crop the centre back out (transposed constant matmul).
    x3 = jnp.dot(h[2 * E:3 * E, :], emb_ref[...], preferred_element_type=f32)
    x3 = same_conv(x3, "b3c2", WF, n18)
    x3 = same_conv(x3, "b3c3", WF, n18)
    cat_ref[2 * E:3 * E, :] = jnp.dot(x3, crop_ref[...],
                                      preferred_element_type=f32)

    # ---- final 1x1 over the stacked concat + residual scale-add + ReLU -----
    res = jnp.dot(wo_ref[...], cat_ref[...],
                  preferred_element_type=f32) + bo_ref[...]
    o_ref[...] = jnp.maximum(x + res * scale, 0.0)


# ------------------------- one-time constant packing ----------------------- #

def _pack_constants(params, *, B, H, W):
    """Pack all weights and 0/1 constants (masks / embed / crop) once, on host."""
    E = params["b1c1"][0].shape[3]
    C = params["b1c1"][0].shape[2]
    HW, HF, WF = H * W, H + 2, W + 2
    HWF = HF * WF
    n16 = B * HW
    n18 = ((B * HWF + 127) // 128) * 128
    tap_off, n_taps = _tap_offsets()

    def t1x1(w):                                  # (1,1,cin,cout) -> (cout,cin)
        w = np.asarray(w)
        return np.transpose(w.reshape(w.shape[2], w.shape[3]), (1, 0))

    def slab(w):                                  # (K,K,cin,cout) -> (cout,128)
        w = np.asarray(w)
        K, _, cin, cout = w.shape
        s = np.transpose(w, (3, 0, 1, 2)).reshape(cout, K * K * cin)
        out = np.zeros((cout, 128), np.float32)
        out[:, :K * K * cin] = s
        return out

    w1 = np.concatenate([t1x1(params["b1c1"][0]), t1x1(params["b2c1"][0]),
                         t1x1(params["b3c1"][0])], axis=0)           # (3E, C)
    b1 = np.concatenate([np.asarray(params[k][1])
                         for k in ("b1c1", "b2c1", "b3c1")]).reshape(3 * E, 1)
    wsp = np.stack([slab(params[name][0])
                    for name, _, _ in _SPATIAL_CONVS])               # (5,E,128)
    bsp = np.concatenate([np.asarray(params[name][1])
                          for name, _, _ in _SPATIAL_CONVS]).reshape(-1, 1)
    wo = t1x1(params["out"][0])                                      # (C, 3E)
    bo = np.asarray(params["out"][1]).reshape(C, 1)

    # per-tap 0/1 boundary masks (zero on the padded lane tail as well)
    masks = np.zeros((n_taps, n18), np.float32)
    for name, K, dil in _SPATIAL_CONVS:
        frame = name in _FRAME_CONVS
        Hc, Wc = (HF, WF) if frame else (H, W)
        npix = Hc * Wc
        rr = np.repeat(np.arange(Hc), Wc)
        cc = np.tile(np.arange(Wc), Hc)
        c = (K - 1) // 2
        for t in range(K * K):
            dh, dw = (t // K - c) * dil, (t % K - c) * dil
            ok = ((rr + dh >= 0) & (rr + dh < Hc) &
                  (cc + dw >= 0) & (cc + dw < Wc)).astype(np.float32)
            for b in range(B):
                masks[tap_off[name] + t, b * npix:(b + 1) * npix] = ok

    # 0/1 crop (frame -> HxW grid) and embed (HxW grid -> frame) matrices
    crop = np.zeros((n18, n16), np.float32)
    for b in range(B):
        for hh in range(H):
            for ww in range(W):
                crop[b * HWF + (hh + 1) * WF + (ww + 1),
                     b * HW + hh * W + ww] = 1.0
    embed = np.ascontiguousarray(crop.T)

    to_j = lambda a: jnp.asarray(a, jnp.float32)
    consts = tuple(to_j(a) for a in
                   (masks, w1, b1, wsp, bsp, wo, bo, embed, crop))
    return consts, dict(C=C, E=E, n16=n16, n18=n18, n_taps=n_taps)


# --------------------------------- wrapper --------------------------------- #

def make_rfam_forward(params, *, N, H, W, scale, grid_steps=None):
    """Packs all constants once and returns a jitted forward(x), x: (N,C,H,W)."""
    if grid_steps is None:
        # 2 grid steps keep both TensorCores of a v7x chip busy; on single-TC
        # v5e/v6e pass grid_steps=1 to fold the whole batch onto the lane axis
        # of a single step (one fewer grid-step overhead, wider lanes).
        grid_steps = 2 if (N % 2 == 0 and N >= 2) else 1
    assert N % grid_steps == 0, "grid_steps must divide the batch size"
    G = grid_steps
    B = N // G

    consts, cfg = _pack_constants(params, B=B, H=H, W=W)
    C, E = cfg["C"], cfg["E"]
    n16, n18, n_taps = cfg["n16"], cfg["n18"], cfg["n_taps"]
    HW = H * W
    max_kke = max(k * k for _, k, _ in _SPATIAL_CONVS) * E

    kernel = functools.partial(_rfam_kernel, H=H, W=W, E=E, B=B,
                               scale=float(scale))

    n_convs = len(_SPATIAL_CONVS)
    const_specs = [
        pl.BlockSpec((n_taps, n18), lambda i: (0, 0)),            # masks
        pl.BlockSpec((3 * E, C), lambda i: (0, 0)),               # w1x1 (fused)
        pl.BlockSpec((3 * E, 1), lambda i: (0, 0)),               # b1x1
        pl.BlockSpec((n_convs, E, 128), lambda i: (0, 0, 0)),     # wsp slabs
        pl.BlockSpec((n_convs * E, 1), lambda i: (0, 0)),         # bsp
        pl.BlockSpec((C, 3 * E), lambda i: (0, 0)),               # wo (fused)
        pl.BlockSpec((C, 1), lambda i: (0, 0)),                   # bo
        pl.BlockSpec((n16, n18), lambda i: (0, 0)),               # embed
        pl.BlockSpec((n18, n16), lambda i: (0, 0)),               # crop
    ]

    call = pl.pallas_call(
        kernel,
        out_shape=jax.ShapeDtypeStruct((G, C, n16), jnp.float32),
        grid=(G,),
        in_specs=[pl.BlockSpec((None, C, n16), lambda i: (i, 0, 0))]
                 + const_specs,
        out_specs=pl.BlockSpec((None, C, n16), lambda i: (i, 0, 0)),
        scratch_shapes=[pltpu.VMEM((max_kke, n18), jnp.float32),   # tap stack
                        pltpu.VMEM((3 * E, n16), jnp.float32)],    # concat
        compiler_params=pltpu.CompilerParams(
            dimension_semantics=("parallel",)),
    )

    @jax.jit
    def forward(x_nchw):
        # (N,C,H,W) -> (G, C, B*H*W): B images side by side on the lane axis
        xb = x_nchw.reshape(G, B, C, HW).transpose(0, 2, 1, 3)
        xb = xb.reshape(G, C, B * HW).astype(jnp.float32)
        y = call(xb, *consts)                                      # (G,C,B*HW)
        y = y.reshape(G, C, B, HW).transpose(0, 2, 1, 3)
        return y.reshape(N, C, H, W)

    return forward


# ---------------------- pure-JAX reference (for check) --------------------- #

def _conv_ref(x, w, b, *, dil=1, pad=0):
    out = lax.conv_general_dilated(
        x, w, window_strides=(1, 1),
        padding=((pad, pad), (pad, pad)),
        rhs_dilation=(dil, dil),
        dimension_numbers=("NHWC", "HWIO", "NHWC"),
        precision=lax.Precision.HIGHEST)
    return out + b


def rfam_ref(x_nhwc, params, scale):
    x1 = _conv_ref(x_nhwc, *params["b1c1"])
    x1 = _conv_ref(x1, *params["b1c2"], pad=1)
    x2 = _conv_ref(x_nhwc, *params["b2c1"])
    x2 = _conv_ref(x2, *params["b2c2"], pad=1)
    x2 = _conv_ref(x2, *params["b2c3"], dil=3, pad=6)
    x3 = _conv_ref(x_nhwc, *params["b3c1"])
    x3 = _conv_ref(x3, *params["b3c2"], pad=3)
    x3 = _conv_ref(x3, *params["b3c3"], dil=5, pad=4)
    cat = jnp.concatenate([x1, x2, x3], axis=-1)
    res = _conv_ref(cat, *params["out"])
    return jnp.maximum(x_nhwc + res * scale, 0.0)


# ------------------------------ param setup -------------------------------- #

def init_params(key, indim):
    embdim = indim // 4

    def conv_w(k, ks, cin, cout):
        kw_, kb_ = jax.random.split(k)
        fan_in = cin * ks * ks
        w = jax.random.normal(kw_, (ks, ks, cin, cout), jnp.float32) / jnp.sqrt(fan_in)
        b = jax.random.normal(kb_, (cout,), jnp.float32) * 0.01
        return w, b

    keys = jax.random.split(key, 9)
    return {
        "b1c1": conv_w(keys[0], 1, indim, embdim),
        "b1c2": conv_w(keys[1], 3, embdim, embdim),
        "b2c1": conv_w(keys[2], 1, indim, embdim),
        "b2c2": conv_w(keys[3], 3, embdim, embdim),
        "b2c3": conv_w(keys[4], 5, embdim, embdim),
        "b3c1": conv_w(keys[5], 1, indim, embdim),
        "b3c2": conv_w(keys[6], 5, embdim, embdim),
        "b3c3": conv_w(keys[7], 3, embdim, embdim),
        "out":  conv_w(keys[8], 1, 3 * embdim, indim),
    }


if __name__ == "__main__":
    key = jax.random.PRNGKey(0)
    kx, kp = jax.random.split(key)

    N, C, H, W = 2, 16, 16, 16               # PyTorch-side NCHW input shape
    scale = 0.5

    x_nchw = jax.random.normal(kx, (N, C, H, W), jnp.float32)
    params = init_params(kp, C)

    fwd = make_rfam_forward(params, N=N, H=H, W=W, scale=scale)
    out = jax.block_until_ready(fwd(x_nchw))
    assert out.shape == (N, C, H, W), out.shape

    x_nhwc = jnp.transpose(x_nchw, (0, 2, 3, 1))
    ref = jnp.transpose(rfam_ref(x_nhwc, params, scale), (0, 3, 1, 2))
    np.testing.assert_allclose(np.asarray(out), np.asarray(ref),
                               rtol=5e-4, atol=5e-4)

    print("KERNEL_OK")
</pallas_src>

<mosaic_0001>
module attributes {stable_mosaic.version = 11 : i64} {
  func.func @_rfam_kernel(%arg0: i32, %arg1: memref<1x16x256xf32, #tpu.memory_space<vmem>>, %arg2: memref<77x384xf32, #tpu.memory_space<vmem>>, %arg3: memref<12x16xf32, #tpu.memory_space<vmem>>, %arg4: memref<12x1xf32, #tpu.memory_space<vmem>>, %arg5: memref<5x4x128xf32, #tpu.memory_space<vmem>>, %arg6: memref<20x1xf32, #tpu.memory_space<vmem>>, %arg7: memref<16x12xf32, #tpu.memory_space<vmem>>, %arg8: memref<16x1xf32, #tpu.memory_space<vmem>>, %arg9: memref<256x384xf32, #tpu.memory_space<vmem>>, %arg10: memref<384x256xf32, #tpu.memory_space<vmem>>, %arg11: memref<1x16x256xf32, #tpu.memory_space<vmem>>, %arg12: memref<100x384xf32, #tpu.memory_space<vmem>>, %arg13: memref<12x256xf32, #tpu.memory_space<vmem>>) attributes {dimension_semantics = [#tpu.dimension_semantics<parallel>], iteration_bounds = array<i64: 2>, scalar_prefetch = 0 : i64, scratch_operands = 2 : i64, tpu.core_type = #tpu.core_type<tc>, window_params = [{transform_indices = @transform_0, window_bounds = array<i64: 1, 16, 256>}, {pipeline_mode = #tpu.pipeline_mode<synchronous>, transform_indices = @transform_1, window_bounds = array<i64: 77, 384>}, {pipeline_mode = #tpu.pipeline_mode<synchronous>, transform_indices = @transform_2, window_bounds = array<i64: 12, 16>}, {pipeline_mode = #tpu.pipeline_mode<synchronous>, transform_indices = @transform_3, window_bounds = array<i64: 12, 1>}, {pipeline_mode = #tpu.pipeline_mode<synchronous>, transform_indices = @transform_4, window_bounds = array<i64: 5, 4, 128>}, {pipeline_mode = #tpu.pipeline_mode<synchronous>, transform_indices = @transform_5, window_bounds = array<i64: 20, 1>}, {pipeline_mode = #tpu.pipeline_mode<synchronous>, transform_indices = @transform_6, window_bounds = array<i64: 16, 12>}, {pipeline_mode = #tpu.pipeline_mode<synchronous>, transform_indices = @transform_7, window_bounds = array<i64: 16, 1>}, {pipeline_mode = #tpu.pipeline_mode<synchronous>, transform_indices = @transform_8, window_bounds = array<i64: 256, 384>}, {pipeline_mode = #tpu.pipeline_mode<synchronous>, transform_indices = @transform_9, window_bounds = array<i64: 384, 256>}, {transform_indices = @transform_10, window_bounds = array<i64: 1, 16, 256>}]} {
    %c0 = arith.constant 0 : index
    %c0_0 = arith.constant 0 : index
    %c0_1 = arith.constant 0 : index
    %0 = vector.load %arg1[%c0, %c0_0, %c0_1] : memref<1x16x256xf32, #tpu.memory_space<vmem>>, vector<1x16x256xf32>
    %1 = vector.shape_cast %0 : vector<1x16x256xf32> to vector<16x256xf32>
    %c0_2 = arith.constant 0 : index
    %c0_3 = arith.constant 0 : index
    %2 = vector.load %arg3[%c0_2, %c0_3] : memref<12x16xf32, #tpu.memory_space<vmem>>, vector<12x16xf32>
    %cst = arith.constant dense<0.000000e+00> : vector<12x256xf32>
    %3 = tpu.matmul %2, %1, %cst {dimension_numbers = #tpu.dot_dimension_numbers<[1], [0], [0], [1], [0, 0, 1, 1], [], []>} : vector<12x16xf32>, vector<16x256xf32>, vector<12x256xf32> -> vector<12x256xf32>
    %c0_4 = arith.constant 0 : index
    %c0_5 = arith.constant 0 : index
    %4 = vector.load %arg4[%c0_4, %c0_5] : memref<12x1xf32, #tpu.memory_space<vmem>>, vector<12x1xf32>
    %5 = vector.broadcast %4 : vector<12x1xf32> to vector<12x256xf32>
    %6 = arith.addf %3, %5 : vector<12x256xf32>
    %7 = vector.extract_strided_slice %6 {offsets = [0, 0], sizes = [4, 256], strides = [1, 1]} : vector<12x256xf32> to vector<4x256xf32>
    %c17_i32 = arith.constant 17 : i32
    %8 = tpu.dynamic_rotate %7 by %c17_i32 dim 1 : vector<4x256xf32>, i32 -> vector<4x256xf32>
    %c0_6 = arith.constant 0 : index
    %c0_7 = arith.constant 0 : index
    %9 = vector.load %arg2[%c0_6, %c0_7] : memref<77x384xf32, #tpu.memory_space<vmem>>, vector<1x256xf32>
    %10 = vector.broadcast %9 : vector<1x256xf32> to vector<4x256xf32>
    %11 = arith.mulf %8, %10 : vector<4x256xf32>
    %c0_8 = arith.constant 0 : index
    %c0_9 = arith.constant 0 : index
    %12 = vector.load %arg12[%c0_8, %c0_9] : memref<100x384xf32, #tpu.memory_space<vmem>>, vector<4x256xf32>
    tpu.vector_store %arg12[%c0_8, %c0_9], %11 {strides = array<i32>} : memref<100x384xf32, #tpu.memory_space<vmem>>, vector<4x256xf32>,
    %c16_i32 = arith.constant 16 : i32
    %13 = tpu.dynamic_rotate %7 by %c16_i32 dim 1 : vector<4x256xf32>, i32 -> vector<4x256xf32>
    %c1 = arith.constant 1 : index
    %c0_10 = arith.constant 0 : index
    %14 = vector.load %arg2[%c1, %c0_10] : memref<77x384xf32, #tpu.memory_space<vmem>>, vector<1x256xf32>
    %15 = vector.broadcast %14 : vector<1x256xf32> to vector<4x256xf32>
    %16 = arith.mulf %13, %15 : vector<4x256xf32>
    %c4 = arith.constant 4 : index
    %c0_11 = arith.constant 0 : index
    %17 = vector.load %arg12[%c4, %c0_11] : memref<100x384xf32, #tpu.memory_space<vmem>>, vector<4x256xf32>
    tpu.vector_store %arg12[%c4, %c0_11], %16 {strides = array<i32>} : memref<100x384xf32, #tpu.memory_space<vmem>>, vector<4x256xf32>,
    %c15_i32 = arith.constant 15 : i32
    %18 = tpu.dynamic_rotate %7 by %c15_i32 dim 1 : vector<4x256xf32>, i32 -> vector<4x256xf32>
    %c2 = arith.constant 2 : index
    %c0_12 = arith.constant 0 : index
    %19 = vector.load %arg2[%c2, %c0_12] : memref<77x384xf32, #tpu.memory_space<vmem>>, vector<1x256xf32>
    %20 = vector.broadcast %19 : vector<1x256xf32> to vector<4x256xf32>
    %21 = arith.mulf %18, %20 : vector<4x256xf32>
    %c8 = arith.constant 8 : index
    %c0_13 = arith.constant 0 : index
    %22 = vector.load %arg12[%c8, %c0_13] : memref<100x384xf32, #tpu.memory_space<vmem>>, vector<4x256xf32>
    tpu.vector_store %arg12[%c8, %c0_13], %21 {strides = array<i32>} : memref<100x384xf32, #tpu.memory_space<vmem>>, vector<4x256xf32>,
    %c1_i32 = arith.constant 1 : i32
    %23 = tpu.dynamic_rotate %7 by %c1_i32 dim 1 : vector<4x256xf32>, i32 -> vector<4x256xf32>
    %c3 = arith.constant 3 : index
    %c0_14 = arith.constant 0 : index
    %24 = vector.load %arg2[%c3, %c0_14] : memref<77x384xf32, #tpu.memory_space<vmem>>, vector<1x256xf32>
    %25 = vector.broadcast %24 : vector<1x256xf32> to vector<4x256xf32>
    %26 = arith.mulf %23, %25 : vector<4x256xf32>
    %c12 = arith.constant 12 : index
    %c0_15 = arith.constant 0 : index
    %27 = vector.load %arg12[%c12, %c0_15] : memref<100x384xf32, #tpu.memory_space<vmem>>, vector<4x256xf32>
    tpu.vector_store %arg12[%c12, %c0_15], %26 {strides = array<i32>} : memref<100x384xf32, #tpu.memory_space<vmem>>, vector<4x256xf32>,
    %c4_16 = arith.constant 4 : index
    %c0_17 = arith.constant 0 : index
    %28 = vector.load %arg2[%c4_16, %c0_17] : memref<77x384xf32, #tpu.memory_space<vmem>>, vector<1x256xf32>
    %29 = vector.broadcast %28 : vector<1x256xf32> to vector<4x256xf32>
    %30 = arith.mulf %7, %29 : vector<4x256xf32>
    %c16 = arith.constant 16 : index
    %c0_18 = arith.constant 0 : index
    %31 = vector.load %arg12[%c16, %c0_18] : memref<100x384xf32, #tpu.memory_space<vmem>>, vector<4x256xf32>
    tpu.vector_store %arg12[%c16, %c0_18], %30 {strides = array<i32>} : memref<100x384xf32, #tpu.memory_space<vmem>>, vector<4x256xf32>,
    %c255_i32 = arith.constant 255 : i32
    %32 = tpu.dynamic_rotate %7 by %c255_i32 dim 1 : vector<4x256xf32>, i32 -> vector<4x256xf32>
    %c5 = arith.constant 5 : index
    %c0_19 = arith.constant 0 : index
    %33 = vector.load %arg2[%c5, %c0_19] : memref<77x384xf32, #tpu.memory_space<vmem>>, vector<1x256xf32>
    %34 = vector.broadcast %33 : vector<1x256xf32> to vector<4x256xf32>
    %35 = arith.mulf %32, %34 : vector<4x256xf32>
    %c20 = arith.constant 20 : index
    %c0_20 = arith.constant 0 : index
    %36 = vector.load %arg12[%c20, %c0_20] : memref<100x384xf32, #tpu.memory_space<vmem>>, vector<4x256xf32>
    tpu.vector_store %arg12[%c20, %c0_20], %35 {strides = array<i32>} : memref<100x384xf32, #tpu.memory_space<vmem>>, vector<4x256xf32>,
    %c241_i32 = arith.constant 241 : i32
    %37 = tpu.dynamic_rotate %7 by %c241_i32 dim 1 : vector<4x256xf32>, i32 -> vector<4x256xf32>
    %c6 = arith.constant 6 : index
    %c0_21 = arith.constant 0 : index
    %38 = vector.load %arg2[%c6, %c0_21] : memref<77x384xf32, #tpu.memory_space<vmem>>, vector<1x256xf32>
    %39 = vector.broadcast %38 : vector<1x256xf32> to vector<4x256xf32>
    %40 = arith.mulf %37, %39 : vector<4x256xf32>
    %c24 = arith.constant 24 : index
    %c0_22 = arith.constant 0 : index
    %41 = vector.load %arg12[%c24, %c0_22] : memref<100x384xf32, #tpu.memory_space<vmem>>, vector<4x256xf32>
    tpu.vector_store %arg12[%c24, %c0_22], %40 {strides = array<i32>} : memref<100x384xf32, #tpu.memory_space<vmem>>, vector<4x256xf32>,
    %c240_i32 = arith.constant 240 : i32
    %42 = tpu.dynamic_rotate %7 by %c240_i32 dim 1 : vector<4x256xf32>, i32 -> vector<4x256xf32>
    %c7 = arith.constant 7 : index
    %c0_23 = arith.constant 0 : index
    %43 = vector.load %arg2[%c7, %c0_23] : memref<77x384xf32, #tpu.memory_space<vmem>>, vector<1x256xf32>
    %44 = vector.broadcast %43 : vector<1x256xf32> to vector<4x256xf32>
    %45 = arith.mulf %42, %44 : vector<4x256xf32>
    %c28 = arith.constant 28 : index
    %c0_24 = arith.constant 0 : index
    %46 = vector.load %arg12[%c28, %c0_24] : memref<100x384xf32, #tpu.memory_space<vmem>>, vector<4x256xf32>
    tpu.vector_store %arg12[%c28, %c0_24], %45 {strides = array<i32>} : memref<100x384xf32, #tpu.memory_space<vmem>>, vector<4x256xf32>,
    %c239_i32 = arith.constant 239 : i32
    %47 = tpu.dynamic_rotate %7 by %c239_i32 dim 1 : vector<4x256xf32>, i32 -> vector<4x256xf32>
    %c8_25 = arith.constant 8 : index
    %c0_26 = arith.constant 0 : index
    %48 = vector.load %arg2[%c8_25, %c0_26] : memref<77x384xf32, #tpu.memory_space<vmem>>, vector<1x256xf32>
    %49 = vector.broadcast %48 : vector<1x256xf32> to vector<4x256xf32>
    %50 = arith.mulf %47, %49 : vector<4x256xf32>
    %c32 = arith.constant 32 : index
    %c0_27 = arith.constant 0 : index
    %51 = vector.load %arg12[%c32, %c0_27] : memref<100x384xf32, #tpu.memory_space<vmem>>, vector<4x256xf32>
    tpu.vector_store %arg12[%c32, %c0_27], %50 {strides = array<i32>} : memref<100x384xf32, #tpu.memory_space<vmem>>, vector<4x256xf32>,
    %c0_28 = arith.constant 0 : index
    %c0_29 = arith.constant 0 : index
    %c0_30 = arith.constant 0 : index
    %52 = vector.load %arg5[%c0_28, %c0_29, %c0_30] : memref<5x4x128xf32, #tpu.memory_space<vmem>>, vector<1x4x128xf32>
    %53 = vector.shape_cast %52 : vector<1x4x128xf32> to vector<4x128xf32>
    %54 = vector.extract_strided_slice %53 {offsets = [0, 0], sizes = [4, 36], strides = [1, 1]} : vector<4x128xf32> to vector<4x36xf32>
    %c0_31 = arith.constant 0 : index
    %c0_32 = arith.constant 0 : index
    %55 = vector.load %arg12[%c0_31, %c0_32] : memref<100x384xf32, #tpu.memory_space<vmem>>, vector<36x256xf32>
    %cst_33 = arith.constant dense<0.000000e+00> : vector<4x256xf32>
    %56 = tpu.matmul %54, %55, %cst_33 {dimension_numbers = #tpu.dot_dimension_numbers<[1], [0], [0], [1], [0, 0, 1, 1], [], []>} : vector<4x36xf32>, vector<36x256xf32>, vector<4x256xf32> -> vector<4x256xf32>
    %c0_34 = arith.constant 0 : index
    %c0_35 = arith.constant 0 : index
    %57 = vector.load %arg6[%c0_34, %c0_35] : memref<20x1xf32, #tpu.memory_space<vmem>>, vector<4x1xf32>
    %58 = vector.broadcast %57 : vector<4x1xf32> to vector<4x256xf32>
    %59 = arith.addf %56, %58 : vector<4x256xf32>
    %c0_36 = arith.constant 0 : index
    %c0_37 = arith.constant 0 : index
    %60 = vector.load %arg13[%c0_36, %c0_37] : memref<12x256xf32, #tpu.memory_space<vmem>>, vector<4x256xf32>
    tpu.vector_store %arg13[%c0_36, %c0_37], %59 {strides = array<i32>} : memref<12x256xf32, #tpu.memory_space<vmem>>, vector<4x256xf32>,
    %61 = vector.extract_strided_slice %6 {offsets = [4, 0], sizes = [4, 256], strides = [1, 1]} : vector<12x256xf32> to vector<4x256xf32>
    %c17_i32_38 = arith.constant 17 : i32
    %62 = tpu.dynamic_rotate %61 by %c17_i32_38 dim 1 : vector<4x256xf32>, i32 -> vector<4x256xf32>
    %c9 = arith.constant 9 : index
    %c0_39 = arith.constant 0 : index
    %63 = vector.load %arg2[%c9, %c0_39] : memref<77x384xf32, #tpu.memory_space<vmem>>, vector<1x256xf32>
    %64 = vector.broadcast %63 : vector<1x256xf32> to vector<4x256xf32>
    %65 = arith.mulf %62, %64 : vector<4x256xf32>
    %c0_40 = arith.constant 0 : index
    %c0_41 = arith.constant 0 : index
    %66 = vector.load %arg12[%c0_40, %c0_41] : memref<100x384xf32, #tpu.memory_space<vmem>>, vector<4x256xf32>
    tpu.vector_store %arg12[%c0_40, %c0_41], %65 {strides = array<i32>} : memref<100x384xf32, #tpu.memory_space<vmem>>, vector<4x256xf32>,
    %c16_i32_42 = arith.constant 16 : i32
    %67 = tpu.dynamic_rotate %61 by %c16_i32_42 dim 1 : vector<4x256xf32>, i32 -> vector<4x256xf32>
    %c10 = arith.constant 10 : index
    %c0_43 = arith.constant 0 : index
    %68 = vector.load %arg2[%c10, %c0_43] : memref<77x384xf32, #tpu.memory_space<vmem>>, vector<1x256xf32>
    %69 = vector.broadcast %68 : vector<1x256xf32> to vector<4x256xf32>
    %70 = arith.mulf %67, %69 : vector<4x256xf32>
    %c4_44 = arith.constant 4 : index
    %c0_45 = arith.constant 0 : index
    %71 = vector.load %arg12[%c4_44, %c0_45] : memref<100x384xf32, #tpu.memory_space<vmem>>, vector<4x256xf32>
    tpu.vector_store %arg12[%c4_44, %c0_45], %70 {strides = array<i32>} : memref<100x384xf32, #tpu.memory_space<vmem>>, vector<4x256xf32>,
    %c15_i32_46 = arith.constant 15 : i32
    %72 = tpu.dynamic_rotate %61 by %c15_i32_46 dim 1 : vector<4x256xf32>, i32 -> vector<4x256xf32>
    %c11 = arith.constant 11 : index
    %c0_47 = arith.constant 0 : index
    %73 = vector.load %arg2[%c11, %c0_47] : memref<77x384xf32, #tpu.memory_space<vmem>>, vector<1x256xf32>
    %74 = vector.broadcast %73 : vector<1x256xf32> to vector<4x256xf32>
    %75 = arith.mulf %72, %74 : vector<4x256xf32>
    %c8_48 = arith.constant 8 : index
    %c0_49 = arith.constant 0 : index
    %76 = vector.load %arg12[%c8_48, %c0_49] : memref<100x384xf32, #tpu.memory_space<vmem>>, vector<4x256xf32>
    tpu.vector_store %arg12[%c8_48, %c0_49], %75 {strides = array<i32>} : memref<100x384xf32, #tpu.memory_space<vmem>>, vector<4x256xf32>,
    %c1_i32_50 = arith.constant 1 : i32
    %77 = tpu.dynamic_rotate %61 by %c1_i32_50 dim 1 : vector<4x256xf32>, i32 -> vector<4x256xf32>
    %c12_51 = arith.constant 12 : index
    %c0_52 = arith.constant 0 : index
    %78 = vector.load %arg2[%c12_51, %c0_52] : memref<77x384xf32, #tpu.memory_space<vmem>>, vector<1x256xf32>
    %79 = vector.broadcast %78 : vector<1x256xf32> to vector<4x256xf32>
    %80 = arith.mulf %77, %79 : vector<4x256xf32>
    %c12_53 = arith.constant 12 : index
    %c0_54 = arith.constant 0 : index
    %81 = vector.load %arg12[%c12_53, %c0_54] : memref<100x384xf32, #tpu.memory_space<vmem>>, vector<4x256xf32>
    tpu.vector_store %arg12[%c12_53, %c0_54], %80 {strides = array<i32>} : memref<100x384xf32, #tpu.memory_space<vmem>>, vector<4x256xf32>,
    %c13 = arith.constant 13 : index
    %c0_55 = arith.constant 0 : index
    %82 = vector.load %arg2[%c13, %c0_55] : memref<77x384xf32, #tpu.memory_space<vmem>>, vector<1x256xf32>
    %83 = vector.broadcast %82 : vector<1x256xf32> to vector<4x256xf32>
    %84 = arith.mulf %61, %83 : vector<4x256xf32>
    %c16_56 = arith.constant 16 : index
    %c0_57 = arith.constant 0 : index
    %85 = vector.load %arg12[%c16_56, %c0_57] : memref<100x384xf32, #tpu.memory_space<vmem>>, vector<4x256xf32>
    tpu.vector_store %arg12[%c16_56, %c0_57], %84 {strides = array<i32>} : memref<100x384xf32, #tpu.memory_space<vmem>>, vector<4x256xf32>,
    %c255_i32_58 = arith.constant 255 : i32
    %86 = tpu.dynamic_rotate %61 by %c255_i32_58 dim 1 : vector<4x256xf32>, i32 -> vector<4x256xf32>
    %c14 = arith.constant 14 : index
    %c0_59 = arith.constant 0 : index
    %87 = vector.load %arg2[%c14, %c0_59] : memref<77x384xf32, #tpu.memory_space<vmem>>, vector<1x256xf32>
    %88 = vector.broadcast %87 : vector<1x256xf32> to vector<4x256xf32>
    %89 = arith.mulf %86, %88 : vector<4x256xf32>
    %c20_60 = arith.constant 20 : index
    %c0_61 = arith.constant 0 : index
    %90 = vector.load %arg12[%c20_60, %c0_61] : memref<100x384xf32, #tpu.memory_space<vmem>>, vector<4x256xf32>
    tpu.vector_store %arg12[%c20_60, %c0_61], %89 {strides = array<i32>} : memref<100x384xf32, #tpu.memory_space<vmem>>, vector<4x256xf32>,
    %c241_i32_62 = arith.constant 241 : i32
    %91 = tpu.dynamic_rotate %61 by %c241_i32_62 dim 1 : vector<4x256xf32>, i32 -> vector<4x256xf32>
    %c15 = arith.constant 15 : index
    %c0_63 = arith.constant 0 : index
    %92 = vector.load %arg2[%c15, %c0_63] : memref<77x384xf32, #tpu.memory_space<vmem>>, vector<1x256xf32>
    %93 = vector.broadcast %92 : vector<1x256xf32> to vector<4x256xf32>
    %94 = arith.mulf %91, %93 : vector<4x256xf32>
    %c24_64 = arith.constant 24 : index
    %c0_65 = arith.constant 0 : index
    %95 = vector.load %arg12[%c24_64, %c0_65] : memref<100x384xf32, #tpu.memory_space<vmem>>, vector<4x256xf32>
    tpu.vector_store %arg12[%c24_64, %c0_65], %94 {strides = array<i32>} : memref<100x384xf32, #tpu.memory_space<vmem>>, vector<4x256xf32>,
    %c240_i32_66 = arith.constant 240 : i32
    %96 = tpu.dynamic_rotate %61 by %c240_i32_66 dim 1 : vector<4x256xf32>, i32 -> vector<4x256xf32>
    %c16_67 = arith.constant 16 : index
    %c0_68 = arith.constant 0 : index
    %97 = vector.load %arg2[%c16_67, %c0_68] : memref<77x384xf32, #tpu.memory_space<vmem>>, vector<1x256xf32>
    %98 = vector.broadcast %97 : vector<1x256xf32> to vector<4x256xf32>
    %99 = arith.mulf %96, %98 : vector<4x256xf32>
    %c28_69 = arith.constant 28 : index
    %c0_70 = arith.constant 0 : index
    %100 = vector.load %arg12[%c28_69, %c0_70] : memref<100x384xf32, #tpu.memory_space<vmem>>, vector<4x256xf32>
    tpu.vector_store %arg12[%c28_69, %c0_70], %99 {strides = array<i32>} : memref<100x384xf32, #tpu.memory_space<vmem>>, vector<4x256xf32>,
    %c239_i32_71 = arith.constant 239 : i32
    %101 = tpu.dynamic_rotate %61 by %c239_i32_71 dim 1 : vector<4x256xf32>, i32 -> vector<4x256xf32>
    %c17 = arith.constant 17 : index
    %c0_72 = arith.constant 0 : index
    %102 = vector.load %arg2[%c17, %c0_72] : memref<77x384xf32, #tpu.memory_space<vmem>>, vector<1x256xf32>
    %103 = vector.broadcast %102 : vector<1x256xf32> to vector<4x256xf32>
    %104 = arith.mulf %101, %103 : vector<4x256xf32>
    %c32_73 = arith.constant 32 : index
    %c0_74 = arith.constant 0 : index
    %105 = vector.load %arg12[%c32_73, %c0_74] : memref<100x384xf32, #tpu.memory_space<vmem>>, vector<4x256xf32>
    tpu.vector_store %arg12[%c32_73, %c0_74], %104 {strides = array<i32>} : memref<100x384xf32, #tpu.memory_space<vmem>>, vector<4x256xf32>,
    %c1_75 = arith.constant 1 : index
    %c0_76 = arith.constant 0 : index
    %c0_77 = arith.constant 0 : index
    %106 = vector.load %arg5[%c1_75, %c0_76, %c0_77] : memref<5x4x128xf32, #tpu.memory_space<vmem>>, vector<1x4x128xf32>
    %107 = vector.shape_cast %106 : vector<1x4x128xf32> to vector<4x128xf32>
    %108 = vector.extract_strided_slice %107 {offsets = [0, 0], sizes = [4, 36], strides = [1, 1]} : vector<4x128xf32> to vector<4x36xf32>
    %c0_78 = arith.constant 0 : index
    %c0_79 = arith.constant 0 : index
    %109 = vector.load %arg12[%c0_78, %c0_79] : memref<100x384xf32, #tpu.memory_space<vmem>>, vector<36x256xf32>
    %cst_80 = arith.constant dense<0.000000e+00> : vector<4x256xf32>
    %110 = tpu.matmul %108, %109, %cst_80 {dimension_numbers = #tpu.dot_dimension_numbers<[1], [0], [0], [1], [0, 0, 1, 1], [], []>} : vector<4x36xf32>, vector<36x256xf32>, vector<4x256xf32> -> vector<4x256xf32>
    %c4_81 = arith.constant 4 : index
    %c0_82 = arith.constant 0 : index
    %111 = vector.load %arg6[%c4_81, %c0_82] : memref<20x1xf32, #tpu.memory_space<vmem>>, vector<4x1xf32>
    %112 = vector.broadcast %111 : vector<4x1xf32> to vector<4x256xf32>
    %113 = arith.addf %110, %112 : vector<4x256xf32>
    %c102_i32 = arith.constant 102 : i32
    %114 = tpu.dynamic_rotate %113 by %c102_i32 dim 1 : vector<4x256xf32>, i32 -> vector<4x256xf32>
    %c18 = arith.constant 18 : index
    %c0_83 = arith.constant 0 : index
    %115 = vector.load %arg2[%c18, %c0_83] : memref<77x384xf32, #tpu.memory_space<vmem>>, vector<1x256xf32>
    %116 = vector.broadcast %115 : vector<1x256xf32> to vector<4x256xf32>
    %117 = arith.mulf %114, %116 : vector<4x256xf32>
    %c0_84 = arith.constant 0 : index
    %c0_85 = arith.constant 0 : index
    %118 = vector.load %arg12[%c0_84, %c0_85] : memref<100x384xf32, #tpu.memory_space<vmem>>, vector<4x256xf32>
    tpu.vector_store %arg12[%c0_84, %c0_85], %117 {strides = array<i32>} : memref<100x384xf32, #tpu.memory_space<vmem>>, vector<4x256xf32>,
    %c99_i32 = arith.constant 99 : i32
    %119 = tpu.dynamic_rotate %113 by %c99_i32 dim 1 : vector<4x256xf32>, i32 -> vector<4x256xf32>
    %c19 = arith.constant 19 : index
    %c0_86 = arith.constant 0 : index
    %120 = vector.load %arg2[%c19, %c0_86] : memref<77x384xf32, #tpu.memory_space<vmem>>, vector<1x256xf32>
    %121 = vector.broadcast %120 : vector<1x256xf32> to vector<4x256xf32>
    %122 = arith.mulf %119, %121 : vector<4x256xf32>
    %c4_87 = arith.constant 4 : index
    %c0_88 = arith.constant 0 : index
    %123 = vector.load %arg12[%c4_87, %c0_88] : memref<100x384xf32, #tpu.memory_space<vmem>>, vector<4x256xf32>
    tpu.vector_store %arg12[%c4_87, %c0_88], %122 {strides = array<i32>} : memref<100x384xf32, #tpu.memory_space<vmem>>, vector<4x256xf32>,
    %c96_i32 = arith.constant 96 : i32
    %124 = tpu.dynamic_rotate %113 by %c96_i32 dim 1 : vector<4x256xf32>, i32 -> vector<4x256xf32>
    %c20_89 = arith.constant 20 : index
    %c0_90 = arith.constant 0 : index
    %125 = vector.load %arg2[%c20_89, %c0_90] : memref<77x384xf32, #tpu.memory_space<vmem>>, vector<1x256xf32>
    %126 = vector.broadcast %125 : vector<1x256xf32> to vector<4x256xf32>
    %127 = arith.mulf %124, %126 : vector<4x256xf32>
    %c8_91 = arith.constant 8 : index
    %c0_92 = arith.constant 0 : index
    %128 = vector.load %arg12[%c8_91, %c0_92] : memref<100x384xf32, #tpu.memory_space<vmem>>, vector<4x256xf32>
    tpu.vector_store %arg12[%c8_91, %c0_92], %127 {strides = array<i32>} : memref<100x384xf32, #tpu.memory_space<vmem>>, vector<4x256xf32>,
    %c93_i32 = arith.constant 93 : i32
    %129 = tpu.dynamic_rotate %113 by %c93_i32 dim 1 : vector<4x256xf32>, i32 -> vector<4x256xf32>
    %c21 = arith.constant 21 : index
    %c0_93 = arith.constant 0 : index
    %130 = vector.load %arg2[%c21, %c0_93] : memref<77x384xf32, #tpu.memory_space<vmem>>, vector<1x256xf32>
    %131 = vector.broadcast %130 : vector<1x256xf32> to vector<4x256xf32>
    %132 = arith.mulf %129, %131 : vector<4x256xf32>
    %c12_94 = arith.constant 12 : index
    %c0_95 = arith.constant 0 : index
    %133 = vector.load %arg12[%c12_94, %c0_95] : memref<100x384xf32, #tpu.memory_space<vmem>>, vector<4x256xf32>
    tpu.vector_store %arg12[%c12_94, %c0_95], %132 {strides = array<i32>} : memref<100x384xf32, #tpu.memory_space<vmem>>, vector<4x256xf32>,
    %c90_i32 = arith.constant 90 : i32
    %134 = tpu.dynamic_rotate %113 by %c90_i32 dim 1 : vector<4x256xf32>, i32 -> vector<4x256xf32>
    %c22 = arith.constant 22 : index
    %c0_96 = arith.constant 0 : index
    %135 = vector.load %arg2[%c22, %c0_96] : memref<77x384xf32, #tpu.memory_space<vmem>>, vector<1x256xf32>
    %136 = vector.broadcast %135 : vector<1x256xf32> to vector<4x256xf32>
    %137 = arith.mulf %134, %136 : vector<4x256xf32>
    %c16_97 = arith.constant 16 : index
    %c0_98 = arith.constant 0 : index
    %138 = vector.load %arg12[%c16_97, %c0_98] : memref<100x384xf32, #tpu.memory_space<vmem>>, vector<4x256xf32>
    tpu.vector_store %arg12[%c16_97, %c0_98], %137 {strides = array<i32>} : memref<100x384xf32, #tpu.memory_space<vmem>>, vector<4x256xf32>,
    %c54_i32 = arith.constant 54 : i32
    %139 = tpu.dynamic_rotate %113 by %c54_i32 dim 1 : vector<4x256xf32>, i32 -> vector<4x256xf32>
    %c23 = arith.constant 23 : index
    %c0_99 = arith.constant 0 : index
    %140 = vector.load %arg2[%c23, %c0_99] : memref<77x384xf32, #tpu.memory_space<vmem>>, vector<1x256xf32>
    %141 = vector.broadcast %140 : vector<1x256xf32> to vector<4x256xf32>
    %142 = arith.mulf %139, %141 : vector<4x256xf32>
    %c20_100 = arith.constant 20 : index
    %c0_101 = arith.constant 0 : index
    %143 = vector.load %arg12[%c20_100, %c0_101] : memref<100x384xf32, #tpu.memory_space<vmem>>, vector<4x256xf32>
    tpu.vector_store %arg12[%c20_100, %c0_101], %142 {strides = array<i32>} : memref<100x384xf32, #tpu.memory_space<vmem>>, vector<4x256xf32>,
    %c51_i32 = arith.constant 51 : i32
    %144 = tpu.dynamic_rotate %113 by %c51_i32 dim 1 : vector<4x256xf32>, i32 -> vector<4x256xf32>
    %c24_102 = arith.constant 24 : index
    %c0_103 = arith.constant 0 : index
    %145 = vector.load %arg2[%c24_102, %c0_103] : memref<77x384xf32, #tpu.memory_space<vmem>>, vector<1x256xf32>
    %146 = vector.broadcast %145 : vector<1x256xf32> to vector<4x256xf32>
    %147 = arith.mulf %144, %146 : vector<4x256xf32>
    %c24_104 = arith.constant 24 : index
    %c0_105 = arith.constant 0 : index
    %148 = vector.load %arg12[%c24_104, %c0_105] : memref<100x384xf32, #tpu.memory_space<vmem>>, vector<4x256xf32>
    tpu.vector_store %arg12[%c24_104, %c0_105], %147 {strides = array<i32>} : memref<100x384xf32, #tpu.memory_space<vmem>>, vector<4x256xf32>,
    %c48_i32 = arith.constant 48 : i32
    %149 = tpu.dynamic_rotate %113 by %c48_i32 dim 1 : vector<4x256xf32>, i32 -> vector<4x256xf32>
    %c25 = arith.constant 25 : index
    %c0_106 = arith.constant 0 : index
    %150 = vector.load %arg2[%c25, %c0_106] : memref<77x384xf32, #tpu.memory_space<vmem>>, vector<1x256xf32>
    %151 = vector.broadcast %150 : vector<1x256xf32> to vector<4x256xf32>
    %152 = arith.mulf %149, %151 : vector<4x256xf32>
    %c28_107 = arith.constant 28 : index
    %c0_108 = arith.constant 0 : index
    %153 = vector.load %arg12[%c28_107, %c0_108] : memref<100x384xf32, #tpu.memory_space<vmem>>, vector<4x256xf32>
    tpu.vector_store %arg12[%c28_107, %c0_108], %152 {strides = array<i32>} : memref<100x384xf32, #tpu.memory_space<vmem>>, vector<4x256xf32>,
    %c45_i32 = arith.constant 45 : i32
    %154 = tpu.dynamic_rotate %113 by %c45_i32 dim 1 : vector<4x256xf32>, i32 -> vector<4x256xf32>
    %c26 = arith.constant 26 : index
    %c0_109 = arith.constant 0 : index
    %155 = vector.load %arg2[%c26, %c0_109] : memref<77x384xf32, #tpu.memory_space<vmem>>, vector<1x256xf32>
    %156 = vector.broadcast %155 : vector<1x256xf32> to vector<4x256xf32>
    %157 = arith.mulf %154, %156 : vector<4x256xf32>
    %c32_110 = arith.constant 32 : index
    %c0_111 = arith.constant 0 : index
    %158 = vector.load %arg12[%c32_110, %c0_111] : memref<100x384xf32, #tpu.memory_space<vmem>>, vector<4x256xf32>
    tpu.vector_store %arg12[%c32_110, %c0_111], %157 {strides = array<i32>} : memref<100x384xf32, #tpu.memory_space<vmem>>, vector<4x256xf32>,
    %c42_i32 = arith.constant 42 : i32
    %159 = tpu.dynamic_rotate %113 by %c42_i32 dim 1 : vector<4x256xf32>, i32 -> vector<4x256xf32>
    %c27 = arith.constant 27 : index
    %c0_112 = arith.constant 0 : index
    %160 = vector.load %arg2[%c27, %c0_112] : memref<77x384xf32, #tpu.memory_space<vmem>>, vector<1x256xf32>
    %161 = vector.broadcast %160 : vector<1x256xf32> to vector<4x256xf32>
    %162 = arith.mulf %159, %161 : vector<4x256xf32>
    %c36 = arith.constant 36 : index
    %c0_113 = arith.constant 0 : index
    %163 = vector.load %arg12[%c36, %c0_113] : memref<100x384xf32, #tpu.memory_space<vmem>>, vector<4x256xf32>
    tpu.vector_store %arg12[%c36, %c0_113], %162 {strides = array<i32>} : memref<100x384xf32, #tpu.memory_space<vmem>>, vector<4x256xf32>,
    %c6_i32 = arith.constant 6 : i32
    %164 = tpu.dynamic_rotate %113 by %c6_i32 dim 1 : vector<4x256xf32>, i32 -> vector<4x256xf32>
    %c28_114 = arith.constant 28 : index
    %c0_115 = arith.constant 0 : index
    %165 = vector.load %arg2[%c28_114, %c0_115] : memref<77x384xf32, #tpu.memory_space<vmem>>, vector<1x256xf32>
    %166 = vector.broadcast %165 : vector<1x256xf32> to vector<4x256xf32>
    %167 = arith.mulf %164, %166 : vector<4x256xf32>
    %c40 = arith.constant 40 : index
    %c0_116 = arith.constant 0 : index
    %168 = vector.load %arg12[%c40, %c0_116] : memref<100x384xf32, #tpu.memory_space<vmem>>, vector<4x256xf32>
    tpu.vector_store %arg12[%c40, %c0_116], %167 {strides = array<i32>} : memref<100x384xf32, #tpu.memory_space<vmem>>, vector<4x256xf32>,
    %c3_i32 = arith.constant 3 : i32
    %169 = tpu.dynamic_rotate %113 by %c3_i32 dim 1 : vector<4x256xf32>, i32 -> vector<4x256xf32>
    %c29 = arith.constant 29 : index
    %c0_117 = arith.constant 0 : index
    %170 = vector.load %arg2[%c29, %c0_117] : memref<77x384xf32, #tpu.memory_space<vmem>>, vector<1x256xf32>
    %171 = vector.broadcast %170 : vector<1x256xf32> to vector<4x256xf32>
    %172 = arith.mulf %169, %171 : vector<4x256xf32>
    %c44 = arith.constant 44 : index
    %c0_118 = arith.constant 0 : index
    %173 = vector.load %arg12[%c44, %c0_118] : memref<100x384xf32, #tpu.memory_space<vmem>>, vector<4x256xf32>
    tpu.vector_store %arg12[%c44, %c0_118], %172 {strides = array<i32>} : memref<100x384xf32, #tpu.memory_space<vmem>>, vector<4x256xf32>,
    %c30 = arith.constant 30 : index
    %c0_119 = arith.constant 0 : index
    %174 = vector.load %arg2[%c30, %c0_119] : memref<77x384xf32, #tpu.memory_space<vmem>>, vector<1x256xf32>
    %175 = vector.broadcast %174 : vector<1x256xf32> to vector<4x256xf32>
    %176 = arith.mulf %113, %175 : vector<4x256xf32>
    %c48 = arith.constant 48 : index
    %c0_120 = arith.constant 0 : index
    %177 = vector.load %arg12[%c48, %c0_120] : memref<100x384xf32, #tpu.memory_space<vmem>>, vector<4x256xf32>
    tpu.vector_store %arg12[%c48, %c0_120], %176 {strides = array<i32>} : memref<100x384xf32, #tpu.memory_space<vmem>>, vector<4x256xf32>,
    %c253_i32 = arith.constant 253 : i32
    %178 = tpu.dynamic_rotate %113 by %c253_i32 dim 1 : vector<4x256xf32>, i32 -> vector<4x256xf32>
    %c31 = arith.constant 31 : index
    %c0_121 = arith.constant 0 : index
    %179 = vector.load %arg2[%c31, %c0_121] : memref<77x384xf32, #tpu.memory_space<vmem>>, vector<1x256xf32>
    %180 = vector.broadcast %179 : vector<1x256xf32> to vector<4x256xf32>
    %181 = arith.mulf %178, %180 : vector<4x256xf32>
    %c52 = arith.constant 52 : index
    %c0_122 = arith.constant 0 : index
    %182 = vector.load %arg12[%c52, %c0_122] : memref<100x384xf32, #tpu.memory_space<vmem>>, vector<4x256xf32>
    tpu.vector_store %arg12[%c52, %c0_122], %181 {strides = array<i32>} : memref<100x384xf32, #tpu.memory_space<vmem>>, vector<4x256xf32>,
    %c250_i32 = arith.constant 250 : i32
    %183 = tpu.dynamic_rotate %113 by %c250_i32 dim 1 : vector<4x256xf32>, i32 -> vector<4x256xf32>
    %c32_123 = arith.constant 32 : index
    %c0_124 = arith.constant 0 : index
    %184 = vector.load %arg2[%c32_123, %c0_124] : memref<77x384xf32, #tpu.memory_space<vmem>>, vector<1x256xf32>
    %185 = vector.broadcast %184 : vector<1x256xf32> to vector<4x256xf32>
    %186 = arith.mulf %183, %185 : vector<4x256xf32>
    %c56 = arith.constant 56 : index
    %c0_125 = arith.constant 0 : index
    %187 = vector.load %arg12[%c56, %c0_125] : memref<100x384xf32, #tpu.memory_space<vmem>>, vector<4x256xf32>
    tpu.vector_store %arg12[%c56, %c0_125], %186 {strides = array<i32>} : memref<100x384xf32, #tpu.memory_space<vmem>>, vector<4x256xf32>,
    %c214_i32 = arith.constant 214 : i32
    %188 = tpu.dynamic_rotate %113 by %c214_i32 dim 1 : vector<4x256xf32>, i32 -> vector<4x256xf32>
    %c33 = arith.constant 33 : index
    %c0_126 = arith.constant 0 : index
    %189 = vector.load %arg2[%c33, %c0_126] : memref<77x384xf32, #tpu.memory_space<vmem>>, vector<1x256xf32>
    %190 = vector.broadcast %189 : vector<1x256xf32> to vector<4x256xf32>
    %191 = arith.mulf %188, %190 : vector<4x256xf32>
    %c60 = arith.constant 60 : index
    %c0_127 = arith.constant 0 : index
    %192 = vector.load %arg12[%c60, %c0_127] : memref<100x384xf32, #tpu.memory_space<vmem>>, vector<4x256xf32>
    tpu.vector_store %arg12[%c60, %c0_127], %191 {strides = array<i32>} : memref<100x384xf32, #tpu.memory_space<vmem>>, vector<4x256xf32>,
    %c211_i32 = arith.constant 211 : i32
    %193 = tpu.dynamic_rotate %113 by %c211_i32 dim 1 : vector<4x256xf32>, i32 -> vector<4x256xf32>
    %c34 = arith.constant 34 : index
    %c0_128 = arith.constant 0 : index
    %194 = vector.load %arg2[%c34, %c0_128] : memref<77x384xf32, #tpu.memory_space<vmem>>, vector<1x256xf32>
    %195 = vector.broadcast %194 : vector<1x256xf32> to vector<4x256xf32>
    %196 = arith.mulf %193, %195 : vector<4x256xf32>
    %c64 = arith.constant 64 : index
    %c0_129 = arith.constant 0 : index
    %197 = vector.load %arg12[%c64, %c0_129] : memref<100x384xf32, #tpu.memory_space<vmem>>, vector<4x256xf32>
    tpu.vector_store %arg12[%c64, %c0_129], %196 {strides = array<i32>} : memref<100x384xf32, #tpu.memory_space<vmem>>, vector<4x256xf32>,
    %c208_i32 = arith.constant 208 : i32
    %198 = tpu.dynamic_rotate %113 by %c208_i32 dim 1 : vector<4x256xf32>, i32 -> vector<4x256xf32>
    %c35 = arith.constant 35 : index
    %c0_130 = arith.constant 0 : index
    %199 = vector.load %arg2[%c35, %c0_130] : memref<77x384xf32, #tpu.memory_space<vmem>>, vector<1x256xf32>
    %200 = vector.broadcast %199 : vector<1x256xf32> to vector<4x256xf32>
    %201 = arith.mulf %198, %200 : vector<4x256xf32>
    %c68 = arith.constant 68 : index
    %c0_131 = arith.constant 0 : index
    %202 = vector.load %arg12[%c68, %c0_131] : memref<100x384xf32, #tpu.memory_space<vmem>>, vector<4x256xf32>
    tpu.vector_store %arg12[%c68, %c0_131], %201 {strides = array<i32>} : memref<100x384xf32, #tpu.memory_space<vmem>>, vector<4x256xf32>,
    %c205_i32 = arith.constant 205 : i32
    %203 = tpu.dynamic_rotate %113 by %c205_i32 dim 1 : vector<4x256xf32>, i32 -> vector<4x256xf32>
    %c36_132 = arith.constant 36 : index
    %c0_133 = arith.constant 0 : index
    %204 = vector.load %arg2[%c36_132, %c0_133] : memref<77x384xf32, #tpu.memory_space<vmem>>, vector<1x256xf32>
    %205 = vector.broadcast %204 : vector<1x256xf32> to vector<4x256xf32>
    %206 = arith.mulf %203, %205 : vector<4x256xf32>
    %c72 = arith.constant 72 : index
    %c0_134 = arith.constant 0 : index
    %207 = vector.load %arg12[%c72, %c0_134] : memref<100x384xf32, #tpu.memory_space<vmem>>, vector<4x256xf32>
    tpu.vector_store %arg12[%c72, %c0_134], %206 {strides = array<i32>} : memref<100x384xf32, #tpu.memory_space<vmem>>, vector<4x256xf32>,
    %c202_i32 = arith.constant 202 : i32
    %208 = tpu.dynamic_rotate %113 by %c202_i32 dim 1 : vector<4x256xf32>, i32 -> vector<4x256xf32>
    %c37 = arith.constant 37 : index
    %c0_135 = arith.constant 0 : index
    %209 = vector.load %arg2[%c37, %c0_135] : memref<77x384xf32, #tpu.memory_space<vmem>>, vector<1x256xf32>
    %210 = vector.broadcast %209 : vector<1x256xf32> to vector<4x256xf32>
    %211 = arith.mulf %208, %210 : vector<4x256xf32>
    %c76 = arith.constant 76 : index
    %c0_136 = arith.constant 0 : index
    %212 = vector.load %arg12[%c76, %c0_136] : memref<100x384xf32, #tpu.memory_space<vmem>>, vector<4x256xf32>
    tpu.vector_store %arg12[%c76, %c0_136], %211 {strides = array<i32>} : memref<100x384xf32, #tpu.memory_space<vmem>>, vector<4x256xf32>,
    %c166_i32 = arith.constant 166 : i32
    %213 = tpu.dynamic_rotate %113 by %c166_i32 dim 1 : vector<4x256xf32>, i32 -> vector<4x256xf32>
    %c38 = arith.constant 38 : index
    %c0_137 = arith.constant 0 : index
    %214 = vector.load %arg2[%c38, %c0_137] : memref<77x384xf32, #tpu.memory_space<vmem>>, vector<1x256xf32>
    %215 = vector.broadcast %214 : vector<1x256xf32> to vector<4x256xf32>
    %216 = arith.mulf %213, %215 : vector<4x256xf32>
    %c80 = arith.constant 80 : index
    %c0_138 = arith.constant 0 : index
    %217 = vector.load %arg12[%c80, %c0_138] : memref<100x384xf32, #tpu.memory_space<vmem>>, vector<4x256xf32>
    tpu.vector_store %arg12[%c80, %c0_138], %216 {strides = array<i32>} : memref<100x384xf32, #tpu.memory_space<vmem>>, vector<4x256xf32>,
    %c163_i32 = arith.constant 163 : i32
    %218 = tpu.dynamic_rotate %113 by %c163_i32 dim 1 : vector<4x256xf32>, i32 -> vector<4x256xf32>
    %c39 = arith.constant 39 : index
    %c0_139 = arith.constant 0 : index
    %219 = vector.load %arg2[%c39, %c0_139] : memref<77x384xf32, #tpu.memory_space<vmem>>, vector<1x256xf32>
    %220 = vector.broadcast %219 : vector<1x256xf32> to vector<4x256xf32>
    %221 = arith.mulf %218, %220 : vector<4x256xf32>
    %c84 = arith.constant 84 : index
    %c0_140 = arith.constant 0 : index
    %222 = vector.load %arg12[%c84, %c0_140] : memref<100x384xf32, #tpu.memory_space<vmem>>, vector<4x256xf32>
    tpu.vector_store %arg12[%c84, %c0_140], %221 {strides = array<i32>} : memref<100x384xf32, #tpu.memory_space<vmem>>, vector<4x256xf32>,
    %c160_i32 = arith.constant 160 : i32
    %223 = tpu.dynamic_rotate %113 by %c160_i32 dim 1 : vector<4x256xf32>, i32 -> vector<4x256xf32>
    %c40_141 = arith.constant 40 : index
    %c0_142 = arith.constant 0 : index
    %224 = vector.load %arg2[%c40_141, %c0_142] : memref<77x384xf32, #tpu.memory_space<vmem>>, vector<1x256xf32>
    %225 = vector.broadcast %224 : vector<1x256xf32> to vector<4x256xf32>
    %226 = arith.mulf %223, %225 : vector<4x256xf32>
    %c88 = arith.constant 88 : index
    %c0_143 = arith.constant 0 : index
    %227 = vector.load %arg12[%c88, %c0_143] : memref<100x384xf32, #tpu.memory_space<vmem>>, vector<4x256xf32>
    tpu.vector_store %arg12[%c88, %c0_143], %226 {strides = array<i32>} : memref<100x384xf32, #tpu.memory_space<vmem>>, vector<4x256xf32>,
    %c157_i32 = arith.constant 157 : i32
    %228 = tpu.dynamic_rotate %113 by %c157_i32 dim 1 : vector<4x256xf32>, i32 -> vector<4x256xf32>
    %c41 = arith.constant 41 : index
    %c0_144 = arith.constant 0 : index
    %229 = vector.load %arg2[%c41, %c0_144] : memref<77x384xf32, #tpu.memory_space<vmem>>, vector<1x256xf32>
    %230 = vector.broadcast %229 : vector<1x256xf32> to vector<4x256xf32>
    %231 = arith.mulf %228, %230 : vector<4x256xf32>
    %c92 = arith.constant 92 : index
    %c0_145 = arith.constant 0 : index
    %232 = vector.load %arg12[%c92, %c0_145] : memref<100x384xf32, #tpu.memory_space<vmem>>, vector<4x256xf32>
    tpu.vector_store %arg12[%c92, %c0_145], %231 {strides = array<i32>} : memref<100x384xf32, #tpu.memory_space<vmem>>, vector<4x256xf32>,
    %c154_i32 = arith.constant 154 : i32
    %233 = tpu.dynamic_rotate %113 by %c154_i32 dim 1 : vector<4x256xf32>, i32 -> vector<4x256xf32>
    %c42 = arith.constant 42 : index
    %c0_146 = arith.constant 0 : index
    %234 = vector.load %arg2[%c42, %c0_146] : memref<77x384xf32, #tpu.memory_space<vmem>>, vector<1x256xf32>
    %235 = vector.broadcast %234 : vector<1x256xf32> to vector<4x256xf32>
    %236 = arith.mulf %233, %235 : vector<4x256xf32>
    %c96 = arith.constant 96 : index
    %c0_147 = arith.constant 0 : index
    %237 = vector.load %arg12[%c96, %c0_147] : memref<100x384xf32, #tpu.memory_space<vmem>>, vector<4x256xf32>
    tpu.vector_store %arg12[%c96, %c0_147], %236 {strides = array<i32>} : memref<100x384xf32, #tpu.memory_space<vmem>>, vector<4x256xf32>,
    %c2_148 = arith.constant 2 : index
    %c0_149 = arith.constant 0 : index
    %c0_150 = arith.constant 0 : index
    %238 = vector.load %arg5[%c2_148, %c0_149, %c0_150] : memref<5x4x128xf32, #tpu.memory_space<vmem>>, vector<1x4x128xf32>
    %239 = vector.shape_cast %238 : vector<1x4x128xf32> to vector<4x128xf32>
    %240 = vector.extract_strided_slice %239 {offsets = [0, 0], sizes = [4, 100], strides = [1, 1]} : vector<4x128xf32> to vector<4x100xf32>
    %c0_151 = arith.constant 0 : index
    %c0_152 = arith.constant 0 : index
    %241 = vector.load %arg12[%c0_151, %c0_152] : memref<100x384xf32, #tpu.memory_space<vmem>>, vector<100x256xf32>
    %cst_153 = arith.constant dense<0.000000e+00> : vector<4x256xf32>
    %242 = tpu.matmul %240, %241, %cst_153 {dimension_numbers = #tpu.dot_dimension_numbers<[1], [0], [0], [1], [0, 0, 1, 1], [], []>} : vector<4x100xf32>, vector<100x256xf32>, vector<4x256xf32> -> vector<4x256xf32>
    %c8_154 = arith.constant 8 : index
    %c0_155 = arith.constant 0 : index
    %243 = vector.load %arg6[%c8_154, %c0_155] : memref<20x1xf32, #tpu.memory_space<vmem>>, vector<4x1xf32>
    %244 = vector.broadcast %243 : vector<4x1xf32> to vector<4x256xf32>
    %245 = arith.addf %242, %244 : vector<4x256xf32>
    %c4_156 = arith.constant 4 : index
    %c0_157 = arith.constant 0 : index
    %246 = vector.load %arg13[%c4_156, %c0_157] : memref<12x256xf32, #tpu.memory_space<vmem>>, vector<4x256xf32>
    tpu.vector_store %arg13[%c4_156, %c0_157], %245 {strides = array<i32>} : memref<12x256xf32, #tpu.memory_space<vmem>>, vector<4x256xf32>,
    %247 = vector.extract_strided_slice %6 {offsets = [8, 0], sizes = [4, 256], strides = [1, 1]} : vector<12x256xf32> to vector<4x256xf32>
    %c0_158 = arith.constant 0 : index
    %c0_159 = arith.constant 0 : index
    %248 = vector.load %arg9[%c0_158, %c0_159] : memref<256x384xf32, #tpu.memory_space<vmem>>, vector<256x384xf32>
    %cst_160 = arith.constant dense<0.000000e+00> : vector<4x384xf32>
    %249 = tpu.matmul %247, %248, %cst_160 {dimension_numbers = #tpu.dot_dimension_numbers<[1], [0], [0], [1], [0, 0, 1, 1], [], []>} : vector<4x256xf32>, vector<256x384xf32>, vector<4x384xf32> -> vector<4x384xf32>
    %c38_i32 = arith.constant 38 : i32
    %250 = tpu.dynamic_rotate %249 by %c38_i32 dim 1 : vector<4x384xf32>, i32 -> vector<4x384xf32>
    %c43 = arith.constant 43 : index
    %c0_161 = arith.constant 0 : index
    %251 = vector.load %arg2[%c43, %c0_161] : memref<77x384xf32, #tpu.memory_space<vmem>>, vector<1x384xf32>
    %252 = vector.broadcast %251 : vector<1x384xf32> to vector<4x384xf32>
    %253 = arith.mulf %250, %252 : vector<4x384xf32>
    %c0_162 = arith.constant 0 : index
    %c0_163 = arith.constant 0 : index
    %254 = vector.load %arg12[%c0_162, %c0_163] : memref<100x384xf32, #tpu.memory_space<vmem>>, vector<4x384xf32>
    tpu.vector_store %arg12[%c0_162, %c0_163], %253 {strides = array<i32>} : memref<100x384xf32, #tpu.memory_space<vmem>>, vector<4x384xf32>,
    %c37_i32 = arith.constant 37 : i32
    %255 = tpu.dynamic_rotate %249 by %c37_i32 dim 1 : vector<4x384xf32>, i32 -> vector<4x384xf32>
    %c44_164 = arith.constant 44 : index
    %c0_165 = arith.constant 0 : index
    %256 = vector.load %arg2[%c44_164, %c0_165] : memref<77x384xf32, #tpu.memory_space<vmem>>, vector<1x384xf32>
    %257 = vector.broadcast %256 : vector<1x384xf32> to vector<4x384xf32>
    %258 = arith.mulf %255, %257 : vector<4x384xf32>
    %c4_166 = arith.constant 4 : index
    %c0_167 = arith.constant 0 : index
    %259 = vector.load %arg12[%c4_166, %c0_167] : memref<100x384xf32, #tpu.memory_space<vmem>>, vector<4x384xf32>
    tpu.vector_store %arg12[%c4_166, %c0_167], %258 {strides = array<i32>} : memref<100x384xf32, #tpu.memory_space<vmem>>, vector<4x384xf32>,
    %c36_i32 = arith.constant 36 : i32
    %260 = tpu.dynamic_rotate %249 by %c36_i32 dim 1 : vector<4x384xf32>, i32 -> vector<4x384xf32>
    %c45 = arith.constant 45 : index
    %c0_168 = arith.constant 0 : index
    %261 = vector.load %arg2[%c45, %c0_168] : memref<77x384xf32, #tpu.memory_space<vmem>>, vector<1x384xf32>
    %262 = vector.broadcast %261 : vector<1x384xf32> to vector<4x384xf32>
    %263 = arith.mulf %260, %262 : vector<4x384xf32>
    %c8_169 = arith.constant 8 : index
    %c0_170 = arith.constant 0 : index
    %264 = vector.load %arg12[%c8_169, %c0_170] : memref<100x384xf32, #tpu.memory_space<vmem>>, vector<4x384xf32>
    tpu.vector_store %arg12[%c8_169, %c0_170], %263 {strides = array<i32>} : memref<100x384xf32, #tpu.memory_space<vmem>>, vector<4x384xf32>,
    %c35_i32 = arith.constant 35 : i32
    %265 = tpu.dynamic_rotate %249 by %c35_i32 dim 1 : vector<4x384xf32>, i32 -> vector<4x384xf32>
    %c46 = arith.constant 46 : index
    %c0_171 = arith.constant 0 : index
    %266 = vector.load %arg2[%c46, %c0_171] : memref<77x384xf32, #tpu.memory_space<vmem>>, vector<1x384xf32>
    %267 = vector.broadcast %266 : vector<1x384xf32> to vector<4x384xf32>
    %268 = arith.mulf %265, %267 : vector<4x384xf32>
    %c12_172 = arith.constant 12 : index
    %c0_173 = arith.constant 0 : index
    %269 = vector.load %arg12[%c12_172, %c0_173] : memref<100x384xf32, #tpu.memory_space<vmem>>, vector<4x384xf32>
    tpu.vector_store %arg12[%c12_172, %c0_173], %268 {strides = array<i32>} : memref<100x384xf32, #tpu.memory_space<vmem>>, vector<4x384xf32>,
    %c34_i32 = arith.constant 34 : i32
    %270 = tpu.dynamic_rotate %249 by %c34_i32 dim 1 : vector<4x384xf32>, i32 -> vector<4x384xf32>
    %c47 = arith.constant 47 : index
    %c0_174 = arith.constant 0 : index
    %271 = vector.load %arg2[%c47, %c0_174] : memref<77x384xf32, #tpu.memory_space<vmem>>, vector<1x384xf32>
    %272 = vector.broadcast %271 : vector<1x384xf32> to vector<4x384xf32>
    %273 = arith.mulf %270, %272 : vector<4x384xf32>
    %c16_175 = arith.constant 16 : index
    %c0_176 = arith.constant 0 : index
    %274 = vector.load %arg12[%c16_175, %c0_176] : memref<100x384xf32, #tpu.memory_space<vmem>>, vector<4x384xf32>
    tpu.vector_store %arg12[%c16_175, %c0_176], %273 {strides = array<i32>} : memref<100x384xf32, #tpu.memory_space<vmem>>, vector<4x384xf32>,
    %c20_i32 = arith.constant 20 : i32
    %275 = tpu.dynamic_rotate %249 by %c20_i32 dim 1 : vector<4x384xf32>, i32 -> vector<4x384xf32>
    %c48_177 = arith.constant 48 : index
    %c0_178 = arith.constant 0 : index
    %276 = vector.load %arg2[%c48_177, %c0_178] : memref<77x384xf32, #tpu.memory_space<vmem>>, vector<1x384xf32>
    %277 = vector.broadcast %276 : vector<1x384xf32> to vector<4x384xf32>
    %278 = arith.mulf %275, %277 : vector<4x384xf32>
    %c20_179 = arith.constant 20 : index
    %c0_180 = arith.constant 0 : index
    %279 = vector.load %arg12[%c20_179, %c0_180] : memref<100x384xf32, #tpu.memory_space<vmem>>, vector<4x384xf32>
    tpu.vector_store %arg12[%c20_179, %c0_180], %278 {strides = array<i32>} : memref<100x384xf32, #tpu.memory_space<vmem>>, vector<4x384xf32>,
    %c19_i32 = arith.constant 19 : i32
    %280 = tpu.dynamic_rotate %249 by %c19_i32 dim 1 : vector<4x384xf32>, i32 -> vector<4x384xf32>
    %c49 = arith.constant 49 : index
    %c0_181 = arith.constant 0 : index
    %281 = vector.load %arg2[%c49, %c0_181] : memref<77x384xf32, #tpu.memory_space<vmem>>, vector<1x384xf32>
    %282 = vector.broadcast %281 : vector<1x384xf32> to vector<4x384xf32>
    %283 = arith.mulf %280, %282 : vector<4x384xf32>
    %c24_182 = arith.constant 24 : index
    %c0_183 = arith.constant 0 : index
    %284 = vector.load %arg12[%c24_182, %c0_183] : memref<100x384xf32, #tpu.memory_space<vmem>>, vector<4x384xf32>
    tpu.vector_store %arg12[%c24_182, %c0_183], %283 {strides = array<i32>} : memref<100x384xf32, #tpu.memory_space<vmem>>, vector<4x384xf32>,
    %c18_i32 = arith.constant 18 : i32
    %285 = tpu.dynamic_rotate %249 by %c18_i32 dim 1 : vector<4x384xf32>, i32 -> vector<4x384xf32>
    %c50 = arith.constant 50 : index
    %c0_184 = arith.constant 0 : index
    %286 = vector.load %arg2[%c50, %c0_184] : memref<77x384xf32, #tpu.memory_space<vmem>>, vector<1x384xf32>
    %287 = vector.broadcast %286 : vector<1x384xf32> to vector<4x384xf32>
    %288 = arith.mulf %285, %287 : vector<4x384xf32>
    %c28_185 = arith.constant 28 : index
    %c0_186 = arith.constant 0 : index
    %289 = vector.load %arg12[%c28_185, %c0_186] : memref<100x384xf32, #tpu.memory_space<vmem>>, vector<4x384xf32>
    tpu.vector_store %arg12[%c28_185, %c0_186], %288 {strides = array<i32>} : memref<100x384xf32, #tpu.memory_space<vmem>>, vector<4x384xf32>,
    %c17_i32_187 = arith.constant 17 : i32
    %290 = tpu.dynamic_rotate %249 by %c17_i32_187 dim 1 : vector<4x384xf32>, i32 -> vector<4x384xf32>
    %c51 = arith.constant 51 : index
    %c0_188 = arith.constant 0 : index
    %291 = vector.load %arg2[%c51, %c0_188] : memref<77x384xf32, #tpu.memory_space<vmem>>, vector<1x384xf32>
    %292 = vector.broadcast %291 : vector<1x384xf32> to vector<4x384xf32>
    %293 = arith.mulf %290, %292 : vector<4x384xf32>
    %c32_189 = arith.constant 32 : index
    %c0_190 = arith.constant 0 : index
    %294 = vector.load %arg12[%c32_189, %c0_190] : memref<100x384xf32, #tpu.memory_space<vmem>>, vector<4x384xf32>
    tpu.vector_store %arg12[%c32_189, %c0_190], %293 {strides = array<i32>} : memref<100x384xf32, #tpu.memory_space<vmem>>, vector<4x384xf32>,
    %c16_i32_191 = arith.constant 16 : i32
    %295 = tpu.dynamic_rotate %249 by %c16_i32_191 dim 1 : vector<4x384xf32>, i32 -> vector<4x384xf32>
    %c52_192 = arith.constant 52 : index
    %c0_193 = arith.constant 0 : index
    %296 = vector.load %arg2[%c52_192, %c0_193] : memref<77x384xf32, #tpu.memory_space<vmem>>, vector<1x384xf32>
    %297 = vector.broadcast %296 : vector<1x384xf32> to vector<4x384xf32>
    %298 = arith.mulf %295, %297 : vector<4x384xf32>
    %c36_194 = arith.constant 36 : index
    %c0_195 = arith.constant 0 : index
    %299 = vector.load %arg12[%c36_194, %c0_195] : memref<100x384xf32, #tpu.memory_space<vmem>>, vector<4x384xf32>
    tpu.vector_store %arg12[%c36_194, %c0_195], %298 {strides = array<i32>} : memref<100x384xf32, #tpu.memory_space<vmem>>, vector<4x384xf32>,
    %c2_i32 = arith.constant 2 : i32
    %300 = tpu.dynamic_rotate %249 by %c2_i32 dim 1 : vector<4x384xf32>, i32 -> vector<4x384xf32>
    %c53 = arith.constant 53 : index
    %c0_196 = arith.constant 0 : index
    %301 = vector.load %arg2[%c53, %c0_196] : memref<77x384xf32, #tpu.memory_space<vmem>>, vector<1x384xf32>
    %302 = vector.broadcast %301 : vector<1x384xf32> to vector<4x384xf32>
    %303 = arith.mulf %300, %302 : vector<4x384xf32>
    %c40_197 = arith.constant 40 : index
    %c0_198 = arith.constant 0 : index
    %304 = vector.load %arg12[%c40_197, %c0_198] : memref<100x384xf32, #tpu.memory_space<vmem>>, vector<4x384xf32>
    tpu.vector_store %arg12[%c40_197, %c0_198], %303 {strides = array<i32>} : memref<100x384xf32, #tpu.memory_space<vmem>>, vector<4x384xf32>,
    %c1_i32_199 = arith.constant 1 : i32
    %305 = tpu.dynamic_rotate %249 by %c1_i32_199 dim 1 : vector<4x384xf32>, i32 -> vector<4x384xf32>
    %c54 = arith.constant 54 : index
    %c0_200 = arith.constant 0 : index
    %306 = vector.load %arg2[%c54, %c0_200] : memref<77x384xf32, #tpu.memory_space<vmem>>, vector<1x384xf32>
    %307 = vector.broadcast %306 : vector<1x384xf32> to vector<4x384xf32>
    %308 = arith.mulf %305, %307 : vector<4x384xf32>
    %c44_201 = arith.constant 44 : index
    %c0_202 = arith.constant 0 : index
    %309 = vector.load %arg12[%c44_201, %c0_202] : memref<100x384xf32, #tpu.memory_space<vmem>>, vector<4x384xf32>
    tpu.vector_store %arg12[%c44_201, %c0_202], %308 {strides = array<i32>} : memref<100x384xf32, #tpu.memory_space<vmem>>, vector<4x384xf32>,
    %c55 = arith.constant 55 : index
    %c0_203 = arith.constant 0 : index
    %310 = vector.load %arg2[%c55, %c0_203] : memref<77x384xf32, #tpu.memory_space<vmem>>, vector<1x384xf32>
    %311 = vector.broadcast %310 : vector<1x384xf32> to vector<4x384xf32>
    %312 = arith.mulf %249, %311 : vector<4x384xf32>
    %c48_204 = arith.constant 48 : index
    %c0_205 = arith.constant 0 : index
    %313 = vector.load %arg12[%c48_204, %c0_205] : memref<100x384xf32, #tpu.memory_space<vmem>>, vector<4x384xf32>
    tpu.vector_store %arg12[%c48_204, %c0_205], %312 {strides = array<i32>} : memref<100x384xf32, #tpu.memory_space<vmem>>, vector<4x384xf32>,
    %c383_i32 = arith.constant 383 : i32
    %314 = tpu.dynamic_rotate %249 by %c383_i32 dim 1 : vector<4x384xf32>, i32 -> vector<4x384xf32>
    %c56_206 = arith.constant 56 : index
    %c0_207 = arith.constant 0 : index
    %315 = vector.load %arg2[%c56_206, %c0_207] : memref<77x384xf32, #tpu.memory_space<vmem>>, vector<1x384xf32>
    %316 = vector.broadcast %315 : vector<1x384xf32> to vector<4x384xf32>
    %317 = arith.mulf %314, %316 : vector<4x384xf32>
    %c52_208 = arith.constant 52 : index
    %c0_209 = arith.constant 0 : index
    %318 = vector.load %arg12[%c52_208, %c0_209] : memref<100x384xf32, #tpu.memory_space<vmem>>, vector<4x384xf32>
    tpu.vector_store %arg12[%c52_208, %c0_209], %317 {strides = array<i32>} : memref<100x384xf32, #tpu.memory_space<vmem>>, vector<4x384xf32>,
    %c382_i32 = arith.constant 382 : i32
    %319 = tpu.dynamic_rotate %249 by %c382_i32 dim 1 : vector<4x384xf32>, i32 -> vector<4x384xf32>
    %c57 = arith.constant 57 : index
    %c0_210 = arith.constant 0 : index
    %320 = vector.load %arg2[%c57, %c0_210] : memref<77x384xf32, #tpu.memory_space<vmem>>, vector<1x384xf32>
    %321 = vector.broadcast %320 : vector<1x384xf32> to vector<4x384xf32>
    %322 = arith.mulf %319, %321 : vector<4x384xf32>
    %c56_211 = arith.constant 56 : index
    %c0_212 = arith.constant 0 : index
    %323 = vector.load %arg12[%c56_211, %c0_212] : memref<100x384xf32, #tpu.memory_space<vmem>>, vector<4x384xf32>
    tpu.vector_store %arg12[%c56_211, %c0_212], %322 {strides = array<i32>} : memref<100x384xf32, #tpu.memory_space<vmem>>, vector<4x384xf32>,
    %c368_i32 = arith.constant 368 : i32
    %324 = tpu.dynamic_rotate %249 by %c368_i32 dim 1 : vector<4x384xf32>, i32 -> vector<4x384xf32>
    %c58 = arith.constant 58 : index
    %c0_213 = arith.constant 0 : index
    %325 = vector.load %arg2[%c58, %c0_213] : memref<77x384xf32, #tpu.memory_space<vmem>>, vector<1x384xf32>
    %326 = vector.broadcast %325 : vector<1x384xf32> to vector<4x384xf32>
    %327 = arith.mulf %324, %326 : vector<4x384xf32>
    %c60_214 = arith.constant 60 : index
    %c0_215 = arith.constant 0 : index
    %328 = vector.load %arg12[%c60_214, %c0_215] : memref<100x384xf32, #tpu.memory_space<vmem>>, vector<4x384xf32>
    tpu.vector_store %arg12[%c60_214, %c0_215], %327 {strides = array<i32>} : memref<100x384xf32, #tpu.memory_space<vmem>>, vector<4x384xf32>,
    %c367_i32 = arith.constant 367 : i32
    %329 = tpu.dynamic_rotate %249 by %c367_i32 dim 1 : vector<4x384xf32>, i32 -> vector<4x384xf32>
    %c59 = arith.constant 59 : index
    %c0_216 = arith.constant 0 : index
    %330 = vector.load %arg2[%c59, %c0_216] : memref<77x384xf32, #tpu.memory_space<vmem>>, vector<1x384xf32>
    %331 = vector.broadcast %330 : vector<1x384xf32> to vector<4x384xf32>
    %332 = arith.mulf %329, %331 : vector<4x384xf32>
    %c64_217 = arith.constant 64 : index
    %c0_218 = arith.constant 0 : index
    %333 = vector.load %arg12[%c64_217, %c0_218] : memref<100x384xf32, #tpu.memory_space<vmem>>, vector<4x384xf32>
    tpu.vector_store %arg12[%c64_217, %c0_218], %332 {strides = array<i32>} : memref<100x384xf32, #tpu.memory_space<vmem>>, vector<4x384xf32>,
    %c366_i32 = arith.constant 366 : i32
    %334 = tpu.dynamic_rotate %249 by %c366_i32 dim 1 : vector<4x384xf32>, i32 -> vector<4x384xf32>
    %c60_219 = arith.constant 60 : index
    %c0_220 = arith.constant 0 : index
    %335 = vector.load %arg2[%c60_219, %c0_220] : memref<77x384xf32, #tpu.memory_space<vmem>>, vector<1x384xf32>
    %336 = vector.broadcast %335 : vector<1x384xf32> to vector<4x384xf32>
    %337 = arith.mulf %334, %336 : vector<4x384xf32>
    %c68_221 = arith.constant 68 : index
    %c0_222 = arith.constant 0 : index
    %338 = vector.load %arg12[%c68_221, %c0_222] : memref<100x384xf32, #tpu.memory_space<vmem>>, vector<4x384xf32>
    tpu.vector_store %arg12[%c68_221, %c0_222], %337 {strides = array<i32>} : memref<100x384xf32, #tpu.memory_space<vmem>>, vector<4x384xf32>,
    %c365_i32 = arith.constant 365 : i32
    %339 = tpu.dynamic_rotate %249 by %c365_i32 dim 1 : vector<4x384xf32>, i32 -> vector<4x384xf32>
    %c61 = arith.constant 61 : index
    %c0_223 = arith.constant 0 : index
    %340 = vector.load %arg2[%c61, %c0_223] : memref<77x384xf32, #tpu.memory_space<vmem>>, vector<1x384xf32>
    %341 = vector.broadcast %340 : vector<1x384xf32> to vector<4x384xf32>
    %342 = arith.mulf %339, %341 : vector<4x384xf32>
    %c72_224 = arith.constant 72 : index
    %c0_225 = arith.constant 0 : index
    %343 = vector.load %arg12[%c72_224, %c0_225] : memref<100x384xf32, #tpu.memory_space<vmem>>, vector<4x384xf32>
    tpu.vector_store %arg12[%c72_224, %c0_225], %342 {strides = array<i32>} : memref<100x384xf32, #tpu.memory_space<vmem>>, vector<4x384xf32>,
    %c364_i32 = arith.constant 364 : i32
    %344 = tpu.dynamic_rotate %249 by %c364_i32 dim 1 : vector<4x384xf32>, i32 -> vector<4x384xf32>
    %c62 = arith.constant 62 : index
    %c0_226 = arith.constant 0 : index
    %345 = vector.load %arg2[%c62, %c0_226] : memref<77x384xf32, #tpu.memory_space<vmem>>, vector<1x384xf32>
    %346 = vector.broadcast %345 : vector<1x384xf32> to vector<4x384xf32>
    %347 = arith.mulf %344, %346 : vector<4x384xf32>
    %c76_227 = arith.constant 76 : index
    %c0_228 = arith.constant 0 : index
    %348 = vector.load %arg12[%c76_227, %c0_228] : memref<100x384xf32, #tpu.memory_space<vmem>>, vector<4x384xf32>
    tpu.vector_store %arg12[%c76_227, %c0_228], %347 {strides = array<i32>} : memref<100x384xf32, #tpu.memory_space<vmem>>, vector<4x384xf32>,
    %c350_i32 = arith.constant 350 : i32
    %349 = tpu.dynamic_rotate %249 by %c350_i32 dim 1 : vector<4x384xf32>, i32 -> vector<4x384xf32>
    %c63 = arith.constant 63 : index
    %c0_229 = arith.constant 0 : index
    %350 = vector.load %arg2[%c63, %c0_229] : memref<77x384xf32, #tpu.memory_space<vmem>>, vector<1x384xf32>
    %351 = vector.broadcast %350 : vector<1x384xf32> to vector<4x384xf32>
    %352 = arith.mulf %349, %351 : vector<4x384xf32>
    %c80_230 = arith.constant 80 : index
    %c0_231 = arith.constant 0 : index
    %353 = vector.load %arg12[%c80_230, %c0_231] : memref<100x384xf32, #tpu.memory_space<vmem>>, vector<4x384xf32>
    tpu.vector_store %arg12[%c80_230, %c0_231], %352 {strides = array<i32>} : memref<100x384xf32, #tpu.memory_space<vmem>>, vector<4x384xf32>,
    %c349_i32 = arith.constant 349 : i32
    %354 = tpu.dynamic_rotate %249 by %c349_i32 dim 1 : vector<4x384xf32>, i32 -> vector<4x384xf32>
    %c64_232 = arith.constant 64 : index
    %c0_233 = arith.constant 0 : index
    %355 = vector.load %arg2[%c64_232, %c0_233] : memref<77x384xf32, #tpu.memory_space<vmem>>, vector<1x384xf32>
    %356 = vector.broadcast %355 : vector<1x384xf32> to vector<4x384xf32>
    %357 = arith.mulf %354, %356 : vector<4x384xf32>
    %c84_234 = arith.constant 84 : index
    %c0_235 = arith.constant 0 : index
    %358 = vector.load %arg12[%c84_234, %c0_235] : memref<100x384xf32, #tpu.memory_space<vmem>>, vector<4x384xf32>
    tpu.vector_store %arg12[%c84_234, %c0_235], %357 {strides = array<i32>} : memref<100x384xf32, #tpu.memory_space<vmem>>, vector<4x384xf32>,
    %c348_i32 = arith.constant 348 : i32
    %359 = tpu.dynamic_rotate %249 by %c348_i32 dim 1 : vector<4x384xf32>, i32 -> vector<4x384xf32>
    %c65 = arith.constant 65 : index
    %c0_236 = arith.constant 0 : index
    %360 = vector.load %arg2[%c65, %c0_236] : memref<77x384xf32, #tpu.memory_space<vmem>>, vector<1x384xf32>
    %361 = vector.broadcast %360 : vector<1x384xf32> to vector<4x384xf32>
    %362 = arith.mulf %359, %361 : vector<4x384xf32>
    %c88_237 = arith.constant 88 : index
    %c0_238 = arith.constant 0 : index
    %363 = vector.load %arg12[%c88_237, %c0_238] : memref<100x384xf32, #tpu.memory_space<vmem>>, vector<4x384xf32>
    tpu.vector_store %arg12[%c88_237, %c0_238], %362 {strides = array<i32>} : memref<100x384xf32, #tpu.memory_space<vmem>>, vector<4x384xf32>,
    %c347_i32 = arith.constant 347 : i32
    %364 = tpu.dynamic_rotate %249 by %c347_i32 dim 1 : vector<4x384xf32>, i32 -> vector<4x384xf32>
    %c66 = arith.constant 66 : index
    %c0_239 = arith.constant 0 : index
    %365 = vector.load %arg2[%c66, %c0_239] : memref<77x384xf32, #tpu.memory_space<vmem>>, vector<1x384xf32>
    %366 = vector.broadcast %365 : vector<1x384xf32> to vector<4x384xf32>
    %367 = arith.mulf %364, %366 : vector<4x384xf32>
    %c92_240 = arith.constant 92 : index
    %c0_241 = arith.constant 0 : index
    %368 = vector.load %arg12[%c92_240, %c0_241] : memref<100x384xf32, #tpu.memory_space<vmem>>, vector<4x384xf32>
    tpu.vector_store %arg12[%c92_240, %c0_241], %367 {strides = array<i32>} : memref<100x384xf32, #tpu.memory_space<vmem>>, vector<4x384xf32>,
    %c346_i32 = arith.constant 346 : i32
    %369 = tpu.dynamic_rotate %249 by %c346_i32 dim 1 : vector<4x384xf32>, i32 -> vector<4x384xf32>
    %c67 = arith.constant 67 : index
    %c0_242 = arith.constant 0 : index
    %370 = vector.load %arg2[%c67, %c0_242] : memref<77x384xf32, #tpu.memory_space<vmem>>, vector<1x384xf32>
    %371 = vector.broadcast %370 : vector<1x384xf32> to vector<4x384xf32>
    %372 = arith.mulf %369, %371 : vector<4x384xf32>
    %c96_243 = arith.constant 96 : index
    %c0_244 = arith.constant 0 : index
    %373 = vector.load %arg12[%c96_243, %c0_244] : memref<100x384xf32, #tpu.memory_space<vmem>>, vector<4x384xf32>
    tpu.vector_store %arg12[%c96_243, %c0_244], %372 {strides = array<i32>} : memref<100x384xf32, #tpu.memory_space<vmem>>, vector<4x384xf32>,
    %c3_245 = arith.constant 3 : index
    %c0_246 = arith.constant 0 : index
    %c0_247 = arith.constant 0 : index
    %374 = vector.load %arg5[%c3_245, %c0_246, %c0_247] : memref<5x4x128xf32, #tpu.memory_space<vmem>>, vector<1x4x128xf32>
    %375 = vector.shape_cast %374 : vector<1x4x128xf32> to vector<4x128xf32>
    %376 = vector.extract_strided_slice %375 {offsets = [0, 0], sizes = [4, 100], strides = [1, 1]} : vector<4x128xf32> to vector<4x100xf32>
    %c0_248 = arith.constant 0 : index
    %c0_249 = arith.constant 0 : index
    %377 = vector.load %arg12[%c0_248, %c0_249] : memref<100x384xf32, #tpu.memory_space<vmem>>, vector<100x384xf32>
    %cst_250 = arith.constant dense<0.000000e+00> : vector<4x384xf32>
    %378 = tpu.matmul %376, %377, %cst_250 {dimension_numbers = #tpu.dot_dimension_numbers<[1], [0], [0], [1], [0, 0, 1, 1], [], []>} : vector<4x100xf32>, vector<100x384xf32>, vector<4x384xf32> -> vector<4x384xf32>
    %c12_251 = arith.constant 12 : index
    %c0_252 = arith.constant 0 : index
    %379 = vector.load %arg6[%c12_251, %c0_252] : memref<20x1xf32, #tpu.memory_space<vmem>>, vector<4x1xf32>
    %380 = vector.broadcast %379 : vector<4x1xf32> to vector<4x384xf32>
    %381 = arith.addf %378, %380 : vector<4x384xf32>
    %c95_i32 = arith.constant 95 : i32
    %382 = tpu.dynamic_rotate %381 by %c95_i32 dim 1 : vector<4x384xf32>, i32 -> vector<4x384xf32>
    %c68_253 = arith.constant 68 : index
    %c0_254 = arith.constant 0 : index
    %383 = vector.load %arg2[%c68_253, %c0_254] : memref<77x384xf32, #tpu.memory_space<vmem>>, vector<1x384xf32>
    %384 = vector.broadcast %383 : vector<1x384xf32> to vector<4x384xf32>
    %385 = arith.mulf %382, %384 : vector<4x384xf32>
    %c0_255 = arith.constant 0 : index
    %c0_256 = arith.constant 0 : index
    %386 = vector.load %arg12[%c0_255, %c0_256] : memref<100x384xf32, #tpu.memory_space<vmem>>, vector<4x384xf32>
    tpu.vector_store %arg12[%c0_255, %c0_256], %385 {strides = array<i32>} : memref<100x384xf32, #tpu.memory_space<vmem>>, vector<4x384xf32>,
    %c90_i32_257 = arith.constant 90 : i32
    %387 = tpu.dynamic_rotate %381 by %c90_i32_257 dim 1 : vector<4x384xf32>, i32 -> vector<4x384xf32>
    %c69 = arith.constant 69 : index
    %c0_258 = arith.constant 0 : index
    %388 = vector.load %arg2[%c69, %c0_258] : memref<77x384xf32, #tpu.memory_space<vmem>>, vector<1x384xf32>
    %389 = vector.broadcast %388 : vector<1x384xf32> to vector<4x384xf32>
    %390 = arith.mulf %387, %389 : vector<4x384xf32>
    %c4_259 = arith.constant 4 : index
    %c0_260 = arith.constant 0 : index
    %391 = vector.load %arg12[%c4_259, %c0_260] : memref<100x384xf32, #tpu.memory_space<vmem>>, vector<4x384xf32>
    tpu.vector_store %arg12[%c4_259, %c0_260], %390 {strides = array<i32>} : memref<100x384xf32, #tpu.memory_space<vmem>>, vector<4x384xf32>,
    %c85_i32 = arith.constant 85 : i32
    %392 = tpu.dynamic_rotate %381 by %c85_i32 dim 1 : vector<4x384xf32>, i32 -> vector<4x384xf32>
    %c70 = arith.constant 70 : index
    %c0_261 = arith.constant 0 : index
    %393 = vector.load %arg2[%c70, %c0_261] : memref<77x384xf32, #tpu.memory_space<vmem>>, vector<1x384xf32>
    %394 = vector.broadcast %393 : vector<1x384xf32> to vector<4x384xf32>
    %395 = arith.mulf %392, %394 : vector<4x384xf32>
    %c8_262 = arith.constant 8 : index
    %c0_263 = arith.constant 0 : index
    %396 = vector.load %arg12[%c8_262, %c0_263] : memref<100x384xf32, #tpu.memory_space<vmem>>, vector<4x384xf32>
    tpu.vector_store %arg12[%c8_262, %c0_263], %395 {strides = array<i32>} : memref<100x384xf32, #tpu.memory_space<vmem>>, vector<4x384xf32>,
    %c5_i32 = arith.constant 5 : i32
    %397 = tpu.dynamic_rotate %381 by %c5_i32 dim 1 : vector<4x384xf32>, i32 -> vector<4x384xf32>
    %c71 = arith.constant 71 : index
    %c0_264 = arith.constant 0 : index
    %398 = vector.load %arg2[%c71, %c0_264] : memref<77x384xf32, #tpu.memory_space<vmem>>, vector<1x384xf32>
    %399 = vector.broadcast %398 : vector<1x384xf32> to vector<4x384xf32>
    %400 = arith.mulf %397, %399 : vector<4x384xf32>
    %c12_265 = arith.constant 12 : index
    %c0_266 = arith.constant 0 : index
    %401 = vector.load %arg12[%c12_265, %c0_266] : memref<100x384xf32, #tpu.memory_space<vmem>>, vector<4x384xf32>
    tpu.vector_store %arg12[%c12_265, %c0_266], %400 {strides = array<i32>} : memref<100x384xf32, #tpu.memory_space<vmem>>, vector<4x384xf32>,
    %c72_267 = arith.constant 72 : index
    %c0_268 = arith.constant 0 : index
    %402 = vector.load %arg2[%c72_267, %c0_268] : memref<77x384xf32, #tpu.memory_space<vmem>>, vector<1x384xf32>
    %403 = vector.broadcast %402 : vector<1x384xf32> to vector<4x384xf32>
    %404 = arith.mulf %381, %403 : vector<4x384xf32>
    %c16_269 = arith.constant 16 : index
    %c0_270 = arith.constant 0 : index
    %405 = vector.load %arg12[%c16_269, %c0_270] : memref<100x384xf32, #tpu.memory_space<vmem>>, vector<4x384xf32>
    tpu.vector_store %arg12[%c16_269, %c0_270], %404 {strides = array<i32>} : memref<100x384xf32, #tpu.memory_space<vmem>>, vector<4x384xf32>,
    %c379_i32 = arith.constant 379 : i32
    %406 = tpu.dynamic_rotate %381 by %c379_i32 dim 1 : vector<4x384xf32>, i32 -> vector<4x384xf32>
    %c73 = arith.constant 73 : index
    %c0_271 = arith.constant 0 : index
    %407 = vector.load %arg2[%c73, %c0_271] : memref<77x384xf32, #tpu.memory_space<vmem>>, vector<1x384xf32>
    %408 = vector.broadcast %407 : vector<1x384xf32> to vector<4x384xf32>
    %409 = arith.mulf %406, %408 : vector<4x384xf32>
    %c20_272 = arith.constant 20 : index
    %c0_273 = arith.constant 0 : index
    %410 = vector.load %arg12[%c20_272, %c0_273] : memref<100x384xf32, #tpu.memory_space<vmem>>, vector<4x384xf32>
    tpu.vector_store %arg12[%c20_272, %c0_273], %409 {strides = array<i32>} : memref<100x384xf32, #tpu.memory_space<vmem>>, vector<4x384xf32>,
    %c299_i32 = arith.constant 299 : i32
    %411 = tpu.dynamic_rotate %381 by %c299_i32 dim 1 : vector<4x384xf32>, i32 -> vector<4x384xf32>
    %c74 = arith.constant 74 : index
    %c0_274 = arith.constant 0 : index
    %412 = vector.load %arg2[%c74, %c0_274] : memref<77x384xf32, #tpu.memory_space<vmem>>, vector<1x384xf32>
    %413 = vector.broadcast %412 : vector<1x384xf32> to vector<4x384xf32>
    %414 = arith.mulf %411, %413 : vector<4x384xf32>
    %c24_275 = arith.constant 24 : index
    %c0_276 = arith.constant 0 : index
    %415 = vector.load %arg12[%c24_275, %c0_276] : memref<100x384xf32, #tpu.memory_space<vmem>>, vector<4x384xf32>
    tpu.vector_store %arg12[%c24_275, %c0_276], %414 {strides = array<i32>} : memref<100x384xf32, #tpu.memory_space<vmem>>, vector<4x384xf32>,
    %c294_i32 = arith.constant 294 : i32
    %416 = tpu.dynamic_rotate %381 by %c294_i32 dim 1 : vector<4x384xf32>, i32 -> vector<4x384xf32>
    %c75 = arith.constant 75 : index
    %c0_277 = arith.constant 0 : index
    %417 = vector.load %arg2[%c75, %c0_277] : memref<77x384xf32, #tpu.memory_space<vmem>>, vector<1x384xf32>
    %418 = vector.broadcast %417 : vector<1x384xf32> to vector<4x384xf32>
    %419 = arith.mulf %416, %418 : vector<4x384xf32>
    %c28_278 = arith.constant 28 : index
    %c0_279 = arith.constant 0 : index
    %420 = vector.load %arg12[%c28_278, %c0_279] : memref<100x384xf32, #tpu.memory_space<vmem>>, vector<4x384xf32>
    tpu.vector_store %arg12[%c28_278, %c0_279], %419 {strides = array<i32>} : memref<100x384xf32, #tpu.memory_space<vmem>>, vector<4x384xf32>,
    %c289_i32 = arith.constant 289 : i32
    %421 = tpu.dynamic_rotate %381 by %c289_i32 dim 1 : vector<4x384xf32>, i32 -> vector<4x384xf32>
    %c76_280 = arith.constant 76 : index
    %c0_281 = arith.constant 0 : index
    %422 = vector.load %arg2[%c76_280, %c0_281] : memref<77x384xf32, #tpu.memory_space<vmem>>, vector<1x384xf32>
    %423 = vector.broadcast %422 : vector<1x384xf32> to vector<4x384xf32>
    %424 = arith.mulf %421, %423 : vector<4x384xf32>
    %c32_282 = arith.constant 32 : index
    %c0_283 = arith.constant 0 : index
    %425 = vector.load %arg12[%c32_282, %c0_283] : memref<100x384xf32, #tpu.memory_space<vmem>>, vector<4x384xf32>
    tpu.vector_store %arg12[%c32_282, %c0_283], %424 {strides = array<i32>} : memref<100x384xf32, #tpu.memory_space<vmem>>, vector<4x384xf32>,
    %c4_284 = arith.constant 4 : index
    %c0_285 = arith.constant 0 : index
    %c0_286 = arith.constant 0 : index
    %426 = vector.load %arg5[%c4_284, %c0_285, %c0_286] : memref<5x4x128xf32, #tpu.memory_space<vmem>>, vector<1x4x128xf32>
    %427 = vector.shape_cast %426 : vector<1x4x128xf32> to vector<4x128xf32>
    %428 = vector.extract_strided_slice %427 {offsets = [0, 0], sizes = [4, 36], strides = [1, 1]} : vector<4x128xf32> to vector<4x36xf32>
    %c0_287 = arith.constant 0 : index
    %c0_288 = arith.constant 0 : index
    %429 = vector.load %arg12[%c0_287, %c0_288] : memref<100x384xf32, #tpu.memory_space<vmem>>, vector<36x384xf32>
    %cst_289 = arith.constant dense<0.000000e+00> : vector<4x384xf32>
    %430 = tpu.matmul %428, %429, %cst_289 {dimension_numbers = #tpu.dot_dimension_numbers<[1], [0], [0], [1], [0, 0, 1, 1], [], []>} : vector<4x36xf32>, vector<36x384xf32>, vector<4x384xf32> -> vector<4x384xf32>
    %c16_290 = arith.constant 16 : index
    %c0_291 = arith.constant 0 : index
    %431 = vector.load %arg6[%c16_290, %c0_291] : memref<20x1xf32, #tpu.memory_space<vmem>>, vector<4x1xf32>
    %432 = vector.broadcast %431 : vector<4x1xf32> to vector<4x384xf32>
    %433 = arith.addf %430, %432 : vector<4x384xf32>
    %c0_292 = arith.constant 0 : index
    %c0_293 = arith.constant 0 : index
    %434 = vector.load %arg10[%c0_292, %c0_293] : memref<384x256xf32, #tpu.memory_space<vmem>>, vector<384x256xf32>
    %cst_294 = arith.constant dense<0.000000e+00> : vector<4x256xf32>
    %435 = tpu.matmul %433, %434, %cst_294 {dimension_numbers = #tpu.dot_dimension_numbers<[1], [0], [0], [1], [0, 0, 1, 1], [], []>} : vector<4x384xf32>, vector<384x256xf32>, vector<4x256xf32> -> vector<4x256xf32>
    %c8_295 = arith.constant 8 : index
    %c0_296 = arith.constant 0 : index
    %436 = vector.load %arg13[%c8_295, %c0_296] : memref<12x256xf32, #tpu.memory_space<vmem>>, vector<4x256xf32>
    tpu.vector_store %arg13[%c8_295, %c0_296], %435 {strides = array<i32>} : memref<12x256xf32, #tpu.memory_space<vmem>>, vector<4x256xf32>,
    %c0_297 = arith.constant 0 : index
    %c0_298 = arith.constant 0 : index
    %437 = vector.load %arg7[%c0_297, %c0_298] : memref<16x12xf32, #tpu.memory_space<vmem>>, vector<16x12xf32>
    %c0_299 = arith.constant 0 : index
    %c0_300 = arith.constant 0 : index
    %438 = vector.load %arg13[%c0_299, %c0_300] : memref<12x256xf32, #tpu.memory_space<vmem>>, vector<12x256xf32>
    %cst_301 = arith.constant dense<0.000000e+00> : vector<16x256xf32>
    %439 = tpu.matmul %437, %438, %cst_301 {dimension_numbers = #tpu.dot_dimension_numbers<[1], [0], [0], [1], [0, 0, 1, 1], [], []>} : vector<16x12xf32>, vector<12x256xf32>, vector<16x256xf32> -> vector<16x256xf32>
    %c0_302 = arith.constant 0 : index
    %c0_303 = arith.constant 0 : index
    %440 = vector.load %arg8[%c0_302, %c0_303] : memref<16x1xf32, #tpu.memory_space<vmem>>, vector<16x1xf32>
    %441 = vector.broadcast %440 : vector<16x1xf32> to vector<16x256xf32>
    %442 = arith.addf %439, %441 : vector<16x256xf32>
    %cst_304 = arith.constant 5.000000e-01 : f32
    %443 = vector.broadcast %cst_304 : f32 to vector<16x256xf32>
    %444 = arith.mulf %442, %443 : vector<16x256xf32>
    %445 = arith.addf %1, %444 : vector<16x256xf32>
    %cst_305 = arith.constant 0.000000e+00 : f32
    %446 = vector.broadcast %cst_305 : f32 to vector<16x256xf32>
    %447 = arith.maximumf %445, %446 : vector<16x256xf32>
    %c0_306 = arith.constant 0 : index
    %c0_307 = arith.constant 0 : index
    %c0_308 = arith.constant 0 : index
    %448 = vector.load %arg11[%c0_306, %c0_307, %c0_308] : memref<1x16x256xf32, #tpu.memory_space<vmem>>, vector<1x16x256xf32>
    %449 = vector.shape_cast %448 : vector<1x16x256xf32> to vector<16x256xf32>
    %450 = vector.shape_cast %447 : vector<16x256xf32> to vector<1x16x256xf32>
    tpu.vector_store %arg11[%c0_306, %c0_307, %c0_308], %450 {strides = array<i32>} : memref<1x16x256xf32, #tpu.memory_space<vmem>>, vector<1x16x256xf32>,
    return
  }
  func.func @transform_0(%arg0: i32) -> (i32, i32, i32) {
    %c0_i32 = arith.constant 0 : i32
    %c0_i32_0 = arith.constant 0 : i32
    %c0_i32_1 = arith.constant 0 : i32
    return %arg0, %c0_i32, %c0_i32_0 : i32, i32, i32
  }
  func.func @transform_1(%arg0: i32) -> (i32, i32) {
    %c0_i32 = arith.constant 0 : i32
    %c0_i32_0 = arith.constant 0 : i32
    %c0_i32_1 = arith.constant 0 : i32
    return %c0_i32, %c0_i32_0 : i32, i32
  }
  func.func @transform_2(%arg0: i32) -> (i32, i32) {
    %c0_i32 = arith.constant 0 : i32
    %c0_i32_0 = arith.constant 0 : i32
    %c0_i32_1 = arith.constant 0 : i32
    return %c0_i32, %c0_i32_0 : i32, i32
  }
  func.func @transform_3(%arg0: i32) -> (i32, i32) {
    %c0_i32 = arith.constant 0 : i32
    %c0_i32_0 = arith.constant 0 : i32
    %c0_i32_1 = arith.constant 0 : i32
    return %c0_i32, %c0_i32_0 : i32, i32
  }
  func.func @transform_4(%arg0: i32) -> (i32, i32, i32) {
    %c0_i32 = arith.constant 0 : i32
    %c0_i32_0 = arith.constant 0 : i32
    %c0_i32_1 = arith.constant 0 : i32
    %c0_i32_2 = arith.constant 0 : i32
    return %c0_i32, %c0_i32_0, %c0_i32_1 : i32, i32, i32
  }
  func.func @transform_5(%arg0: i32) -> (i32, i32) {
    %c0_i32 = arith.constant 0 : i32
    %c0_i32_0 = arith.constant 0 : i32
    %c0_i32_1 = arith.constant 0 : i32
    return %c0_i32, %c0_i32_0 : i32, i32
  }
  func.func @transform_6(%arg0: i32) -> (i32, i32) {
    %c0_i32 = arith.constant 0 : i32
    %c0_i32_0 = arith.constant 0 : i32
    %c0_i32_1 = arith.constant 0 : i32
    return %c0_i32, %c0_i32_0 : i32, i32
  }
  func.func @transform_7(%arg0: i32) -> (i32, i32) {
    %c0_i32 = arith.constant 0 : i32
    %c0_i32_0 = arith.constant 0 : i32
    %c0_i32_1 = arith.constant 0 : i32
    return %c0_i32, %c0_i32_0 : i32, i32
  }
  func.func @transform_8(%arg0: i32) -> (i32, i32) {
    %c0_i32 = arith.constant 0 : i32
    %c0_i32_0 = arith.constant 0 : i32
    %c0_i32_1 = arith.constant 0 : i32
    return %c0_i32, %c0_i32_0 : i32, i32
  }
  func.func @transform_9(%arg0: i32) -> (i32, i32) {
    %c0_i32 = arith.constant 0 : i32
    %c0_i32_0 = arith.constant 0 : i32
    %c0_i32_1 = arith.constant 0 : i32
    return %c0_i32, %c0_i32_0 : i32, i32
  }
  func.func @transform_10(%arg0: i32) -> (i32, i32, i32) {
    %c0_i32 = arith.constant 0 : i32
    %c0_i32_0 = arith.constant 0 : i32
    %c0_i32_1 = arith.constant 0 : i32
    return %arg0, %c0_i32, %c0_i32_0 : i32, i32, i32
  }
}

</mosaic_0001>

<bundles_post_ra>
// kernel: forward.1
= control target key start
LH: loop header
LB: loop body
LE: loop exit
PB: predicated region body
PF: predicated region fallthrough
CT: control target
= control target key end

     0   :  { %15 = vsyncpa [#allocation5], 0  ;;  %s6384_s0 = inlined_call_operand.vmem [shape: f32[2,16,256], index: 0, kind: input, shape index: {}]   ;;  %s6385_s1 = inlined_call_operand.vmem [shape: f32[77,384], index: 1, kind: input, shape index: {}]   ;;  %s6386_s2 = inlined_call_operand.vmem [shape: f32[12,16], index: 2, kind: input, shape index: {}]   ;;  %s6387_s3 = inlined_call_operand.vmem [shape: f32[12,1], index: 3, kind: input, shape index: {}]   ;;  %s6388_s4 = inlined_call_operand.vmem [shape: f32[5,4,128], index: 4, kind: input, shape index: {}]   ;;  %s6389_s5 = inlined_call_operand.vmem [shape: f32[20,1], index: 5, kind: input, shape index: {}]   ;;  %s6390_s6 = inlined_call_operand.vmem [shape: f32[16,12], index: 6, kind: input, shape index: {}]   ;;  %s6391_s7 = inlined_call_operand.vmem [shape: f32[16,1], index: 7, kind: input, shape index: {}]   ;;  %s6392_s8 = inlined_call_operand.hbm [shape: f32[256,384], index: 8, kind: input, shape index: {}]   ;;  %s6393_s9 = inlined_call_operand.hbm [shape: f32[384,256], index: 9, kind: input, shape index: {}]   ;;  %s6394_s10 = inlined_call_operand.vmem [shape: f32[2,16,256], index: 10, kind: output, shape index: {}]  }
   0x1   :  { %16 = vsyncpa [#allocation7], 0  ;;  %s4769_s13 = smov 0  }
   0x2 LB: > { %s4653_s14 = smov [#allocation4]   ;;  %s4775_s16 = sadd.s32 4294967295, %s4651_s13   ;;  %s4651_s13 = sphi %s4769_s13, %s22_s13  }
   0x3   : > { %s301_s15 = sshll.u32 %s4653_s14, 4  ;;  %p4274_p0 = scmp.ge.s32.totalorder %s4651_s13, 1  ;;  %s302_s15 = int_to_ptr.vmem [resolvable:$true] %s301_s15 }
   0x4   : > { %p268_p1 = scmp.lt.s32.totalorder %s4651_s13, 3  ;;  %p4506_p3 = scmp.eq.s32.totalorder %s4775_s16, 0 }
   0x5   : > { %s4654_s18 = smov [#allocation6]   ;;  %s4596_s21 = scalar_lea.vmem %s302_s15, 12288 }
   0x6   : > { %p4779_p2 = pnand %p4274_p0, %p268_p1  ;;  %s314_s19 = sshll.u32 %s4654_s18, 4  ;;  %s315_s19 = int_to_ptr.vmem [resolvable:$true] %s314_s19 }
   0x7   : > { %p4597_p7 = scmp.ne.s32.totalorder %s302_s15, %s4596_s21  ;;  %p4604_p10 = scmp.lt.s32.totalorder %s302_s15, %s302_s15 }
   0x8   : > { %p4499_p4 = pneg %p4779_p2  ;;  %p4605_p11 = scmp.lt.s32.totalorder %s4596_s21, %s4596_s21 }
   0xa   : > { %p4788_p5 = pnand %p4506_p3, %p4499_p4  ;;  %p4606_p12 = por %p4605_p11, %p4604_p10 }
   0xc   : > { %p4587_p6 = pneg %p4788_p5 }
   0xe   : > { %p4599_p8 = pnand %p4597_p7, %p4587_p6 }
  0x10   : > { %p4600_p9 = pneg %p4599_p8 }
  0x12   : > { %p4607_p13 = pnand %p4606_p12, %p4600_p9 }
  0x14   : > { %4610 = shalt.err (!%p4607_p13)
}
  0x15   : > { %s4655_s22 = smov 384   ;;  %s4656_s23 = smov 24  }
  0x16   : > { %4502 = dma.hbm_to_vmem [thread:$0]  (!%p4788_p5), %s6392_s8, 12288, %s302_s15, [#allocation5], %s4655_s22, %s4655_s22, %s4656_s23  }
  0x17   : > { %s4622_s26 = scalar_lea.vmem %s315_s19, 12288  ;;  %p4630_p7 = scmp.lt.s32.totalorder %s315_s19, %s315_s19 }
  0x18   : > { %p4623_p0 = scmp.ne.s32.totalorder %s315_s19, %s4622_s26  ;;  %p4631_p8 = scmp.lt.s32.totalorder %s4622_s26, %s4622_s26 }
  0x1a   : > { %p4625_p1 = pnand %p4623_p0, %p4587_p6  ;;  %p4632_p10 = por %p4631_p8, %p4630_p7 }
  0x1c   : > { %p4626_p4 = pneg %p4625_p1 }
  0x1e   : > { %p4633_p9 = pnand %p4632_p10, %p4626_p4 }
  0x20   : > { %4636 = shalt.err (!%p4633_p9)
}
  0x21   : > { %s4657_s27 = smov 256   ;;  %s4658_s28 = smov 16  }
  0x22   : > { %4505 = dma.hbm_to_vmem [thread:$0]  (!%p4788_p5), %s6393_s9, 12288, %s315_s19, [#allocation7], %s4657_s27, %s4657_s27, %s4658_s28  }
  0x23   : > { %338 = sbr.rel (%p4779_p2) target bundleno = 2297 (0x8f9), region = 60 }
  0x28   : > { %4642 = dma.done.wait (%p4506_p3), [#allocation5], 12288  }
  0x29   : > { %4644 = vsyncadd (%p4506_p3), [#allocation5], 4294955008 }
  0x2a   : > { %4646 = dma.done.wait (%p4506_p3), [#allocation7], 12288  }
  0x2b   : > { %4648 = vsyncadd (%p4506_p3), [#allocation7], 4294955008  ;;  %p380_p6 = scmp.lt.s32.totalorder %s4775_s16, 1  ;;  %v6425_v0 = vmov 0.0   ;;  %v4660_v1 = vmov 0   ;;  %v396_v6 = vld [vmem:[%s6387_s3] sm:$0xff]  ;;  %v496_v8 = vlaneseq }
  0x2c   : > { %479 = vmatprep.mubr.f32.mxu1 %v6425_v0  ;;  %4579 = vset.pattern.permute.xlu0 %v4660_v1  ;;  %v394_v7 = vld [vmem:[%s6386_s2] sm:$0xff]  ;;  %vm408_vm0 = vcmask 130048   ;;  %s4661_s23 = smov 111   ;;  %s4662_s24 = smov 112   ;;  %vm747_vm4 = vcmask 1043456   ;;  %vm6420_vm10 = vcmask 293888  }
  0x2d   : > { %s6495_s16 = smov (!%p380_p6, %s4775_s16), 1  ;;  %818 = vmatprep.mubr.f32.mxu0 %v6425_v0  ;;  %4580 = vset.pattern.permute.xlu1 %v4660_v1  ;;  %v4846_v9 = vshrl.u32 %v496_v8, 7  ;;  %v4290_v11 = vld [vmem:[%s6385_s1 + $0x4] ss:$8 sm:$0x3]  ;;  %s6417_s25 = smov 127  }
  0x2e   : > { %s6395_s11 = sshll.u32 %s6495_s16, 5  ;;  %400 = vperm.xlu0 %4579, %v396_v6   ;;  %s4664_s26 = smov 113   ;;  %v1076_v24 = vld [vmem:[%s6389_s5 + $0x4] sm:$0xf]  ;;  %v4910_v25 = vand.u32 127, %v496_v8 }
  0x2f   : > { %s4832_s15 = scalar_lea.vmem %s6384_s0, %s6395_s11  ;;  %v4849_v10 = vsub.s32 0, %v4846_v9  ;;  %v4855_v12 = vsub.s32 1, %v4846_v9  ;;  %s6416_s27 = smov 1   ;;  %v4294_v26 = vld [vmem:[%s6385_s1 + $0x18] ss:$8 sm:$0x3] }
  0x30   : > { %v393_v2 = vld [vmem:[%s4832_s15 + $0x18] sm:$0xff]  ;;  %v392_v3 = vld [vmem:[%s4832_s15 + $0x10] sm:$0xff]  ;;  %v391_v4 = vld [vmem:[%s4832_s15 + $0x8] sm:$0xff]  ;;  %s4666_s28 = smov 16   ;;  %s4667_s29 = smov 15   ;;  %vm6424_vm1 = vcmp.lt.s32.totalorder %v4910_v25, 111 }
  0x31   : > { %443 = vmatprep.subr.mxu1 %v393_v2  ;;  %v390_v5 = vld [vmem:[%s4832_s15] sm:$0xff]  ;;  %v607_v14 = vrot.slane %v4290_v11, %v4849_v10  ;;  %v611_v17 = vrot.slane %v4290_v11, %v4855_v12  ;;  %s6404_s30 = smov 17   ;;  %v715_v29 = vrot.slane %v4294_v26, %v4849_v10  ;;  %v719_v30 = vrot.slane %v4294_v26, %v4855_v12  ;;  %s4669_s19 = smov 29  }
  0x32   : > { %444 = vmatpush1.msra.mxu1 %v392_v3  ;;  %v4291_v31 = vld [vmem:[%s6385_s1 + $0x5] ss:$8 sm:$0x3]  ;;  %vm622_vm2 = vcmp.lt.s32.totalorder %v4910_v25, 127  ;;  %vm652_vm3 = vcmp.lt.s32.totalorder %v4910_v25, 113  ;;  %vm575_vm5 = vcmp.lt.s32.totalorder %v4910_v25, 1 }
  0x33   : > { %445 = vmatprep.subr.mxu1 %v391_v4  ;;  %v631_v38 = vrot.slane %v4291_v31, %v4849_v10  ;;  %v635_v39 = vrot.slane %v4291_v31, %v4855_v12  ;;  %v4292_v40 = vld [vmem:[%s6385_s1 + $0x6] ss:$8 sm:$0x3]  ;;  %v4302_v45 = vld [vmem:[%s6385_s1 + $0x1d] ss:$8 sm:$0x3] }
  0x34   : > { %446 = vmatpush1.msra.mxu1 %v390_v5  ;;  %v661_v48 = vrot.slane %v4292_v40, %v4849_v10  ;;  %v665_v49 = vrot.slane %v4292_v40, %v4855_v12  ;;  %v4289_v50 = vld [vmem:[%s6385_s1 + $0x3] ss:$8 sm:$0x3]  ;;  %v947_v55 = vrot.slane %v4302_v45, %v4855_v12  ;;  %v943_v56 = vrot.slane %v4302_v45, %v4849_v10  ;;  %v4287_v63 = vld [vmem:[%s6385_s1 + $0x1] ss:$8 sm:$0x3] }
  0x35   : > { %4285 = vmatmul.mubr.msk.f32.vlgmr.msra.gmra.mxu1 %vm408_vm0, %v394_v7  ;;  %v584_v61 = vrot.slane %v4289_v50, %v4849_v10  ;;  %v588_v62 = vrot.slane %v4289_v50, %v4855_v12  ;;  %vm521_vm6 = vcmp.lt.s32.totalorder %v4910_v25, 16  ;;  %vm551_vm7 = vcmp.lt.s32.totalorder %v4910_v25, 15  ;;  %v4293_v26 = vld [vmem:[%s6385_s1 + $0x7] ss:$8 sm:$0x3]  ;;  %s4670_s20 = smov 26  }
  0x36   : > { %485 = vmatprep.mubr.f32.mxu1 %v6425_v0  ;;  %vm676_vm8 = vcmp.lt.s32.totalorder %v4910_v25, 112  ;;  %vm498_vm9 = vcmp.lt.s32.totalorder %v4910_v25, 17  ;;  %s6410_s21 = smov 35   ;;  %s4672_s22 = smov 32   ;;  %vm1777_vm11 = vcmp.lt.s32.totalorder %v4910_v25, 29  ;;  %vm1807_vm12 = vcmp.lt.s32.totalorder %v4910_v25, 26 }
  0x37   : > { %s4675_s12 = smov 80   ;;  %s4676_s14 = smov 77   ;;  %vm1723_vm13 = vcmp.lt.s32.totalorder %v4910_v25, 35  ;;  %vm1753_vm14 = vcmp.lt.s32.totalorder %v4910_v25, 32  ;;  %vm1669_vm15 = vcmp.lt.s32.totalorder %v4910_v25, 74 }
  0x38   : > { %s4677_s17 = smov 86   ;;  %s4678_s18 = smov 83  }
  0x39   : > { %s6398_s11 = smov 126  }
  0xa9   : > { %v401_v13 = vpop.permute.xlu0 %400 }
  0xf5   : > { %v481_v15 = vpop.f32.mrf.mxu1 }
  0xf6   : > { %v4858_v16 = vadd.f32 %v481_v15, %v401_v13  ;;  %v534_v15 = vrot.slane %v4287_v63, %v4855_v12 }
  0xf7   : > { %v483_v18 = vpop.f32.mrf.mxu1 }
  0xf8   : > { %v614_v19 = vmul.f32 %v607_v14, %v4858_v16  ;;  %v4862_v20 = vadd.f32 %v483_v18, %v401_v13  ;;  %702 = vrot.lane.b32.xlu1 %v4858_v16, %s4661_s23  ;;  %672 = vrot.lane.b32.xlu0 %v4858_v16, %s4662_s24  ;;  %v829_v23 = vrot.slane %v4858_v16, 4  ;;  %v950_v6 = vmul.f32 %v943_v56, %v4858_v16 }
  0xf9   : > { %v530_v14 = vrot.slane %v4287_v63, %v4849_v10 }
  0xfa   : > { %616 = vst [vmem:[#allocation2 + $0x100] sm:$0xf] %v614_v19  ;;  %v615_v21 = vmul.f32 %v611_v17, %v4862_v20  ;;  %v830_v22 = vrot.slane %v4862_v20, 4  ;;  %v951_v5 = vmul.f32 %v947_v55, %v4862_v20 }
  0xfc   : > { %617 = vst [vmem:[#allocation2 + $0x50] sm:$0xf] %v615_v21  ;;  %618 = vrot.lane.b32.xlu1 %v4858_v16, %s6417_s25  ;;  %704 = vrot.lane.b32.xlu0 %v4862_v20, %s4661_s23  ;;  %v955_v21 = vrot.slane %v951_v5, 4  ;;  %v4303_v5 = vld [vmem:[%s6385_s1 + $0x1e] ss:$8 sm:$0x3] }
 0x100   : > { %648 = vrot.lane.b32.xlu1 %v4858_v16, %s4664_s26  ;;  %620 = vrot.lane.b32.xlu0 %v4862_v20, %s6417_s25 }
 0x104   : > { %571 = vrot.lane.b32.xlu1 %v4858_v16, %s6416_s27  ;;  %650 = vrot.lane.b32.xlu0 %v4862_v20, %s4664_s26 }
 0x108   : > { %517 = vrot.lane.b32.xlu1 %v4858_v16, %s4666_s28  ;;  %573 = vrot.lane.b32.xlu0 %v4862_v20, %s6416_s27 }
 0x10c   : > { %547 = vrot.lane.b32.xlu1 %v4858_v16, %s4667_s29  ;;  %519 = vrot.lane.b32.xlu0 %v4862_v20, %s4666_s28 }
 0x110   : > { %492 = vrot.lane.b32.xlu1 %v4858_v16, %s6404_s30  ;;  %549 = vrot.lane.b32.xlu0 %v4862_v20, %s4667_s29  ;;  %v4288_v16 = vld [vmem:[%s6385_s1 + $0x2] ss:$8 sm:$0x3] }
 0x114   : > { %674 = vrot.lane.b32.xlu1 %v4862_v20, %s4662_s24  ;;  %494 = vrot.lane.b32.xlu0 %v4862_v20, %s6404_s30 }
 0x118   : > { %1014 = vrot.lane.b32.xlu0 %v830_v22, %s4662_s24  ;;  %1012 = vrot.lane.b32.xlu1 %v829_v23, %s4662_s24 }
 0x11c   : > { %1043 = vrot.lane.b32.xlu0 %v830_v22, %s4661_s23  ;;  %1041 = vrot.lane.b32.xlu1 %v829_v23, %s4661_s23 }
 0x120   : > { %962 = vrot.lane.b32.xlu0 %v830_v22, %s6417_s25  ;;  %960 = vrot.lane.b32.xlu1 %v829_v23, %s6417_s25 }
 0x124   : > { %991 = vrot.lane.b32.xlu0 %v830_v22, %s4664_s26  ;;  %989 = vrot.lane.b32.xlu1 %v829_v23, %s4664_s26  ;;  %s4673_s26 = smov 74  }
 0x128   : > { %910 = vrot.lane.b32.xlu0 %v830_v22, %s6416_s27  ;;  %908 = vrot.lane.b32.xlu1 %v829_v23, %s6416_s27 }
 0x12c   : > { %858 = vrot.lane.b32.xlu0 %v830_v22, %s4666_s28  ;;  %856 = vrot.lane.b32.xlu1 %v829_v23, %s4666_s28 }
 0x130   : > { %887 = vrot.lane.b32.xlu0 %v830_v22, %s4667_s29  ;;  %885 = vrot.lane.b32.xlu1 %v829_v23, %s4667_s29  ;;  %s6396_s29 = smov 38  }
 0x134   : > { %835 = vrot.lane.b32.xlu0 %v830_v22, %s6404_s30  ;;  %833 = vrot.lane.b32.xlu1 %v829_v23, %s6404_s30  ;;  %v954_v22 = vrot.slane %v950_v6, 4 }
 0x138   : > { %1079 = vperm.xlu1 %4580, %v1076_v24  }
 0x16a   : > { %v703_v27 = vpop.permute.xlu1 %702  ;;  %v4915_v28 = vpop.permute.xlu0 %672 }
 0x16e   : > { %v619_v32 = vpop.permute.xlu1 %618  ;;  %v705_v33 = vpop.permute.xlu0 %704 }
 0x16f   : > { %v707_v34 = vsel %vm6424_vm1, %v703_v27, %v705_v33  ;;  %v708_v35 = vsel %vm6424_vm1, %v705_v33, %v703_v27  ;;  %v564_v33 = vrot.slane %v4288_v16, %v4855_v12 }
 0x170   : > { %v722_v36 = vmul.f32 %v715_v29, %v707_v34  ;;  %v723_v37 = vmul.f32 %v719_v30, %v708_v35  ;;  %v501_v34 = vld [vmem:[%s6385_s1] ss:$8 sm:$0x3] }
 0x171   : > { %v506_v45 = vrot.slane %v501_v34, %v4849_v10 }
 0x172   : > { %724 = vst [vmem:[#allocation2 + $0xc0] sm:$0xf] %v722_v36  ;;  %725 = vst [vmem:[#allocation2 + $0xb8] sm:$0xf] %v723_v37  ;;  %v649_v41 = vpop.permute.xlu1 %648  ;;  %v621_v42 = vpop.permute.xlu0 %620 }
 0x173   : > { %v623_v43 = vsel %vm622_vm2, %v619_v32, %v621_v42  ;;  %v624_v44 = vsel %vm622_vm2, %v621_v42, %v619_v32  ;;  %v560_v32 = vrot.slane %v4288_v16, %v4849_v10  ;;  %v689_v42 = vrot.slane %v4293_v26, %v4855_v12 }
 0x174   : > { %v638_v46 = vmul.f32 %v631_v38, %v623_v43  ;;  %v639_v47 = vmul.f32 %v635_v39, %v624_v44  ;;  %v685_v39 = vrot.slane %v4293_v26, %v4849_v10 }
 0x176   : > { %v642_v51 = vrot.slane %v638_v46, 4  ;;  %v643_v52 = vrot.slane %v639_v47, 4  ;;  %v572_v53 = vpop.permute.xlu1 %571  ;;  %v651_v54 = vpop.permute.xlu0 %650  ;;  %v510_v46 = vrot.slane %v501_v34, %v4855_v12 }
 0x177   : > { %v653_v57 = vsel %vm652_vm3, %v649_v41, %v651_v54  ;;  %v654_v58 = vsel %vm652_vm3, %v651_v54, %v649_v41 }
 0x178   : > { %646 = vst [vmem:[#allocation2 + $0x100] sm:$0xf0] %v642_v51  ;;  %647 = vst [vmem:[#allocation2 + $0x50] sm:$0xf0] %v643_v52  ;;  %v668_v59 = vmul.f32 %v661_v48, %v653_v57  ;;  %v669_v60 = vmul.f32 %v665_v49, %v654_v58 }
 0x179   : > { %v736_v1 = vld [vmem:[#allocation2 + $0xb8] sm:$0xf]  ;;  %v735_v2 = vld [vmem:[#allocation2 + $0xc0] sm:$0xf] }
 0x17a   : > { %670 = vst [vmem:[#allocation2 + $0x88] sm:$0xf] %v668_v59  ;;  %671 = vst [vmem:[#allocation2 + $0xa0] sm:$0xf] %v669_v60  ;;  %v518_v3 = vpop.permute.xlu1 %517  ;;  %4295 = vmatprep.subr.msk.mxu0 %vm747_vm4, %v736_v1  ;;  %v574_v4 = vpop.permute.xlu0 %573 }
 0x17b   : > { %v576_v7 = vsel %vm575_vm5, %v572_v53, %v574_v4  ;;  %v577_v8 = vsel %vm575_vm5, %v574_v4, %v572_v53  ;;  %4296 = vmatpush1.msk.msra.mxu0 %vm747_vm4, %v735_v2  ;;  %v4305_v53 = vld [vmem:[%s6385_s1 + $0x30] ss:$8 sm:$0x3]  ;;  %v4306_v58 = vld [vmem:[%s6385_s1 + $0x31] ss:$8 sm:$0x3] }
 0x17c   : > { %v591_v11 = vmul.f32 %v584_v61, %v577_v8  ;;  %v592_v13 = vmul.f32 %v588_v62, %v576_v7  ;;  %v1024_v61 = vrot.slane %v4305_v53, %v4849_v10  ;;  %v1028_v62 = vrot.slane %v4305_v53, %v4855_v12 }
 0x17d   : > { %v1057_v4 = vrot.slane %v4306_v58, %v4855_v12 }
 0x17e   : > { %v595_v17 = vrot.slane %v591_v11, 4  ;;  %v596_v18 = vrot.slane %v592_v13, 4  ;;  %v548_v19 = vpop.permute.xlu1 %547  ;;  %v520_v20 = vpop.permute.xlu0 %519 }
 0x17f   : > { %v522_v23 = vsel %vm521_vm6, %v518_v3, %v520_v20  ;;  %v523_v24 = vsel %vm521_vm6, %v520_v20, %v518_v3  ;;  %v4980_v27 = vld [vmem:[#allocation2 + $0x50] sm:$0xff]  ;;  %v4982_v29 = vld [vmem:[#allocation2 + $0x100] sm:$0xff]  ;;  %v1053_v3 = vrot.slane %v4306_v58, %v4849_v10 }
 0x180   : > { %599 = vst [vmem:[#allocation2 + $0x18] sm:$0xf0] %v595_v17  ;;  %600 = vst [vmem:[#allocation2 + $0x68] sm:$0xf0] %v596_v18  ;;  %v537_v30 = vmul.f32 %v530_v14, %v523_v24  ;;  %v538_v31 = vmul.f32 %v534_v15, %v522_v23  ;;  %v972_v17 = vrot.slane %v4303_v5, %v4849_v10 }
 0x181   : > { %959 = vst [vmem:[#allocation2 + $0x50] sm:$0xf] %v955_v21  ;;  %958 = vst [vmem:[#allocation2 + $0x100] sm:$0xf] %v954_v22  ;;  %v976_v18 = vrot.slane %v4303_v5, %v4855_v12 }
 0x182   : > { %v541_v35 = vrot.slane %v537_v30, 4  ;;  %v542_v36 = vrot.slane %v538_v31, 4  ;;  %v493_v37 = vpop.permute.xlu1 %492  ;;  %v550_v38 = vpop.permute.xlu0 %549 }
 0x183   : > { %v552_v40 = vsel %vm551_vm7, %v548_v19, %v550_v38  ;;  %v553_v41 = vsel %vm551_vm7, %v550_v38, %v548_v19  ;;  %v4304_v19 = vld [vmem:[%s6385_s1 + $0x1f] ss:$8 sm:$0x3] }
 0x184   : > { %545 = vst [vmem:[#allocation2 + $0x108] sm:$0xf0] %v541_v35  ;;  %546 = vst [vmem:[#allocation2 + $0x10] sm:$0xf0] %v542_v36  ;;  %v567_v43 = vmul.f32 %v560_v32, %v553_v41  ;;  %v568_v44 = vmul.f32 %v564_v33, %v552_v40  ;;  %v1001_v34 = vrot.slane %v4304_v19, %v4849_v10 }
 0x185   : > { %v1005_v35 = vrot.slane %v4304_v19, %v4855_v12  ;;  %v4301_v36 = vld [vmem:[%s6385_s1 + $0x1c] ss:$8 sm:$0x3] }
 0x186   : > { %569 = vst [vmem:[#allocation2 + $0x18] sm:$0xf] %v567_v43  ;;  %570 = vst [vmem:[#allocation2 + $0x68] sm:$0xf] %v568_v44  ;;  %v675_v47 = vpop.permute.xlu1 %674  ;;  %v495_v48 = vpop.permute.xlu0 %494 }
 0x187   : > { %v677_v49 = vsel %vm676_vm8, %v4915_v28, %v675_v47  ;;  %v678_v50 = vsel %vm676_vm8, %v675_v47, %v4915_v28  ;;  %v499_v51 = vsel %vm498_vm9, %v493_v37, %v495_v48  ;;  %v500_v52 = vsel %vm498_vm9, %v495_v48, %v493_v37  ;;  %v4299_v48 = vld [vmem:[%s6385_s1 + $0x1a] ss:$8 sm:$0x3] }
 0x188   : > { %v692_v54 = vmul.f32 %v685_v39, %v677_v49  ;;  %v693_v55 = vmul.f32 %v689_v42, %v678_v50  ;;  %v513_v56 = vmul.f32 %v506_v45, %v500_v52  ;;  %v514_v57 = vmul.f32 %v510_v46, %v499_v51 }
 0x189   : > { %v920_v47 = vrot.slane %v4301_v36, %v4849_v10 }
 0x18a   : > { %v696_v59 = vrot.slane %v692_v54, 4  ;;  %v697_v28 = vrot.slane %v693_v55, 4  ;;  %515 = vst [vmem:[#allocation2 + $0x108] sm:$0xf] %v513_v56  ;;  %516 = vst [vmem:[#allocation2 + $0x10] sm:$0xf] %v514_v57  ;;  %v1015_v60 = vpop.permute.xlu0 %1014  ;;  %v1013_v63 = vpop.permute.xlu1 %1012  ;;  %v868_v56 = vrot.slane %v4299_v48, %v4849_v10 }
 0x18b   : > { %v1016_v1 = vsel %vm676_vm8, %v1013_v63, %v1015_v60  ;;  %v1017_v2 = vsel %vm676_vm8, %v1015_v60, %v1013_v63  ;;  %v4300_v60 = vld [vmem:[%s6385_s1 + $0x1b] ss:$8 sm:$0x3] }
 0x18c   : > { %700 = vst [vmem:[#allocation2 + $0x88] sm:$0xf0] %v696_v59  ;;  %701 = vst [vmem:[#allocation2 + $0xa0] sm:$0xf0] %v697_v28  ;;  %v1031_v6 = vmul.f32 %v1024_v61, %v1016_v1  ;;  %v1032_v7 = vmul.f32 %v1028_v62, %v1017_v2  ;;  %v872_v28 = vrot.slane %v4299_v48, %v4855_v12 }
 0x18d   : > { %v730_v43 = vld [vmem:[#allocation2 + $0x68] sm:$0xff]  ;;  %v729_v46 = vld [vmem:[#allocation2 + $0x18] sm:$0xff] }
 0x18e   : > { %v1044_v8 = vpop.permute.xlu0 %1043  ;;  %v1042_v11 = vpop.permute.xlu1 %1041  ;;  %v1035_v20 = vrot.slane %v1031_v6, 4  ;;  %v1036_v21 = vrot.slane %v1032_v7, 4  ;;  %v897_v6 = vrot.slane %v4300_v60, %v4849_v10  ;;  %v901_v7 = vrot.slane %v4300_v60, %v4855_v12  ;;  %v1983_v60 = vld [vmem:[#allocation4 + $0x108] sm:$0xff] }
 0x18f   : > { %v1045_v13 = vsel %vm6424_vm1, %v1042_v11, %v1044_v8  ;;  %v1046_v14 = vsel %vm6424_vm1, %v1044_v8, %v1042_v11 }
 0x190   : > { %v1060_v15 = vmul.f32 %v1053_v3, %v1045_v13  ;;  %v1061_v16 = vmul.f32 %v1057_v4, %v1046_v14  ;;  %v4298_v13 = vld [vmem:[%s6385_s1 + $0x19] ss:$8 sm:$0x3] }
 0x191   : > { %v728_v49 = vld [vmem:[#allocation2 + $0x10] sm:$0xff]  ;;  %v727_v52 = vld [vmem:[#allocation2 + $0x108] sm:$0xff] }
 0x192   : > { %1062 = vst [vmem:[#allocation2 + $0xc0] sm:$0xf] %v1060_v15  ;;  %1063 = vst [vmem:[#allocation2 + $0xb8] sm:$0xf] %v1061_v16  ;;  %v963_v22 = vpop.permute.xlu0 %962  ;;  %v961_v23 = vpop.permute.xlu1 %960 }
 0x193   : > { %v733_v24 = vld [vmem:[#allocation2 + $0x88] sm:$0xff]  ;;  %v734_v26 = vld [vmem:[#allocation2 + $0xa0] sm:$0xff]  ;;  %v964_v30 = vsel %vm622_vm2, %v961_v23, %v963_v22  ;;  %v965_v31 = vsel %vm622_vm2, %v963_v22, %v961_v23 }
 0x194   : > { %1039 = vst [vmem:[#allocation2 + $0x88] sm:$0xf0] %v1035_v20  ;;  %1040 = vst [vmem:[#allocation2 + $0xa0] sm:$0xf0] %v1036_v21  ;;  %v979_v32 = vmul.f32 %v972_v17, %v964_v30  ;;  %v980_v33 = vmul.f32 %v976_v18, %v965_v31  ;;  %778 = vmatprep.subr.mxu0 %v734_v26  ;;  %v849_v26 = vrot.slane %v4298_v13, %v4855_v12 }
 0x195   : > { %779 = vmatpush1.msra.mxu0 %v733_v24  ;;  %v845_v24 = vrot.slane %v4298_v13, %v4849_v10  ;;  %v1963_v13 = vld [vmem:[#allocation4 + $0x68] sm:$0xff] }
 0x196   : > { %v983_v37 = vrot.slane %v979_v32, 4  ;;  %v984_v38 = vrot.slane %v980_v33, 4  ;;  %780 = vmatprep.subr.mxu0 %v4980_v27  ;;  %v992_v39 = vpop.permute.xlu0 %991  ;;  %v990_v40 = vpop.permute.xlu1 %989  ;;  %v924_v27 = vrot.slane %v4301_v36, %v4855_v12 }
 0x197   : > { %v993_v41 = vsel %vm652_vm3, %v990_v40, %v992_v39  ;;  %v994_v42 = vsel %vm652_vm3, %v992_v39, %v990_v40  ;;  %781 = vmatpush1.msra.mxu0 %v4982_v29  ;;  %v726_v29 = vld [vmem:[%s6388_s4] sm:$0xf]  ;;  %v4307_v40 = vld [vmem:[%s6388_s4 + $0x4] sm:$0xf]  ;;  %vm1615_vm3 = vcmp.lt.s32.totalorder %v4910_v25, 80 }
 0x198   : > { %987 = vst [vmem:[#allocation2 + $0x100] sm:$0xf0] %v983_v37  ;;  %988 = vst [vmem:[#allocation2 + $0x50] sm:$0xf0] %v984_v38  ;;  %v1008_v44 = vmul.f32 %v1001_v34, %v993_v41  ;;  %v1009_v45 = vmul.f32 %v1005_v35, %v994_v42  ;;  %782 = vmatprep.subr.mxu0 %v730_v43  ;;  %v395_v41 = vld [vmem:[%s6386_s2 + $0x8] sm:$0xf] }
 0x199   : > { %783 = vmatpush1.msra.mxu0 %v729_v46  ;;  %v1075_v55 = vld [vmem:[#allocation2 + $0xb8] sm:$0xf]  ;;  %v1074_v59 = vld [vmem:[#allocation2 + $0xc0] sm:$0xf]  ;;  %4286 = vmatmul.mubr.msk.f32.gmra.mxu1 %vm408_vm0, %v395_v41  ;;  %vm6423_vm0 = vcmp.lt.s32.totalorder %v4910_v25, 38 }
 0x19a   : > { %1010 = vst [vmem:[#allocation2 + $0x88] sm:$0xf] %v1008_v44  ;;  %1011 = vst [vmem:[#allocation2 + $0xa0] sm:$0xf] %v1009_v45  ;;  %v911_v50 = vpop.permute.xlu0 %910  ;;  %v909_v51 = vpop.permute.xlu1 %908  ;;  %784 = vmatprep.subr.mxu0 %v728_v49  ;;  %1935 = vmatprep.mubr.f32.mxu1 %v6425_v0  ;;  %v2023_v41 = vld [vmem:[#allocation4 + $0x248] sm:$0xff] }
 0x19b   : > { %v912_v53 = vsel %vm575_vm5, %v909_v51, %v911_v50  ;;  %v913_v54 = vsel %vm575_vm5, %v911_v50, %v909_v51  ;;  %785 = vmatpush1.msra.mxu0 %v727_v52  ;;  %v4323_v43 = vld [vmem:[%s6385_s1 + $0x4e] ss:$8 sm:$0x3] }
 0x19c   : > { %v927_v57 = vmul.f32 %v920_v47, %v913_v54  ;;  %v928_v58 = vmul.f32 %v924_v27, %v912_v53  ;;  %4308 = vmatprep.subr.msk.mxu0 %vm747_vm4, %v1075_v55  ;;  %4297 = vmatmul.mubr.msk.f32.vlgmr.msra.gmra.mxu0 %vm6420_vm10, %v726_v29  ;;  %v1492_v46 = vrot.slane %v4323_v43, %v4849_v10  ;;  %v1996_v52 = vld [vmem:[#allocation4 + $0x170] sm:$0xff]  ;;  %v1995_v53 = vld [vmem:[#allocation4 + $0x168] sm:$0xff]  ;;  %v1993_v54 = vld [vmem:[#allocation4 + $0x158] sm:$0xff] }
 0x19d   : > { %4309 = vmatpush1.msk.msra.mxu0 %vm747_vm4, %v1074_v59  ;;  %1155 = vmatprep.mubr.f32.mxu0 %v6425_v0  ;;  %v1496_v48 = vrot.slane %v4323_v43, %v4855_v12  ;;  %v1992_v55 = vld [vmem:[#allocation4 + $0x150] sm:$0xff]  ;;  %v1986_v59 = vld [vmem:[#allocation4 + $0x120] sm:$0xff] }
 0x19e   : > { %v931_v61 = vrot.slane %v927_v57, 4  ;;  %v932_v62 = vrot.slane %v928_v58, 4  ;;  %v859_v63 = vpop.permute.xlu0 %858  ;;  %v857_v1 = vpop.permute.xlu1 %856  ;;  %v1989_v57 = vld [vmem:[#allocation4 + $0x138] sm:$0xff]  ;;  %v1987_v58 = vld [vmem:[#allocation4 + $0x128] sm:$0xff]  ;;  %v2022_v43 = vld [vmem:[#allocation4 + $0x240] sm:$0xff] }
 0x19f   : > { %v860_v2 = vsel %vm521_vm6, %v857_v1, %v859_v63  ;;  %v861_v3 = vsel %vm521_vm6, %v859_v63, %v857_v1  ;;  %v1071_v20 = vld [vmem:[#allocation2 + $0x50] sm:$0xff]  ;;  %v1070_v23 = vld [vmem:[#allocation2 + $0x100] sm:$0xff]  ;;  %v1978_v63 = vld [vmem:[#allocation4 + $0xe0] sm:$0xff] }
 0x1a0   : > { %935 = vst [vmem:[#allocation2 + $0x18] sm:$0xf0] %v931_v61  ;;  %936 = vst [vmem:[#allocation2 + $0x68] sm:$0xf0] %v932_v62  ;;  %v875_v4 = vmul.f32 %v868_v56, %v861_v3  ;;  %v876_v5 = vmul.f32 %v872_v28, %v860_v2  ;;  %v1990_v56 = vld [vmem:[#allocation4 + $0x140] sm:$0xff]  ;;  %v1984_v28 = vld [vmem:[#allocation4 + $0x110] sm:$0xff] }
 0x1a1   : > { %v1073_v8 = vld [vmem:[#allocation2 + $0xa0] sm:$0xff]  ;;  %v1072_v11 = vld [vmem:[#allocation2 + $0x88] sm:$0xff]  ;;  %v1981_v61 = vld [vmem:[#allocation4 + $0xf8] sm:$0xff] }
 0x1a2   : > { %v879_v14 = vrot.slane %v875_v4, 4  ;;  %v880_v15 = vrot.slane %v876_v5, 4  ;;  %v888_v16 = vpop.permute.xlu0 %887  ;;  %v886_v17 = vpop.permute.xlu1 %885  ;;  %1115 = vmatprep.subr.mxu0 %v1073_v8  ;;  %v1980_v62 = vld [vmem:[#allocation4 + $0xf0] sm:$0xff]  ;;  %v1977_v1 = vld [vmem:[#allocation4 + $0xd8] sm:$0xff]  ;;  %v1975_v2 = vld [vmem:[#allocation4 + $0xc8] sm:$0xff] }
 0x1a3   : > { %v889_v18 = vsel %vm551_vm7, %v886_v17, %v888_v16  ;;  %v890_v19 = vsel %vm551_vm7, %v888_v16, %v886_v17  ;;  %1116 = vmatpush1.msra.mxu0 %v1072_v11  ;;  %v1974_v3 = vld [vmem:[#allocation4 + $0xc0] sm:$0xff]  ;;  %v1972_v4 = vld [vmem:[#allocation4 + $0xb0] sm:$0xff]  ;;  %v1971_v5 = vld [vmem:[#allocation4 + $0xa8] sm:$0xff]  ;;  %vm1645_vm7 = vcmp.lt.s32.totalorder %v4910_v25, 77 }
 0x1a4   : > { %883 = vst [vmem:[#allocation2 + $0x108] sm:$0xf0] %v879_v14  ;;  %884 = vst [vmem:[#allocation2 + $0x10] sm:$0xf0] %v880_v15  ;;  %v904_v21 = vmul.f32 %v897_v6, %v890_v19  ;;  %v905_v22 = vmul.f32 %v901_v7, %v889_v18  ;;  %1117 = vmatprep.subr.mxu0 %v1071_v20  ;;  %v1969_v6 = vld [vmem:[#allocation4 + $0x98] sm:$0xff]  ;;  %v1968_v7 = vld [vmem:[#allocation4 + $0x90] sm:$0xff] }
 0x1a5   : > { %1118 = vmatpush1.msra.mxu0 %v1070_v23  ;;  %v1966_v8 = vld [vmem:[#allocation4 + $0x80] sm:$0xff]  ;;  %v1965_v11 = vld [vmem:[#allocation4 + $0x78] sm:$0xff]  ;;  %v1960_v15 = vld [vmem:[#allocation4 + $0x50] sm:$0xff] }
 0x1a6   : > { %906 = vst [vmem:[#allocation2 + $0x18] sm:$0xf] %v904_v21  ;;  %907 = vst [vmem:[#allocation2 + $0x68] sm:$0xf] %v905_v22  ;;  %v836_v30 = vpop.permute.xlu0 %835  ;;  %v834_v31 = vpop.permute.xlu1 %833  ;;  %v1962_v14 = vld [vmem:[#allocation4 + $0x60] sm:$0xff]  ;;  %v1959_v16 = vld [vmem:[#allocation4 + $0x48] sm:$0xff] }
 0x1a7   : > { %v837_v32 = vsel %vm498_vm9, %v834_v31, %v836_v30  ;;  %v838_v33 = vsel %vm498_vm9, %v836_v30, %v834_v31  ;;  %v1957_v17 = vld [vmem:[#allocation4 + $0x38] sm:$0xff]  ;;  %v1956_v18 = vld [vmem:[#allocation4 + $0x30] sm:$0xff]  ;;  %v1954_v19 = vld [vmem:[#allocation4 + $0x20] sm:$0xff] }
 0x1a8   : > { %v852_v34 = vmul.f32 %v845_v24, %v838_v33  ;;  %v853_v35 = vmul.f32 %v849_v26, %v837_v32  ;;  %v1953_v20 = vld [vmem:[#allocation4 + $0x18] sm:$0xff]  ;;  %v1951_v21 = vld [vmem:[#allocation4 + $0x8] sm:$0xff]  ;;  %v1950_v22 = vld [vmem:[#allocation4] sm:$0xff] }
 0x1a9   : > { %v2044_v23 = vld [vmem:[#allocation4 + $0x2f0] sm:$0xff]  ;;  %v2043_v24 = vld [vmem:[#allocation4 + $0x2e8] sm:$0xff]  ;;  %v2041_v26 = vld [vmem:[#allocation4 + $0x2d8] sm:$0xff] }
 0x1aa   : > { %854 = vst [vmem:[#allocation2 + $0x108] sm:$0xf] %v852_v34  ;;  %855 = vst [vmem:[#allocation2 + $0x10] sm:$0xf] %v853_v35  ;;  %v2040_v30 = vld [vmem:[#allocation4 + $0x2d0] sm:$0xff]  ;;  %v2038_v31 = vld [vmem:[#allocation4 + $0x2c0] sm:$0xff] }
 0x1ab   : > { %v2037_v32 = vld [vmem:[#allocation4 + $0x2b8] sm:$0xff]  ;;  %v2035_v33 = vld [vmem:[#allocation4 + $0x2a8] sm:$0xff]  ;;  %v2034_v34 = vld [vmem:[#allocation4 + $0x2a0] sm:$0xff] }
 0x1ac   : > { %v2032_v35 = vld [vmem:[#allocation4 + $0x290] sm:$0xff] }
 0x1ad   : > { %v1069_v36 = vld [vmem:[#allocation2 + $0x68] sm:$0xff]  ;;  %v1068_v37 = vld [vmem:[#allocation2 + $0x18] sm:$0xff] }
 0x1ae   : > { %1119 = vmatprep.subr.mxu0 %v1069_v36  ;;  %v2031_v36 = vld [vmem:[#allocation4 + $0x288] sm:$0xff] }
 0x1af   : > { %1120 = vmatpush1.msra.mxu0 %v1068_v37  ;;  %v2029_v37 = vld [vmem:[#allocation4 + $0x278] sm:$0xff] }
 0x1b1   : > { %v1067_v38 = vld [vmem:[#allocation2 + $0x10] sm:$0xff]  ;;  %v1066_v39 = vld [vmem:[#allocation2 + $0x108] sm:$0xff] }
 0x1b2   : > { %1121 = vmatprep.subr.mxu0 %v1067_v38  ;;  %v2028_v38 = vld [vmem:[#allocation4 + $0x270] sm:$0xff] }
 0x1b3   : > { %1122 = vmatpush1.msra.mxu0 %v1066_v39  ;;  %v1080_v45 = vpop.permute.xlu1 %1079  ;;  %v2026_v39 = vld [vmem:[#allocation4 + $0x260] sm:$0xff] }
 0x1b4   : > { %4310 = vmatmul.mubr.msk.f32.vlgmr.msra.gmra.mxu0 %vm6420_vm10, %v4307_v40  ;;  %2046 = vmatprep.subr.mxu0 %v1996_v52  ;;  %v2025_v40 = vld [vmem:[#allocation4 + $0x258] sm:$0xff]  ;;  %v2010_v52 = vld [vmem:[#allocation4 + $0x1e0] sm:$0xff]  ;;  %vm2902_vm10 = vcmp.lt.s32.totalorder %v4910_v25, 108 }
 0x1b5   : > { %2047 = vmatpush1.msra.mxu0 %v1995_v53  ;;  %v2008_v53 = vld [vmem:[#allocation4 + $0x1d0] sm:$0xff] }
 0x1b6   : > { %2048 = vmatprep.subr.mxu0 %v1993_v54  ;;  %v2007_v54 = vld [vmem:[#allocation4 + $0x1c8] sm:$0xff] }
 0x1b7   : > { %2049 = vmatpush1.msra.mxu0 %v1992_v55  ;;  %v2005_v55 = vld [vmem:[#allocation4 + $0x1b8] sm:$0xff] }
 0x1b8   : > { %2050 = vmatprep.subr.mxu0 %v1990_v56  ;;  %v2004_v56 = vld [vmem:[#allocation4 + $0x1b0] sm:$0xff] }
 0x1b9   : > { %2051 = vmatpush1.msra.mxu0 %v1989_v57  ;;  %v2002_v57 = vld [vmem:[#allocation4 + $0x1a0] sm:$0xff] }
 0x1ba   : > { %2052 = vmatprep.subr.mxu0 %v1987_v58  ;;  %v2001_v58 = vld [vmem:[#allocation4 + $0x198] sm:$0xff] }
 0x1bb   : > { %2053 = vmatpush1.msra.mxu0 %v1986_v59  ;;  %v397_v59 = vld [vmem:[%s6387_s3 + $0x8] sm:$0xf] }
 0x1bc   : > { %2054 = vmatprep.subr.mxu0 %v1984_v28  ;;  %v1999_v28 = vld [vmem:[#allocation4 + $0x188] sm:$0xff] }
 0x1bd   : > { %2055 = vmatpush1.msra.mxu0 %v1983_v60  ;;  %v1998_v60 = vld [vmem:[#allocation4 + $0x180] sm:$0xff] }
 0x1be   : > { %2056 = vmatprep.subr.mxu0 %v1981_v61 }
 0x1bf   : > { %2057 = vmatpush1.msra.mxu0 %v1980_v62 }
 0x1c0   : > { %2058 = vmatprep.subr.mxu0 %v1978_v63 }
 0x1c1   : > { %2059 = vmatpush1.msra.mxu0 %v1977_v1 }
 0x1c2   : > { %2060 = vmatprep.subr.mxu0 %v1975_v2 }
 0x1c3   : > { %2061 = vmatpush1.msra.mxu0 %v1974_v3 }
 0x1c4   : > { %2062 = vmatprep.subr.mxu0 %v1972_v4 }
 0x1c5   : > { %2063 = vmatpush1.msra.mxu0 %v1971_v5 }
 0x1c6   : > { %2064 = vmatprep.subr.mxu0 %v1969_v6 }
 0x1c7   : > { %2065 = vmatpush1.msra.mxu0 %v1968_v7 }
 0x1c8   : > { %2066 = vmatprep.subr.mxu0 %v1966_v8 }
 0x1c9   : > { %2067 = vmatpush1.msra.mxu0 %v1965_v11  ;;  %v4332_v11 = vld [vmem:[%s6385_s1 + $0x67] ss:$8 sm:$0x3] }
 0x1ca   : > { %2068 = vmatprep.subr.mxu0 %v1963_v13 }
 0x1cb   : > { %2069 = vmatpush1.msra.mxu0 %v1962_v14 }
 0x1cc   : > { %2070 = vmatprep.subr.mxu0 %v1960_v15 }
 0x1cd   : > { %2071 = vmatpush1.msra.mxu0 %v1959_v16 }
 0x1ce   : > { %2072 = vmatprep.subr.mxu0 %v1957_v17 }
 0x1cf   : > { %2073 = vmatpush1.msra.mxu0 %v1956_v18 }
 0x1d0   : > { %2074 = vmatprep.subr.mxu0 %v1954_v19 }
 0x1d1   : > { %2075 = vmatpush1.msra.mxu0 %v1953_v20 }
 0x1d2   : > { %2076 = vmatprep.subr.mxu0 %v1951_v21  ;;  %v1732_v21 = vrot.slane %v4332_v11, %v4849_v10 }
 0x1d3   : > { %2077 = vmatpush1.msra.mxu0 %v1950_v22  ;;  %v1736_v22 = vrot.slane %v4332_v11, %v4855_v12 }
 0x1d4   : > { %2078 = vmatprep.subr.mxu0 %v2044_v23  ;;  %v4333_v23 = vld [vmem:[%s6385_s1 + $0x78] ss:$8 sm:$0x3] }
 0x1d5   : > { %2079 = vmatpush2.msra.mxu0 %v2043_v24 }
 0x1d6   : > { %2080 = vmatprep.subr.mxu0 %v2041_v26 }
 0x1d7   : > { %2081 = vmatpush2.msra.mxu0 %v2040_v30 }
 0x1d8   : > { %2082 = vmatprep.subr.mxu0 %v2038_v31 }
 0x1d9   : > { %2083 = vmatpush2.msra.mxu0 %v2037_v32 }
 0x1da   : > { %2084 = vmatprep.subr.mxu0 %v2035_v33 }
 0x1db   : > { %2085 = vmatpush2.msra.mxu0 %v2034_v34  ;;  %v1762_v34 = vrot.slane %v4333_v23, %v4849_v10 }
 0x1dc   : > { %2086 = vmatprep.subr.mxu0 %v2032_v35  ;;  %v1766_v35 = vrot.slane %v4333_v23, %v4855_v12 }
 0x1dd   : > { %2087 = vmatpush2.msra.mxu0 %v2031_v36  ;;  %v4330_v36 = vld [vmem:[%s6385_s1 + $0x65] ss:$8 sm:$0x3] }
 0x1de   : > { %2088 = vmatprep.subr.mxu0 %v2029_v37 }
 0x1df   : > { %2089 = vmatpush2.msra.mxu0 %v2028_v38 }
 0x1e0   : > { %2090 = vmatprep.subr.mxu0 %v2026_v39 }
 0x1e1   : > { %2091 = vmatpush2.msra.mxu0 %v2025_v40 }
 0x1e2   : > { %2092 = vmatprep.subr.mxu0 %v2023_v41 }
 0x1e3   : > { %2093 = vmatpush2.msra.mxu0 %v2022_v43 }
 0x25c   : > { %v5099_v42 = vpop.f32.mrf.mxu0 }
 0x25d   : > { %6439 = vst [vmem:[#allocation10_spill] sm:$0xff] %v5099_v42 }
 0x25e   : > { %v5104_v44 = vpop.f32.mrf.mxu0 }
 0x25f   : > { %6440 = vst [vmem:[#allocation11_spill] sm:$0xff] %v5104_v44 }
 0x274   : > { %v1157_v47 = vpop.f32.mrf.mxu0 }
 0x275   : > { %v5107_v27 = vadd.f32 %v1157_v47, %v1080_v45  ;;  %v2017_v47 = vld [vmem:[#allocation4 + $0x218] sm:$0xff] }
 0x276   : > { %v1159_v49 = vpop.f32.mrf.mxu0 }
 0x277   : > { %v5110_v29 = vadd.f32 %v1159_v49, %v1080_v45  ;;  %1773 = vrot.lane.b32.xlu0 %v5107_v27, %s4669_s19  ;;  %v1499_v50 = vmul.f32 %v1492_v46, %v5107_v27  ;;  %v2020_v45 = vld [vmem:[#allocation4 + $0x230] sm:$0xff]  ;;  %v2019_v46 = vld [vmem:[#allocation4 + $0x228] sm:$0xff]  ;;  %v2014_v49 = vld [vmem:[#allocation4 + $0x200] sm:$0xff] }
 0x278   : > { %2094 = vmatprep.subr.mxu0 %v2020_v45 }
 0x279   : > { %1775 = vrot.lane.b32.xlu1 %v5110_v29, %s4669_s19  ;;  %v1500_v51 = vmul.f32 %v1496_v48, %v5110_v29  ;;  %1501 = vst [vmem:[#allocation2 + $0x120] sm:$0xf] %v1499_v50  ;;  %s4679_s19 = smov 125   ;;  %2095 = vmatpush2.msra.mxu0 %v2019_v46  ;;  %v2016_v48 = vld [vmem:[#allocation4 + $0x210] sm:$0xff]  ;;  %v2013_v50 = vld [vmem:[#allocation4 + $0x1f8] sm:$0xff] }
 0x27a   : > { %2096 = vmatprep.subr.mxu0 %v2017_v47  ;;  %v1678_v47 = vrot.slane %v4330_v36, %v4849_v10 }
 0x27b   : > { %1803 = vrot.lane.b32.xlu0 %v5107_v27, %s4670_s20  ;;  %1502 = vst [vmem:[#allocation2 + $0x98] sm:$0xf] %v1500_v51  ;;  %2097 = vmatpush2.msra.mxu0 %v2016_v48  ;;  %v2011_v51 = vld [vmem:[#allocation4 + $0x1e8] sm:$0xff]  ;;  %v1682_v48 = vrot.slane %v4330_v36, %v4855_v12 }
 0x27c   : > { %2098 = vmatprep.subr.mxu0 %v2014_v49  ;;  %v4331_v49 = vld [vmem:[%s6385_s1 + $0x66] ss:$8 sm:$0x3]  ;;  %v4327_v36 = vld [vmem:[%s6385_s1 + $0x62] ss:$8 sm:$0x3] }
 0x27d   : > { %1805 = vrot.lane.b32.xlu1 %v5110_v29, %s4670_s20  ;;  %s4680_s20 = smov 122   ;;  %2099 = vmatpush2.msra.mxu0 %v2013_v50 }
 0x27e   : > { %2100 = vmatprep.subr.mxu0 %v2011_v51 }
 0x27f   : > { %1719 = vrot.lane.b32.xlu0 %v5107_v27, %s6410_s21  ;;  %2101 = vmatpush2.msra.mxu0 %v2010_v52 }
 0x280   : > { %2102 = vmatprep.subr.mxu0 %v2008_v53 }
 0x281   : > { %1721 = vrot.lane.b32.xlu1 %v5110_v29, %s6410_s21  ;;  %2103 = vmatpush2.msra.mxu0 %v2007_v54 }
 0x282   : > { %2104 = vmatprep.subr.mxu0 %v2005_v55 }
 0x283   : > { %1749 = vrot.lane.b32.xlu0 %v5107_v27, %s4672_s22  ;;  %2105 = vmatpush2.msra.mxu0 %v2004_v56 }
 0x284   : > { %2106 = vmatprep.subr.mxu0 %v2002_v57 }
 0x285   : > { %1751 = vrot.lane.b32.xlu1 %v5110_v29, %s4672_s22  ;;  %s4681_s22 = smov 3   ;;  %2107 = vmatpush2.msra.mxu0 %v2001_v58  ;;  %v1708_v58 = vrot.slane %v4331_v49, %v4849_v10 }
 0x286   : > { %2108 = vmatprep.subr.mxu0 %v1999_v28  ;;  %v4328_v28 = vld [vmem:[%s6385_s1 + $0x63] ss:$8 sm:$0x3] }
 0x287   : > { %1665 = vrot.lane.b32.xlu0 %v5107_v27, %s4673_s26  ;;  %2109 = vmatpush2.msra.mxu0 %v1998_v60 }
 0x288   : > { %4449 = vmatprep.subr.mxu0 %v6425_v0 }
 0x289   : > { %1667 = vrot.lane.b32.xlu1 %v5110_v29, %s4673_s26  ;;  %s4682_s26 = smov 42  }
 0x28b   : > { %1695 = vrot.lane.b32.xlu0 %v5107_v27, %s6396_s29 }
 0x28d   : > { %1697 = vrot.lane.b32.xlu1 %v5110_v29, %s6396_s29  ;;  %s6400_s29 = smov 2  }
 0x28f   : > { %1611 = vrot.lane.b32.xlu0 %v5107_v27, %s4675_s12 }
 0x291   : > { %1613 = vrot.lane.b32.xlu1 %v5110_v29, %s4675_s12  ;;  %s4683_s12 = smov 6  }
 0x293   : > { %1641 = vrot.lane.b32.xlu0 %v5107_v27, %s4676_s14 }
 0x295   : > { %1643 = vrot.lane.b32.xlu1 %v5110_v29, %s4676_s14  ;;  %s4684_s14 = smov 48  }
 0x297   : > { %1557 = vrot.lane.b32.xlu0 %v5107_v27, %s4677_s17 }
 0x299   : > { %1559 = vrot.lane.b32.xlu1 %v5110_v29, %s4677_s17  ;;  %s4685_s17 = smov 45  }
 0x29b   : > { %1587 = vrot.lane.b32.xlu0 %v5107_v27, %s4678_s18 }
 0x29d   : > { %1589 = vrot.lane.b32.xlu1 %v5110_v29, %s4678_s18  ;;  %s4686_s18 = smov 54  }
 0x29f   : > { %1503 = vrot.lane.b32.xlu0 %v5107_v27, %s4679_s19 }
 0x2a1   : > { %1505 = vrot.lane.b32.xlu1 %v5110_v29, %s4679_s19  ;;  %s4687_s19 = smov 51  }
 0x2a3   : > { %1533 = vrot.lane.b32.xlu0 %v5107_v27, %s4680_s20 }
 0x2a5   : > { %1535 = vrot.lane.b32.xlu1 %v5110_v29, %s4680_s20  ;;  %s4688_s20 = smov 93  }
 0x2a7   : > { %1456 = vrot.lane.b32.xlu0 %v5107_v27, %s4681_s22 }
 0x2a9   : > { %1458 = vrot.lane.b32.xlu1 %v5110_v29, %s4681_s22  ;;  %s6418_s22 = smov 90  }
 0x2ab   : > { %1402 = vrot.lane.b32.xlu0 %v5107_v27, %s4682_s26 }
 0x2ad   : > { %1404 = vrot.lane.b32.xlu1 %v5110_v29, %s4682_s26  ;;  %s4690_s26 = smov 99  }
 0x2af   : > { %1432 = vrot.lane.b32.xlu0 %v5107_v27, %s4683_s12 }
 0x2b1   : > { %1434 = vrot.lane.b32.xlu1 %v5110_v29, %s4683_s12  ;;  %s4691_s12 = smov 96  }
 0x2b3   : > { %1348 = vrot.lane.b32.xlu0 %v5107_v27, %s4684_s14 }
 0x2b5   : > { %1350 = vrot.lane.b32.xlu1 %v5110_v29, %s4684_s14  ;;  %s4692_s14 = smov 102  }
 0x2b7   : > { %1378 = vrot.lane.b32.xlu0 %v5107_v27, %s4685_s17 }
 0x2b9   : > { %1380 = vrot.lane.b32.xlu1 %v5110_v29, %s4685_s17  ;;  %s4698_s17 = smov 110  }
 0x2bb   : > { %1294 = vrot.lane.b32.xlu0 %v5107_v27, %s4686_s18 }
 0x2bd   : > { %1296 = vrot.lane.b32.xlu1 %v5110_v29, %s4686_s18  ;;  %s4694_s18 = smov 92  }
 0x2bf   : > { %1324 = vrot.lane.b32.xlu0 %v5107_v27, %s4687_s19 }
 0x2c1   : > { %1326 = vrot.lane.b32.xlu1 %v5110_v29, %s4687_s19  ;;  %s4695_s19 = smov 94  }
 0x2c3   : > { %1240 = vrot.lane.b32.xlu0 %v5107_v27, %s4688_s20 }
 0x2c5   : > { %1242 = vrot.lane.b32.xlu1 %v5110_v29, %s4688_s20 }
 0x2c7   : > { %1270 = vrot.lane.b32.xlu0 %v5107_v27, %s6418_s22 }
 0x2c9   : > { %1272 = vrot.lane.b32.xlu1 %v5110_v29, %s6418_s22 }
 0x2cb   : > { %1186 = vrot.lane.b32.xlu0 %v5107_v27, %s4690_s26 }
 0x2cd   : > { %1188 = vrot.lane.b32.xlu1 %v5110_v29, %s4690_s26  ;;  %s4696_s26 = smov 108  }
 0x2cf   : > { %1216 = vrot.lane.b32.xlu0 %v5107_v27, %s4691_s12 }
 0x2d1   : > { %1218 = vrot.lane.b32.xlu1 %v5110_v29, %s4691_s12  ;;  %s4697_s12 = smov 109  }
 0x2d3   : > { %1162 = vrot.lane.b32.xlu0 %v5107_v27, %s4692_s14  ;;  %v4334_v27 = vld [vmem:[%s6385_s1 + $0x79] ss:$8 sm:$0x3] }
 0x2d4   : > { %v1786_v62 = vrot.slane %v4334_v27, %v4849_v10  ;;  %v1790_v63 = vrot.slane %v4334_v27, %v4855_v12 }
 0x2d5   : > { %1164 = vrot.lane.b32.xlu1 %v5110_v29, %s4692_s14  ;;  %v4335_v29 = vld [vmem:[%s6385_s1 + $0x7a] ss:$8 sm:$0x3]  ;;  %s4693_s14 = smov 91  }
 0x2d6   : > { %v1816_v7 = vrot.slane %v4335_v29, %v4849_v10  ;;  %v1820_v8 = vrot.slane %v4335_v29, %v4855_v12 }
 0x2d7   : > { %405 = vperm.xlu0 %4579, %v397_v59   ;;  %v1712_v59 = vrot.slane %v4331_v49, %v4855_v12 }
 0x2e9   : > { %v1774_v61 = vpop.permute.xlu0 %1773 }
 0x2eb   : > { %v1776_v1 = vpop.permute.xlu1 %1775 }
 0x2ec   : > { %v1778_v2 = vsel %vm1777_vm11, %v1774_v61, %v1776_v1  ;;  %v1779_v3 = vsel %vm1777_vm11, %v1776_v1, %v1774_v61  ;;  %vm1561_vm11 = vcmp.lt.s32.totalorder %v4910_v25, 86 }
 0x2ed   : > { %v1793_v4 = vmul.f32 %v1786_v62, %v1778_v2  ;;  %v1794_v5 = vmul.f32 %v1790_v63, %v1779_v3  ;;  %v1804_v6 = vpop.permute.xlu0 %1803  ;;  %v1624_v3 = vrot.slane %v4328_v28, %v4849_v10 }
 0x2ef   : > { %v1797_v13 = vrot.slane %v1793_v4, 4  ;;  %v1798_v14 = vrot.slane %v1794_v5, 4  ;;  %v1806_v15 = vpop.permute.xlu1 %1805  ;;  %v1628_v4 = vrot.slane %v4328_v28, %v4855_v12  ;;  %v4325_v28 = vld [vmem:[%s6385_s1 + $0x60] ss:$8 sm:$0x3] }
 0x2f0   : > { %v1808_v16 = vsel %vm1807_vm12, %v1804_v6, %v1806_v15  ;;  %v1809_v17 = vsel %vm1807_vm12, %v1806_v15, %v1804_v6  ;;  %vm1591_vm12 = vcmp.lt.s32.totalorder %v4910_v25, 83 }
 0x2f1   : > { %1801 = vst [vmem:[#allocation2 + $0x60] sm:$0xf0] %v1797_v13  ;;  %1802 = vst [vmem:[#allocation2 + $0x110] sm:$0xf0] %v1798_v14  ;;  %v1823_v18 = vmul.f32 %v1816_v7, %v1808_v16  ;;  %v1824_v19 = vmul.f32 %v1820_v8, %v1809_v17  ;;  %v1720_v20 = vpop.permute.xlu0 %1719 }
 0x2f2   : > { %v4329_v7 = vld [vmem:[%s6385_s1 + $0x64] ss:$8 sm:$0x3] }
 0x2f3   : > { %1825 = vst [vmem:[#allocation2 + $0xd0] sm:$0xf] %v1823_v18  ;;  %1826 = vst [vmem:[#allocation2 + $0x8] sm:$0xf] %v1824_v19  ;;  %v1722_v24 = vpop.permute.xlu1 %1721  ;;  %v1654_v17 = vrot.slane %v4329_v7, %v4849_v10  ;;  %v1658_v18 = vrot.slane %v4329_v7, %v4855_v12 }
 0x2f4   : > { %v1724_v26 = vsel %vm1723_vm13, %v1720_v20, %v1722_v24  ;;  %v1725_v30 = vsel %vm1723_vm13, %v1722_v24, %v1720_v20  ;;  %v4326_v19 = vld [vmem:[%s6385_s1 + $0x61] ss:$8 sm:$0x3] }
 0x2f5   : > { %v1739_v31 = vmul.f32 %v1732_v21, %v1724_v26  ;;  %v1740_v32 = vmul.f32 %v1736_v22, %v1725_v30  ;;  %v1750_v33 = vpop.permute.xlu0 %1749 }
 0x2f7   : > { %v1743_v37 = vrot.slane %v1739_v31, 4  ;;  %v1744_v38 = vrot.slane %v1740_v32, 4  ;;  %v1752_v39 = vpop.permute.xlu1 %1751  ;;  %v1570_v32 = vrot.slane %v4326_v19, %v4849_v10 }
 0x2f8   : > { %v1754_v40 = vsel %vm1753_vm14, %v1750_v33, %v1752_v39  ;;  %v1755_v41 = vsel %vm1753_vm14, %v1752_v39, %v1750_v33  ;;  %v1574_v33 = vrot.slane %v4326_v19, %v4855_v12  ;;  %vm1507_vm14 = vcmp.lt.s32.totalorder %v4910_v25, 125  ;;  %v4320_v19 = vld [vmem:[%s6385_s1 + $0x4b] ss:$8 sm:$0x3] }
 0x2f9   : > { %1747 = vst [vmem:[#allocation2 + $0xc8] sm:$0xf0] %v1743_v37  ;;  %1748 = vst [vmem:[#allocation2 + $0x28] sm:$0xf0] %v1744_v38  ;;  %v1769_v43 = vmul.f32 %v1762_v34, %v1754_v40  ;;  %v1770_v45 = vmul.f32 %v1766_v35, %v1755_v41  ;;  %v1666_v46 = vpop.permute.xlu0 %1665 }
 0x2fa   : > { %v1854_v50 = vld [vmem:[#allocation2 + $0x8] sm:$0xf]  ;;  %v1853_v51 = vld [vmem:[#allocation2 + $0xd0] sm:$0xf] }
 0x2fb   : > { %1771 = vst [vmem:[#allocation2 + $0x60] sm:$0xf] %v1769_v43  ;;  %1772 = vst [vmem:[#allocation2 + $0x110] sm:$0xf] %v1770_v45  ;;  %v1668_v52 = vpop.permute.xlu1 %1667  ;;  %4337 = vmatprep.subr.msk.mxu1 %vm747_vm4, %v1854_v50  ;;  %v1600_v45 = vrot.slane %v4327_v36, %v4849_v10 }
 0x2fc   : > { %v1670_v53 = vsel %vm1669_vm15, %v1666_v46, %v1668_v52  ;;  %v1671_v54 = vsel %vm1669_vm15, %v1668_v52, %v1666_v46  ;;  %4338 = vmatpush1.msk.msra.mxu1 %vm747_vm4, %v1853_v51  ;;  %v1604_v46 = vrot.slane %v4327_v36, %v4855_v12  ;;  %vm1537_vm15 = vcmp.lt.s32.totalorder %v4910_v25, 122 }
 0x2fd   : > { %v1685_v55 = vmul.f32 %v1678_v47, %v1670_v53  ;;  %v1686_v56 = vmul.f32 %v1682_v48, %v1671_v54  ;;  %v1696_v57 = vpop.permute.xlu0 %1695  ;;  %v4324_v47 = vld [vmem:[%s6385_s1 + $0x4f] ss:$8 sm:$0x3] }
 0x2ff   : > { %v1689_v60 = vrot.slane %v1685_v55, 4  ;;  %v1690_v27 = vrot.slane %v1686_v56, 4  ;;  %v1698_v61 = vpop.permute.xlu1 %1697  ;;  %v1516_v56 = vrot.slane %v4324_v47, %v4849_v10 }
 0x300   : > { %v1700_v62 = vsel %vm6423_vm0, %v1696_v57, %v1698_v61  ;;  %v1701_v63 = vsel %vm6423_vm0, %v1698_v61, %v1696_v57  ;;  %v1520_v57 = vrot.slane %v4324_v47, %v4855_v12  ;;  %v4318_v47 = vld [vmem:[%s6385_s1 + $0x49] ss:$8 sm:$0x3]  ;;  %vm2868_vm0 = vcmp.lt.s32.totalorder %v4910_v25, 109 }
 0x301   : > { %1693 = vst [vmem:[#allocation2 + $0xd8] sm:$0xf0] %v1689_v60  ;;  %1694 = vst [vmem:[#allocation2 + $0xf0] sm:$0xf0] %v1690_v27  ;;  %v1715_v29 = vmul.f32 %v1708_v58, %v1700_v62  ;;  %v1716_v1 = vmul.f32 %v1712_v59, %v1701_v63  ;;  %v1612_v2 = vpop.permute.xlu0 %1611 }
 0x302   : > { %v1852_v5 = vld [vmem:[#allocation2 + $0x110] sm:$0xff]  ;;  %v1851_v6 = vld [vmem:[#allocation2 + $0x60] sm:$0xff] }
 0x303   : > { %1717 = vst [vmem:[#allocation2 + $0xc8] sm:$0xf] %v1715_v29  ;;  %1718 = vst [vmem:[#allocation2 + $0x28] sm:$0xf] %v1716_v1  ;;  %v1614_v8 = vpop.permute.xlu1 %1613  ;;  %1879 = vmatprep.subr.mxu1 %v1852_v5  ;;  %v1546_v1 = vrot.slane %v4325_v28, %v4849_v10 }
 0x304   : > { %v1616_v11 = vsel %vm1615_vm3, %v1612_v2, %v1614_v8  ;;  %v1617_v13 = vsel %vm1615_vm3, %v1614_v8, %v1612_v2  ;;  %1880 = vmatpush1.msra.mxu1 %v1851_v6  ;;  %v1550_v2 = vrot.slane %v4325_v28, %v4855_v12  ;;  %vm1460_vm3 = vcmp.lt.s32.totalorder %v4910_v25, 3  ;;  %v4319_v28 = vld [vmem:[%s6385_s1 + $0x4a] ss:$8 sm:$0x3] }
 0x305   : > { %v1631_v14 = vmul.f32 %v1624_v3, %v1616_v11  ;;  %v1632_v15 = vmul.f32 %v1628_v4, %v1617_v13  ;;  %v1642_v16 = vpop.permute.xlu0 %1641  ;;  %v4322_v3 = vld [vmem:[%s6385_s1 + $0x4d] ss:$8 sm:$0x3] }
 0x307   : > { %v1635_v20 = vrot.slane %v1631_v14, 4  ;;  %v1636_v21 = vrot.slane %v1632_v15, 4  ;;  %v1644_v22 = vpop.permute.xlu1 %1643  ;;  %v1469_v15 = vrot.slane %v4322_v3, %v4849_v10 }
 0x308   : > { %v1646_v23 = vsel %vm1645_vm7, %v1642_v16, %v1644_v22  ;;  %v1647_v24 = vsel %vm1645_vm7, %v1644_v22, %v1642_v16  ;;  %v1473_v16 = vrot.slane %v4322_v3, %v4855_v12  ;;  %vm1406_vm7 = vcmp.lt.s32.totalorder %v4910_v25, 42  ;;  %v4316_v3 = vld [vmem:[%s6385_s1 + $0x37] ss:$8 sm:$0x3] }
 0x309   : > { %1639 = vst [vmem:[#allocation2 + $0x20] sm:$0xf0] %v1635_v20  ;;  %1640 = vst [vmem:[#allocation2 + $0x128] sm:$0xf0] %v1636_v21  ;;  %v1661_v26 = vmul.f32 %v1654_v17, %v1646_v23  ;;  %v1662_v30 = vmul.f32 %v1658_v18, %v1647_v24  ;;  %v1558_v31 = vpop.permute.xlu0 %1557 }
 0x30a   : > { %v1850_v34 = vld [vmem:[#allocation2 + $0x28] sm:$0xff] }
 0x30b   : > { %v1849_v35 = vld [vmem:[#allocation2 + $0xc8] sm:$0xff]  ;;  %1663 = vst [vmem:[#allocation2 + $0xd8] sm:$0xf] %v1661_v26  ;;  %1664 = vst [vmem:[#allocation2 + $0xf0] sm:$0xf] %v1662_v30  ;;  %v1560_v37 = vpop.permute.xlu1 %1559  ;;  %1881 = vmatprep.subr.mxu1 %v1850_v34  ;;  %v1415_v30 = vrot.slane %v4320_v19, %v4849_v10 }
 0x30c   : > { %v1562_v38 = vsel %vm1561_vm11, %v1558_v31, %v1560_v37  ;;  %v1563_v39 = vsel %vm1561_vm11, %v1560_v37, %v1558_v31  ;;  %1882 = vmatpush1.msra.mxu1 %v1849_v35  ;;  %v1419_v31 = vrot.slane %v4320_v19, %v4855_v12  ;;  %vm1436_vm11 = vcmp.lt.s32.totalorder %v4910_v25, 6  ;;  %v4317_v19 = vld [vmem:[%s6385_s1 + $0x48] ss:$8 sm:$0x3] }
 0x30d   : > { %v1577_v40 = vmul.f32 %v1570_v32, %v1562_v38  ;;  %v1578_v41 = vmul.f32 %v1574_v33, %v1563_v39  ;;  %v1588_v43 = vpop.permute.xlu0 %1587  ;;  %v4321_v32 = vld [vmem:[%s6385_s1 + $0x4c] ss:$8 sm:$0x3] }
 0x30f   : > { %v1581_v48 = vrot.slane %v1577_v40, 4  ;;  %v1582_v49 = vrot.slane %v1578_v41, 4  ;;  %v1590_v50 = vpop.permute.xlu1 %1589  ;;  %v1445_v41 = vrot.slane %v4321_v32, %v4849_v10 }
 0x310   : > { %v1592_v51 = vsel %vm1591_vm12, %v1588_v43, %v1590_v50  ;;  %v1593_v52 = vsel %vm1591_vm12, %v1590_v50, %v1588_v43  ;;  %v1449_v43 = vrot.slane %v4321_v32, %v4855_v12  ;;  %vm1352_vm12 = vcmp.lt.s32.totalorder %v4910_v25, 48  ;;  %v4314_v32 = vld [vmem:[%s6385_s1 + $0x35] ss:$8 sm:$0x3] }
 0x311   : > { %1585 = vst [vmem:[#allocation2 + $0xe8] sm:$0xf0] %v1581_v48  ;;  %1586 = vst [vmem:[#allocation2 + $0x30] sm:$0xf0] %v1582_v49  ;;  %v1607_v53 = vmul.f32 %v1600_v45, %v1592_v51  ;;  %v1608_v54 = vmul.f32 %v1604_v46, %v1593_v52  ;;  %v1504_v55 = vpop.permute.xlu0 %1503 }
 0x312   : > { %v1848_v58 = vld [vmem:[#allocation2 + $0xf0] sm:$0xff]  ;;  %v1847_v59 = vld [vmem:[#allocation2 + $0xd8] sm:$0xff] }
 0x313   : > { %1609 = vst [vmem:[#allocation2 + $0x20] sm:$0xf] %v1607_v53  ;;  %1610 = vst [vmem:[#allocation2 + $0x128] sm:$0xf] %v1608_v54  ;;  %v1506_v60 = vpop.permute.xlu1 %1505  ;;  %1883 = vmatprep.subr.mxu1 %v1848_v58  ;;  %v1361_v58 = vrot.slane %v4318_v47, %v4849_v10 }
 0x314   : > { %v1508_v27 = vsel %vm1507_vm14, %v1504_v55, %v1506_v60  ;;  %v1509_v61 = vsel %vm1507_vm14, %v1506_v60, %v1504_v55  ;;  %1884 = vmatpush1.msra.mxu1 %v1847_v59  ;;  %v1365_v59 = vrot.slane %v4318_v47, %v4855_v12  ;;  %vm1382_vm14 = vcmp.lt.s32.totalorder %v4910_v25, 45  ;;  %v4315_v47 = vld [vmem:[%s6385_s1 + $0x36] ss:$8 sm:$0x3] }
 0x315   : > { %v1523_v62 = vmul.f32 %v1516_v56, %v1508_v27  ;;  %v1524_v63 = vmul.f32 %v1520_v57, %v1509_v61  ;;  %v1534_v29 = vpop.permute.xlu0 %1533 }
 0x317   : > { %v1527_v4 = vrot.slane %v1523_v62, 4  ;;  %v1528_v5 = vrot.slane %v1524_v63, 4  ;;  %v1536_v6 = vpop.permute.xlu1 %1535 }
 0x318   : > { %v1538_v7 = vsel %vm1537_vm15, %v1534_v29, %v1536_v6  ;;  %v1539_v8 = vsel %vm1537_vm15, %v1536_v6, %v1534_v29  ;;  %vm1298_vm15 = vcmp.lt.s32.totalorder %v4910_v25, 54 }
 0x319   : > { %1531 = vst [vmem:[#allocation2 + $0x120] sm:$0xf0] %v1527_v4  ;;  %1532 = vst [vmem:[#allocation2 + $0x98] sm:$0xf0] %v1528_v5  ;;  %v1553_v11 = vmul.f32 %v1546_v1, %v1538_v7  ;;  %v1554_v13 = vmul.f32 %v1550_v2, %v1539_v8  ;;  %v1457_v14 = vpop.permute.xlu0 %1456  ;;  %v1391_v1 = vrot.slane %v4319_v28, %v4849_v10 }
 0x31a   : > { %v1846_v17 = vld [vmem:[#allocation2 + $0x128] sm:$0xff]  ;;  %v1845_v18 = vld [vmem:[#allocation2 + $0x20] sm:$0xff]  ;;  %v1395_v2 = vrot.slane %v4319_v28, %v4855_v12 }
 0x31b   : > { %1555 = vst [vmem:[#allocation2 + $0xe8] sm:$0xf] %v1553_v11  ;;  %1556 = vst [vmem:[#allocation2 + $0x30] sm:$0xf] %v1554_v13  ;;  %v1459_v20 = vpop.permute.xlu1 %1458  ;;  %1885 = vmatprep.subr.mxu1 %v1846_v17 }
 0x31c   : > { %v1461_v21 = vsel %vm1460_vm3, %v1457_v14, %v1459_v20  ;;  %v1462_v22 = vsel %vm1460_vm3, %v1459_v20, %v1457_v14  ;;  %1886 = vmatpush1.msra.mxu1 %v1845_v18  ;;  %vm1328_vm3 = vcmp.lt.s32.totalorder %v4910_v25, 51 }
 0x31d   : > { %v1476_v23 = vmul.f32 %v1469_v15, %v1462_v22  ;;  %v1477_v24 = vmul.f32 %v1473_v16, %v1461_v21  ;;  %v1403_v26 = vpop.permute.xlu0 %1402  ;;  %v1307_v15 = vrot.slane %v4316_v3, %v4849_v10  ;;  %v1311_v16 = vrot.slane %v4316_v3, %v4855_v12  ;;  %v4313_v3 = vld [vmem:[%s6385_s1 + $0x34] ss:$8 sm:$0x3] }
 0x31f   : > { %v1480_v33 = vrot.slane %v1476_v23, 4  ;;  %v1481_v34 = vrot.slane %v1477_v24, 4  ;;  %v1405_v35 = vpop.permute.xlu1 %1404 }
 0x320   : > { %v1407_v36 = vsel %vm1406_vm7, %v1403_v26, %v1405_v35  ;;  %v1408_v37 = vsel %vm1406_vm7, %v1405_v35, %v1403_v26  ;;  %v1842_v53 = vld [vmem:[#allocation2 + $0x98] sm:$0xff]  ;;  %v1841_v57 = vld [vmem:[#allocation2 + $0x120] sm:$0xff]  ;;  %vm1244_vm7 = vcmp.lt.s32.totalorder %v4910_v25, 93 }
 0x321   : > { %1484 = vst [vmem:[#allocation2 + $0x58] sm:$0xf0] %v1480_v33  ;;  %1485 = vst [vmem:[#allocation2 + $0x38] sm:$0xf0] %v1481_v34  ;;  %v1422_v38 = vmul.f32 %v1415_v30, %v1408_v37  ;;  %v1423_v39 = vmul.f32 %v1419_v31, %v1407_v36  ;;  %v1433_v40 = vpop.permute.xlu0 %1432  ;;  %v1337_v30 = vrot.slane %v4317_v19, %v4849_v10 }
 0x322   : > { %v1844_v45 = vld [vmem:[#allocation2 + $0x30] sm:$0xff]  ;;  %v1843_v46 = vld [vmem:[#allocation2 + $0xe8] sm:$0xff]  ;;  %v1341_v31 = vrot.slane %v4317_v19, %v4855_v12 }
 0x323   : > { %v1426_v48 = vrot.slane %v1422_v38, 4  ;;  %v1427_v49 = vrot.slane %v1423_v39, 4  ;;  %v1435_v50 = vpop.permute.xlu1 %1434  ;;  %1887 = vmatprep.subr.mxu1 %v1844_v45 }
 0x324   : > { %v1437_v51 = vsel %vm1436_vm11, %v1433_v40, %v1435_v50  ;;  %v1438_v52 = vsel %vm1436_vm11, %v1435_v50, %v1433_v40  ;;  %1888 = vmatpush1.msra.mxu1 %v1843_v46  ;;  %vm6436_vm11 = vcmp.lt.s32.totalorder %v4910_v25, 90 }
 0x325   : > { %1430 = vst [vmem:[#allocation2 + $0xc0] sm:$0xf0] %v1426_v48  ;;  %1431 = vst [vmem:[#allocation2 + $0xb8] sm:$0xf0] %v1427_v49  ;;  %v1452_v54 = vmul.f32 %v1445_v41, %v1438_v52  ;;  %v1453_v55 = vmul.f32 %v1449_v43, %v1437_v51  ;;  %1889 = vmatprep.subr.mxu1 %v1842_v53  ;;  %v1349_v56 = vpop.permute.xlu0 %1348  ;;  %v1253_v41 = vrot.slane %v4314_v32, %v4849_v10 }
 0x326   : > { %1890 = vmatpush1.msra.mxu1 %v1841_v57  ;;  %v1257_v43 = vrot.slane %v4314_v32, %v4855_v12 }
 0x327   : > { %1454 = vst [vmem:[#allocation2 + $0x58] sm:$0xf] %v1452_v54  ;;  %1455 = vst [vmem:[#allocation2 + $0x38] sm:$0xf] %v1453_v55  ;;  %v1351_v60 = vpop.permute.xlu1 %1350  ;;  %v1283_v54 = vrot.slane %v4315_v47, %v4849_v10  ;;  %v1287_v55 = vrot.slane %v4315_v47, %v4855_v12 }
 0x328   : > { %v1353_v27 = vsel %vm1352_vm12, %v1349_v56, %v1351_v60  ;;  %v1354_v61 = vsel %vm1352_vm12, %v1351_v60, %v1349_v56  ;;  %v4312_v56 = vld [vmem:[%s6385_s1 + $0x33] ss:$8 sm:$0x3]  ;;  %vm1190_vm12 = vcmp.lt.s32.totalorder %v4910_v25, 99 }
 0x329   : > { %v1368_v62 = vmul.f32 %v1361_v58, %v1354_v61  ;;  %v1369_v63 = vmul.f32 %v1365_v59, %v1353_v27  ;;  %v1379_v29 = vpop.permute.xlu0 %1378 }
 0x32b   : > { %v1372_v4 = vrot.slane %v1368_v62, 4  ;;  %v1373_v5 = vrot.slane %v1369_v63, 4  ;;  %v1381_v6 = vpop.permute.xlu1 %1380  ;;  %v1199_v63 = vrot.slane %v4312_v56, %v4849_v10 }
 0x32c   : > { %v1383_v7 = vsel %vm1382_vm14, %v1379_v29, %v1381_v6  ;;  %v1384_v8 = vsel %vm1382_vm14, %v1381_v6, %v1379_v29  ;;  %v1203_v29 = vrot.slane %v4312_v56, %v4855_v12  ;;  %vm1220_vm14 = vcmp.lt.s32.totalorder %v4910_v25, 96  ;;  %v1988_v56 = vld [vmem:[#allocation4 + $0x130] sm:$0xff] }
 0x32d   : > { %1376 = vst [vmem:[#allocation2 + $0x88] sm:$0xf0] %v1372_v4  ;;  %1377 = vst [vmem:[#allocation2 + $0xa0] sm:$0xf0] %v1373_v5  ;;  %v1398_v11 = vmul.f32 %v1391_v1, %v1384_v8  ;;  %v1399_v13 = vmul.f32 %v1395_v2, %v1383_v7  ;;  %v1295_v14 = vpop.permute.xlu0 %1294 }
 0x32e   : > { %v1840_v17 = vld [vmem:[#allocation2 + $0x38] sm:$0xff] }
 0x32f   : > { %v1839_v18 = vld [vmem:[#allocation2 + $0x58] sm:$0xff]  ;;  %1400 = vst [vmem:[#allocation2 + $0xc0] sm:$0xf] %v1398_v11  ;;  %1401 = vst [vmem:[#allocation2 + $0xb8] sm:$0xf] %v1399_v13  ;;  %v1297_v20 = vpop.permute.xlu1 %1296  ;;  %1891 = vmatprep.subr.mxu1 %v1840_v17  ;;  %v1229_v13 = vrot.slane %v4313_v3, %v4849_v10 }
 0x330   : > { %v1299_v21 = vsel %vm1298_vm15, %v1295_v14, %v1297_v20  ;;  %v1300_v22 = vsel %vm1298_vm15, %v1297_v20, %v1295_v14  ;;  %1892 = vmatpush1.msra.mxu1 %v1839_v18  ;;  %v1233_v14 = vrot.slane %v4313_v3, %v4855_v12  ;;  %vm1166_vm15 = vcmp.lt.s32.totalorder %v4910_v25, 102  ;;  %v2015_v3 = vld [vmem:[#allocation4 + $0x208] sm:$0xff] }
 0x331   : > { %v1314_v23 = vmul.f32 %v1307_v15, %v1300_v22  ;;  %v1315_v24 = vmul.f32 %v1311_v16, %v1299_v21  ;;  %v1325_v26 = vpop.permute.xlu0 %1324  ;;  %v4311_v15 = vld [vmem:[%s6385_s1 + $0x32] ss:$8 sm:$0x3] }
 0x333   : > { %v1318_v33 = vrot.slane %v1314_v23, 4  ;;  %v1319_v34 = vrot.slane %v1315_v24, 4  ;;  %v1327_v35 = vpop.permute.xlu1 %1326  ;;  %v1175_v23 = vrot.slane %v4311_v15, %v4849_v10  ;;  %v1179_v24 = vrot.slane %v4311_v15, %v4855_v12  ;;  %v1955_v15 = vld [vmem:[#allocation4 + $0x28] sm:$0xff] }
 0x334   : > { %v1329_v36 = vsel %vm1328_vm3, %v1325_v26, %v1327_v35  ;;  %v1330_v37 = vsel %vm1328_vm3, %v1327_v35, %v1325_v26  ;;  %vm6422_vm3 = vcmask 818176  }
 0x335   : > { %1322 = vst [vmem:[#allocation2 + $0x100] sm:$0xf0] %v1318_v33  ;;  %1323 = vst [vmem:[#allocation2 + $0x50] sm:$0xf0] %v1319_v34  ;;  %v1344_v38 = vmul.f32 %v1337_v30, %v1330_v37  ;;  %v1345_v39 = vmul.f32 %v1341_v31, %v1329_v36  ;;  %v1241_v40 = vpop.permute.xlu0 %1240  ;;  %v487_v37 = vpop.f32.mrf.mxu1 }
 0x336   : > { %v1838_v45 = vld [vmem:[#allocation2 + $0xb8] sm:$0xff]  ;;  %v1837_v46 = vld [vmem:[#allocation2 + $0xc0] sm:$0xff] }
 0x337   : > { %1346 = vst [vmem:[#allocation2 + $0x88] sm:$0xf] %v1344_v38  ;;  %1347 = vst [vmem:[#allocation2 + $0xa0] sm:$0xf] %v1345_v39  ;;  %v1243_v48 = vpop.permute.xlu1 %1242  ;;  %1893 = vmatprep.subr.mxu1 %v1838_v45 }
 0x338   : > { %v1245_v49 = vsel %vm1244_vm7, %v1241_v40, %v1243_v48  ;;  %v1246_v50 = vsel %vm1244_vm7, %v1243_v48, %v1241_v40  ;;  %1894 = vmatpush1.msra.mxu1 %v1837_v46  ;;  %v489_v40 = vpop.f32.mrf.mxu1  ;;  %v4336_v46 = vld [vmem:[%s6388_s4 + $0x8] sm:$0xf] }
 0x339   : > { %v1260_v51 = vmul.f32 %v1253_v41, %v1246_v50  ;;  %v1261_v52 = vmul.f32 %v1257_v43, %v1245_v49  ;;  %v1271_v53 = vpop.permute.xlu0 %1270  ;;  %v2045_v49 = vld [vmem:[#allocation4 + $0x2f8] sm:$0xff] }
 0x33a   : > { %v1997_v50 = vld [vmem:[#allocation4 + $0x178] sm:$0xff] }
 0x33b   : > { %v1264_v57 = vrot.slane %v1260_v51, 4  ;;  %v1265_v58 = vrot.slane %v1261_v52, 4  ;;  %v1273_v59 = vpop.permute.xlu1 %1272  ;;  %v2042_v51 = vld [vmem:[#allocation4 + $0x2e0] sm:$0xff] }
 0x33c   : > { %v1275_v28 = vsel %vm6436_vm11, %v1271_v53, %v1273_v59  ;;  %v1276_v60 = vsel %vm6436_vm11, %v1273_v59, %v1271_v53  ;;  %v1994_v52 = vld [vmem:[#allocation4 + $0x160] sm:$0xff]  ;;  %v2039_v53 = vld [vmem:[#allocation4 + $0x2c8] sm:$0xff] }
 0x33d   : > { %1268 = vst [vmem:[#allocation2 + $0x18] sm:$0xf0] %v1264_v57  ;;  %1269 = vst [vmem:[#allocation2 + $0x68] sm:$0xf0] %v1265_v58  ;;  %v1290_v27 = vmul.f32 %v1283_v54, %v1276_v60  ;;  %v1291_v61 = vmul.f32 %v1287_v55, %v1275_v28  ;;  %v1187_v62 = vpop.permute.xlu0 %1186  ;;  %v1991_v54 = vld [vmem:[#allocation4 + $0x148] sm:$0xff]  ;;  %v2036_v55 = vld [vmem:[#allocation4 + $0x2b0] sm:$0xff] }
 0x33e   : > { %v1836_v1 = vld [vmem:[#allocation2 + $0xa0] sm:$0xff]  ;;  %v1835_v2 = vld [vmem:[#allocation2 + $0x88] sm:$0xff]  ;;  %v2033_v57 = vld [vmem:[#allocation4 + $0x298] sm:$0xff] }
 0x33f   : > { %1292 = vst [vmem:[#allocation2 + $0x100] sm:$0xf] %v1290_v27  ;;  %1293 = vst [vmem:[#allocation2 + $0x50] sm:$0xf] %v1291_v61  ;;  %v1189_v4 = vpop.permute.xlu1 %1188  ;;  %1895 = vmatprep.subr.mxu1 %v1836_v1  ;;  %v1985_v58 = vld [vmem:[#allocation4 + $0x118] sm:$0xff]  ;;  %v2030_v59 = vld [vmem:[#allocation4 + $0x280] sm:$0xff] }
 0x340   : > { %v1191_v5 = vsel %vm1190_vm12, %v1187_v62, %v1189_v4  ;;  %v1192_v6 = vsel %vm1190_vm12, %v1189_v4, %v1187_v62  ;;  %1896 = vmatpush1.msra.mxu1 %v1835_v2  ;;  %v1982_v28 = vld [vmem:[#allocation4 + $0x100] sm:$0xff]  ;;  %v2027_v60 = vld [vmem:[#allocation4 + $0x268] sm:$0xff]  ;;  %v2024_v61 = vld [vmem:[#allocation4 + $0x250] sm:$0xff]  ;;  %vm6421_vm12 = vmmov 0  }
 0x341   : > { %v1206_v7 = vmul.f32 %v1199_v63, %v1192_v6  ;;  %v1207_v8 = vmul.f32 %v1203_v29, %v1191_v5  ;;  %v1217_v11 = vpop.permute.xlu0 %1216  ;;  %v1979_v27 = vld [vmem:[#allocation4 + $0xe8] sm:$0xff]  ;;  %v1976_v62 = vld [vmem:[#allocation4 + $0xd0] sm:$0xff]  ;;  %v2021_v63 = vld [vmem:[#allocation4 + $0x238] sm:$0xff] }
 0x342   : > { %v1973_v29 = vld [vmem:[#allocation4 + $0xb8] sm:$0xff]  ;;  %v2018_v1 = vld [vmem:[#allocation4 + $0x220] sm:$0xff]  ;;  %v1967_v4 = vld [vmem:[#allocation4 + $0x88] sm:$0xff] }
 0x343   : > { %v1210_v16 = vrot.slane %v1206_v7, 4  ;;  %v1211_v17 = vrot.slane %v1207_v8, 4  ;;  %v1219_v18 = vpop.permute.xlu1 %1218  ;;  %v1970_v2 = vld [vmem:[#allocation4 + $0xa0] sm:$0xff]  ;;  %v2012_v5 = vld [vmem:[#allocation4 + $0x1f0] sm:$0xff]  ;;  %v2009_v7 = vld [vmem:[#allocation4 + $0x1d8] sm:$0xff] }
 0x344   : > { %v1221_v19 = vsel %vm1220_vm14, %v1217_v11, %v1219_v18  ;;  %v1222_v20 = vsel %vm1220_vm14, %v1219_v18, %v1217_v11  ;;  %v1964_v6 = vld [vmem:[#allocation4 + $0x70] sm:$0xff]  ;;  %v1961_v8 = vld [vmem:[#allocation4 + $0x58] sm:$0xff]  ;;  %v2006_v11 = vld [vmem:[#allocation4 + $0x1c0] sm:$0xff]  ;;  %vm3055_vm14 = vcmp.lt.s32.totalorder %v4910_v25, 91 }
 0x345   : > { %1214 = vst [vmem:[#allocation2 + $0x108] sm:$0xf0] %v1210_v16  ;;  %1215 = vst [vmem:[#allocation2 + $0x10] sm:$0xf0] %v1211_v17  ;;  %v1236_v21 = vmul.f32 %v1229_v13, %v1222_v20  ;;  %v1237_v22 = vmul.f32 %v1233_v14, %v1221_v19  ;;  %v1163_v31 = vpop.permute.xlu0 %1162  ;;  %v1958_v13 = vld [vmem:[#allocation4 + $0x40] sm:$0xff]  ;;  %v2003_v14 = vld [vmem:[#allocation4 + $0x1a8] sm:$0xff] }
 0x346   : > { %v1834_v26 = vld [vmem:[#allocation2 + $0x50] sm:$0xff]  ;;  %v1833_v30 = vld [vmem:[#allocation2 + $0x100] sm:$0xff]  ;;  %v2000_v16 = vld [vmem:[#allocation4 + $0x190] sm:$0xff] }
 0x347   : > { %1238 = vst [vmem:[#allocation2 + $0x18] sm:$0xf] %v1236_v21  ;;  %1239 = vst [vmem:[#allocation2 + $0x68] sm:$0xf] %v1237_v22  ;;  %v1165_v32 = vpop.permute.xlu1 %1164  ;;  %1897 = vmatprep.subr.mxu1 %v1834_v26  ;;  %v1952_v17 = vld [vmem:[#allocation4 + $0x10] sm:$0xff] }
 0x348   : > { %v1167_v33 = vsel %vm1166_vm15, %v1163_v31, %v1165_v32  ;;  %v1168_v34 = vsel %vm1166_vm15, %v1165_v32, %v1163_v31  ;;  %1898 = vmatpush1.msra.mxu1 %v1833_v30  ;;  %v4352_v18 = vld [vmem:[%s6385_s1 + $0x97] ss:$8 sm:$0x7]  ;;  %v5411_v31 = vsub.s32 2, %v4846_v9  ;;  %vm3021_vm15 = vcmp.lt.s32.totalorder %v4910_v25, 92 }
 0x349   : > { %v1182_v35 = vmul.f32 %v1175_v23, %v1168_v34  ;;  %v1183_v36 = vmul.f32 %v1179_v24, %v1167_v33  ;;  %v2650_v19 = vrot.slane %v4352_v18, %v4849_v10  ;;  %v2654_v20 = vrot.slane %v4352_v18, %v4855_v12 }
 0x34a   : > { %v2658_v33 = vrot.slane %v4352_v18, %v5411_v31  ;;  %v5626_v18 = vld [vmem:[%s6385_s1 + $0xaf] ss:$8 sm:$0x7] }
 0x34b   : > { %1184 = vst [vmem:[#allocation2 + $0x108] sm:$0xf] %v1182_v35  ;;  %1185 = vst [vmem:[#allocation2 + $0x10] sm:$0xf] %v1183_v36 }
 0x34e   : > { %v1832_v38 = vld [vmem:[#allocation2 + $0x68] sm:$0xff]  ;;  %v1831_v39 = vld [vmem:[#allocation2 + $0x18] sm:$0xff] }
 0x34f   : > { %1899 = vmatprep.subr.mxu1 %v1832_v38 }
 0x350   : > { %1900 = vmatpush1.msra.mxu1 %v1831_v39 }
 0x352   : > { %v406_v41 = vpop.permute.xlu0 %405  ;;  %v1830_v43 = vld [vmem:[#allocation2 + $0x10] sm:$0xff]  ;;  %v1829_v45 = vld [vmem:[#allocation2 + $0x108] sm:$0xff] }
 0x353   : > { %v5375_v47 = vadd.f32 %v487_v37, %v406_v41  ;;  %v490_v48 = vadd.f32 %v489_v40, %v406_v41  ;;  %1901 = vmatprep.subr.mxu1 %v1830_v43 }
 0x354   : > { %1902 = vmatpush1.msra.mxu1 %v1829_v45 }
 0x355   : > { %4339 = vmatmul.mubr.msk.f32.vlgmr.msra.gmra.mxu1 %vm6422_vm3, %v4336_v46  ;;  %2110 = vmatprep.mubr.f32.mxu0 %v490_v48  ;;  %vm2825_vm3 = vcmp.lt.s32.totalorder %v4910_v25, 110 }
 0x356   : > { %4394 = vmatprep.subr.mxu1 %v2045_v49  ;;  %2111 = vmatmul.mubr.f32.vlgmr.msra.gmra.mxu0 %v5375_v47 }
 0x357   : > { %4395 = vmatpush3.msra.mxu1 %v1997_v50  ;;  %2181 = vmatprep.mubr.f32.mxu1 %v490_v48  ;;  %v5543_v50 = vld [vmem:[%s6385_s1 + $0xc2] ss:$8 sm:$0x7] }
 0x358   : > { %4396 = vmatprep.subr.mxu1 %v2042_v51  ;;  %4475 = vmatprep.mubr.msk.f32.mxu0 %vm6421_vm12, %v6425_v0  ;;  %vm2945_vm12 = vcmp.lt.s32.totalorder %v4910_v25, 94  ;;  %v3069_v42 = vrot.slane %v5543_v50, %v4855_v12 }
 0x359   : > { %4397 = vmatpush3.msra.mxu1 %v1994_v52 }
 0x35a   : > { %4398 = vmatprep.subr.mxu1 %v2039_v53  ;;  %v3065_v53 = vrot.slane %v5543_v50, %v4849_v10 }
 0x35b   : > { %4399 = vmatpush3.msra.mxu1 %v1991_v54  ;;  %v3166_v54 = vld [vmem:[%s6389_s5 + $0xc] sm:$0xf] }
 0x35c   : > { %4400 = vmatprep.subr.mxu1 %v2036_v55  ;;  %v5564_v55 = vld [vmem:[%s6385_s1 + $0xc3] ss:$8 sm:$0x7] }
 0x35d   : > { %4401 = vmatpush3.msra.mxu1 %v1988_v56 }
 0x35e   : > { %4402 = vmatprep.subr.mxu1 %v2033_v57 }
 0x35f   : > { %4403 = vmatpush3.msra.mxu1 %v1985_v58 }
 0x360   : > { %4404 = vmatprep.subr.mxu1 %v2030_v59 }
 0x361   : > { %4405 = vmatpush3.msra.mxu1 %v1982_v28  ;;  %v3107_v28 = vrot.slane %v5564_v55, %v4849_v10 }
 0x362   : > { %4406 = vmatprep.subr.mxu1 %v2027_v60  ;;  %v5579_v60 = vld [vmem:[%s6385_s1 + $0xc0] ss:$8 sm:$0x7] }
 0x363   : > { %4407 = vmatpush3.msra.mxu1 %v1979_v27 }
 0x364   : > { %4408 = vmatprep.subr.mxu1 %v2024_v61 }
 0x365   : > { %4409 = vmatpush3.msra.mxu1 %v1976_v62 }
 0x366   : > { %4410 = vmatprep.subr.mxu1 %v2021_v63 }
 0x367   : > { %4411 = vmatpush3.msra.mxu1 %v1973_v29 }
 0x368   : > { %4412 = vmatprep.subr.mxu1 %v2018_v1  ;;  %v2988_v1 = vrot.slane %v5579_v60, %v4849_v10 }
 0x369   : > { %4413 = vmatpush3.msra.mxu1 %v1970_v2  ;;  %v5594_v2 = vld [vmem:[%s6385_s1 + $0xc1] ss:$8 sm:$0x7] }
 0x36a   : > { %4414 = vmatprep.subr.mxu1 %v2015_v3 }
 0x36b   : > { %4415 = vmatpush3.msra.mxu1 %v1967_v4 }
 0x36c   : > { %4416 = vmatprep.subr.mxu1 %v2012_v5 }
 0x36d   : > { %4417 = vmatpush3.msra.mxu1 %v1964_v6 }
 0x36e   : > { %4418 = vmatprep.subr.mxu1 %v2009_v7  ;;  %v3031_v7 = vrot.slane %v5594_v2, %v4849_v10 }
 0x36f   : > { %4419 = vmatpush3.msra.mxu1 %v1961_v8  ;;  %v5610_v8 = vld [vmem:[%s6385_s1 + $0xae] ss:$8 sm:$0x7] }
 0x370   : > { %4420 = vmatprep.subr.mxu1 %v2006_v11 }
 0x371   : > { %4421 = vmatpush3.msra.mxu1 %v1958_v13 }
 0x372   : > { %4422 = vmatprep.subr.mxu1 %v2003_v14 }
 0x373   : > { %4423 = vmatpush3.msra.mxu1 %v1955_v15 }
 0x374   : > { %4424 = vmatprep.subr.mxu1 %v2000_v16 }
 0x375   : > { %4425 = vmatpush3.msra.mxu1 %v1952_v17  ;;  %v2912_v17 = vrot.slane %v5610_v8, %v4849_v10 }
 0x376   : > { %2182 = vmatmul.mubr.f32.vlgmr.msra.gmra.mxu1 %v5375_v47 }
 0x377   : > { %3248 = vmatprep.mubr.f32.mxu1 %v6425_v0 }
 0x415   : > { %v5401_v26 = vpop.f32.mrf.mxu1 }
 0x416   : > { %v2112_v21 = vpop.f32.mrf.mxu0  ;;  %6441 = vst [vmem:[#allocation12_spill] sm:$0xff] %v5401_v26 }
 0x417   : > { %3092 = vrot.lane.b32.xlu0 %v2112_v21, %s6418_s22  ;;  %3049 = vrot.lane.b32.xlu1 %v2112_v21, %s4693_s14  ;;  %v2662_v22 = vmul.f32 %v2650_v19, %v2112_v21  ;;  %v5405_v30 = vpop.f32.mrf.mxu1 }
 0x418   : > { %v5388_v23 = vpop.f32.mrf.mxu0  ;;  %6442 = vst [vmem:[#allocation13_spill] sm:$0xff] %v5405_v30  ;;  %v3073_v30 = vrot.slane %v5543_v50, %v5411_v31  ;;  %v5771_v50 = vld [vmem:[%s6385_s1 + $0x95] ss:$8 sm:$0x7] }
 0x419   : > { %v2663_v24 = vmul.f32 %v2654_v20, %v5388_v23  ;;  %2665 = vst [vmem:[#allocation2 + $0x120] sm:$0xf] %v2662_v22 }
 0x41b   : > { %3015 = vrot.lane.b32.xlu0 %v2112_v21, %s4694_s18  ;;  %2973 = vrot.lane.b32.xlu1 %v2112_v21, %s4688_s20  ;;  %2666 = vst [vmem:[#allocation2 + $0x98] sm:$0xf] %v2663_v24  ;;  %v5642_v24 = vld [vmem:[%s6385_s1 + $0xac] ss:$8 sm:$0x7] }
 0x41f   : > { %2939 = vrot.lane.b32.xlu0 %v2112_v21, %s4695_s19  ;;  %2896 = vrot.lane.b32.xlu1 %v2112_v21, %s4696_s26 }
 0x423   : > { %2862 = vrot.lane.b32.xlu0 %v2112_v21, %s4697_s12  ;;  %2819 = vrot.lane.b32.xlu1 %v2112_v21, %s4698_s17 }
 0x427   : > { %2786 = vrot.lane.b32.xlu0 %v2112_v21, %s4661_s23  ;;  %2744 = vrot.lane.b32.xlu1 %v2112_v21, %s4662_s24 }
 0x42b   : > { %2710 = vrot.lane.b32.xlu0 %v2112_v21, %s6398_s11  ;;  %2668 = vrot.lane.b32.xlu1 %v2112_v21, %s6417_s25  ;;  %s6402_s11 = smov 18  }
 0x42f   : > { %2526 = vrot.lane.b32.xlu0 %v2112_v21, %s4666_s28  ;;  %2602 = vrot.lane.b32.xlu1 %v2112_v21, %s6416_s27 }
 0x433   : > { %2568 = vrot.lane.b32.xlu0 %v2112_v21, %s6400_s29  ;;  %3051 = vrot.lane.b32.xlu1 %v5388_v23, %s4693_s14  ;;  %s6406_s29 = smov 20  }
 0x436   : > { %v4426_v32 = vpop.f32.mrf.mxu1 }
 0x437   : > { %2450 = vrot.lane.b32.xlu0 %v2112_v21, %s6402_s11  ;;  %3094 = vrot.lane.b32.xlu1 %v5388_v23, %s6418_s22  ;;  %s6408_s11 = smov 19  }
 0x438   : > { %v4427_v34 = vpop.f32.mrf.mxu1 }
 0x439   : > { %v5417_v35 = vadd.f32 %v4427_v34, %v4426_v32 }
 0x43b   : > { %2493 = vrot.lane.b32.xlu0 %v2112_v21, %s6404_s30  ;;  %2975 = vrot.lane.b32.xlu1 %v5388_v23, %s4688_s20  ;;  %v2664_v9 = vmul.f32 %v5417_v35, %v2658_v33  ;;  %s4704_s30 = smov 34  }
 0x43d   : > { %2667 = vst [vmem:[#allocation2 + $0xa8] sm:$0xf] %v2664_v9 }
 0x43f   : > { %2373 = vrot.lane.b32.xlu0 %v2112_v21, %s6406_s29  ;;  %3017 = vrot.lane.b32.xlu1 %v5388_v23, %s4694_s18  ;;  %s6412_s29 = smov 37  }
 0x443   : > { %2416 = vrot.lane.b32.xlu0 %v2112_v21, %s6408_s11  ;;  %2898 = vrot.lane.b32.xlu1 %v5388_v23, %s4696_s26  ;;  %s6414_s11 = smov 36  }
 0x447   : > { %2297 = vrot.lane.b32.xlu0 %v2112_v21, %s6410_s21  ;;  %2941 = vrot.lane.b32.xlu1 %v5388_v23, %s4695_s19  ;;  %s6443_s21 = smov 38  }
 0x44b   : > { %2339 = vrot.lane.b32.xlu0 %v2112_v21, %s4704_s30  ;;  %2821 = vrot.lane.b32.xlu1 %v5388_v23, %s4698_s17 }
 0x44f   : > { %2220 = vrot.lane.b32.xlu0 %v2112_v21, %s6412_s29  ;;  %2864 = vrot.lane.b32.xlu1 %v5388_v23, %s4697_s12  ;;  %s6444_s29 = smov 126  }
 0x453   : > { %2263 = vrot.lane.b32.xlu0 %v2112_v21, %s6414_s11  ;;  %2746 = vrot.lane.b32.xlu1 %v5388_v23, %s4662_s24  ;;  %s6445_s11 = smov 2  }
 0x457   : > { %2187 = vrot.lane.b32.xlu0 %v2112_v21, %s6443_s21  ;;  %2788 = vrot.lane.b32.xlu1 %v5388_v23, %s4661_s23 }
 0x45b   : > { %2604 = vrot.lane.b32.xlu0 %v5388_v23, %s6416_s27  ;;  %2670 = vrot.lane.b32.xlu1 %v5388_v23, %s6417_s25  ;;  %s6446_s27 = smov 18   ;;  %s6447_s25 = smov 17  }
 0x45f   : > { %2712 = vrot.lane.b32.xlu1 %v5388_v23, %s6444_s29  ;;  %3053 = vrot.lane.b32.xlu0 %v5417_v35, %s4693_s14  ;;  %s6448_s14 = smov 20  }
 0x463   : > { %2528 = vrot.lane.b32.xlu1 %v5388_v23, %s4666_s28  ;;  %3096 = vrot.lane.b32.xlu0 %v5417_v35, %s6418_s22  ;;  %s6449_s22 = smov 19  }
 0x467   : > { %2570 = vrot.lane.b32.xlu1 %v5388_v23, %s6445_s11  ;;  %2977 = vrot.lane.b32.xlu0 %v5417_v35, %s4688_s20  ;;  %s6450_s20 = smov 35  }
 0x46b   : > { %2452 = vrot.lane.b32.xlu1 %v5388_v23, %s6446_s27  ;;  %3019 = vrot.lane.b32.xlu0 %v5417_v35, %s4694_s18  ;;  %s6451_s18 = smov 37  }
 0x46f   : > { %2495 = vrot.lane.b32.xlu1 %v5388_v23, %s6447_s25  ;;  %2900 = vrot.lane.b32.xlu0 %v5417_v35, %s4696_s26  ;;  %s6453_s26 = smov 127  }
 0x473   : > { %2375 = vrot.lane.b32.xlu1 %v5388_v23, %s6448_s14  ;;  %2943 = vrot.lane.b32.xlu0 %v5417_v35, %s4695_s19  ;;  %s6452_s19 = smov 36  }
 0x477   : > { %2418 = vrot.lane.b32.xlu1 %v5388_v23, %s6449_s22  ;;  %2823 = vrot.lane.b32.xlu0 %v5417_v35, %s4698_s17  ;;  %s4711_s17 = smov 123  }
 0x47b   : > { %2299 = vrot.lane.b32.xlu1 %v5388_v23, %s6450_s20  ;;  %2866 = vrot.lane.b32.xlu0 %v5417_v35, %s4697_s12  ;;  %s6454_s12 = smov 1  }
 0x47f   : > { %2341 = vrot.lane.b32.xlu1 %v5388_v23, %s4704_s30  ;;  %2748 = vrot.lane.b32.xlu0 %v5417_v35, %s4662_s24 }
 0x483   : > { %2222 = vrot.lane.b32.xlu1 %v5388_v23, %s6451_s18  ;;  %2790 = vrot.lane.b32.xlu0 %v5417_v35, %s4661_s23 }
 0x487   : > { %2265 = vrot.lane.b32.xlu1 %v5388_v23, %s6452_s19  ;;  %2672 = vrot.lane.b32.xlu0 %v5417_v35, %s6453_s26 }
 0x489   : > { %v5492_v36 = vpop.permute.xlu0 %3092  ;;  %v5494_v37 = vpop.permute.xlu1 %3049 }
 0x48b   : > { %2606 = vrot.lane.b32.xlu1 %v5417_v35, %s6454_s12  ;;  %2714 = vrot.lane.b32.xlu0 %v5417_v35, %s6444_s29  ;;  %s4709_s29 = smov 85  }
 0x48d   : > { %v5500_v38 = vpop.permute.xlu0 %3015  ;;  %v5502_v39 = vpop.permute.xlu1 %2973 }
 0x48f   : > { %2572 = vrot.lane.b32.xlu1 %v5417_v35, %s6445_s11  ;;  %2530 = vrot.lane.b32.xlu0 %v5417_v35, %s4666_s28 }
 0x491   : > { %v5508_v40 = vpop.permute.xlu0 %2939  ;;  %v5510_v41 = vpop.permute.xlu1 %2896 }
 0x493   : > { %2497 = vrot.lane.b32.xlu1 %v5417_v35, %s6447_s25  ;;  %2454 = vrot.lane.b32.xlu0 %v5417_v35, %s6446_s27 }
 0x495   : > { %v5516_v43 = vpop.permute.xlu0 %2862  ;;  %v5518_v45 = vpop.permute.xlu1 %2819 }
 0x497   : > { %2420 = vrot.lane.b32.xlu1 %v5417_v35, %s6449_s22  ;;  %2377 = vrot.lane.b32.xlu0 %v5417_v35, %s6448_s14  ;;  %s4710_s22 = smov 33   ;;  %s4712_s14 = smov 43  }
 0x499   : > { %v5524_v46 = vpop.permute.xlu0 %2786  ;;  %v5526_v47 = vpop.permute.xlu1 %2744 }
 0x49b   : > { %2343 = vrot.lane.b32.xlu1 %v5417_v35, %s4704_s30  ;;  %2301 = vrot.lane.b32.xlu0 %v5417_v35, %s6450_s20  ;;  %s4708_s30 = smov 5   ;;  %s6480_s20 = smov 90  }
 0x49d   : > { %v5532_v48 = vpop.permute.xlu0 %2710  ;;  %v5534_v49 = vpop.permute.xlu1 %2668 }
 0x49e   : > { %6455 = vst [vmem:[#allocation14_spill] sm:$0xff] %v5532_v48  ;;  %6456 = vst [vmem:[#allocation15_spill] sm:$0xff] %v5534_v49 }
 0x49f   : > { %2267 = vrot.lane.b32.xlu1 %v5417_v35, %s6452_s19  ;;  %2224 = vrot.lane.b32.xlu0 %v5417_v35, %s6451_s18  ;;  %s4713_s18 = smov 95  }
 0x4a1   : > { %v5545_v51 = vpop.permute.xlu0 %2526  ;;  %v5547_v52 = vpop.permute.xlu1 %2602 }
 0x4a2   : > { %6457 = vst [vmem:[#allocation16_spill] sm:$0xff] %v5547_v52 }
 0x4a3   : > { %2189 = vrot.lane.b32.xlu1 %v5388_v23, %s6443_s21  ;;  %2191 = vrot.lane.b32.xlu0 %v5417_v35, %s6443_s21  ;;  %v2955_v23 = vrot.slane %v5626_v18, %v4849_v10 }
 0x4a5   : > { %v5566_v56 = vpop.permute.xlu0 %2568  ;;  %v5568_v57 = vpop.permute.xlu1 %3051 }
 0x4a6   : > { %v3057_v58 = vsel %vm3055_vm14, %v5494_v37, %v5568_v57 }
 0x4a7   : > { %v3077_v59 = vmul.f32 %v3065_v53, %v3057_v58  ;;  %3169 = vperm.xlu1 %4580, %v3166_v54   ;;  %v2835_v53 = vrot.slane %v5642_v24, %v4849_v10  ;;  %v5658_v54 = vld [vmem:[%s6385_s1 + $0xad] ss:$8 sm:$0x7] }
 0x4a9   : > { %v3083_v27 = vrot.slane %v3077_v59, 4  ;;  %v5581_v61 = vpop.permute.xlu0 %2450  ;;  %v5583_v62 = vpop.permute.xlu1 %3094 }
 0x4aa   : > { %v3099_v63 = vsel %vm6436_vm11, %v5492_v36, %v5583_v62 }
 0x4ab   : > { %3089 = vst [vmem:[#allocation2 + $0x60] sm:$0xf0] %v3083_v27  ;;  %v3119_v29 = vmul.f32 %v3107_v28, %v3099_v63  ;;  %v2878_v63 = vrot.slane %v5658_v54, %v4849_v10 }
 0x4ad   : > { %3122 = vst [vmem:[#allocation2 + $0xd0] sm:$0xf] %v3119_v29  ;;  %v5596_v3 = vpop.permute.xlu0 %2493  ;;  %v5598_v4 = vpop.permute.xlu1 %2975  ;;  %v5674_v29 = vld [vmem:[%s6385_s1 + $0xaa] ss:$8 sm:$0x7] }
 0x4ae   : > { %v2980_v5 = vsel %vm1244_vm7, %v5502_v39, %v5598_v4 }
 0x4af   : > { %v3000_v6 = vmul.f32 %v2988_v1, %v2980_v5 }
 0x4b1   : > { %v3006_v11 = vrot.slane %v3000_v6, 4  ;;  %v5612_v13 = vpop.permute.xlu0 %2373  ;;  %v5614_v14 = vpop.permute.xlu1 %3017 }
 0x4b2   : > { %v3023_v15 = vsel %vm3021_vm15, %v5500_v38, %v5614_v14 }
 0x4b3   : > { %3012 = vst [vmem:[#allocation2 + $0xc8] sm:$0xf0] %v3006_v11  ;;  %v3043_v16 = vmul.f32 %v3031_v7, %v3023_v15  ;;  %v2759_v15 = vrot.slane %v5674_v29, %v4849_v10 }
 0x4b5   : > { %3046 = vst [vmem:[#allocation2 + $0x60] sm:$0xf] %v3043_v16  ;;  %v5628_v19 = vpop.permute.xlu0 %2416  ;;  %v5630_v20 = vpop.permute.xlu1 %2898  ;;  %v5689_v16 = vld [vmem:[%s6385_s1 + $0xab] ss:$8 sm:$0x7] }
 0x4b6   : > { %v2904_v21 = vsel %vm2902_vm10, %v5510_v41, %v5630_v20 }
 0x4b7   : > { %v2924_v22 = vmul.f32 %v2912_v17, %v2904_v21 }
 0x4b9   : > { %v2930_v32 = vrot.slane %v2924_v22, 4  ;;  %v5644_v33 = vpop.permute.xlu0 %2297  ;;  %v5646_v34 = vpop.permute.xlu1 %2941 }
 0x4ba   : > { %v2947_v35 = vsel %vm2945_vm12, %v5508_v40, %v5646_v34 }
 0x4bb   : > { %2936 = vst [vmem:[#allocation2 + $0xd8] sm:$0xf0] %v2930_v32  ;;  %v2967_v9 = vmul.f32 %v2955_v23, %v2947_v35  ;;  %v2801_v32 = vrot.slane %v5689_v16, %v4849_v10  ;;  %v5704_v35 = vld [vmem:[%s6385_s1 + $0x96] ss:$8 sm:$0x7] }
 0x4bd   : > { %2970 = vst [vmem:[#allocation2 + $0xc8] sm:$0xf] %v2967_v9  ;;  %v5660_v58 = vpop.permute.xlu0 %2339  ;;  %v5662_v59 = vpop.permute.xlu1 %2821  ;;  %v5709_v9 = vld [vmem:[%s6385_s1 + $0xa8] ss:$8 sm:$0x7] }
 0x4be   : > { %v2827_v28 = vsel %vm2825_vm3, %v5518_v45, %v5662_v59 }
 0x4bf   : > { %v2847_v27 = vmul.f32 %v2835_v53, %v2827_v28 }
 0x4c1   : > { %v2853_v1 = vrot.slane %v2847_v27, 4  ;;  %v5676_v5 = vpop.permute.xlu0 %2220  ;;  %v5678_v6 = vpop.permute.xlu1 %2864 }
 0x4c2   : > { %v2870_v7 = vsel %vm2868_vm0, %v5516_v43, %v5678_v6 }
 0x4c3   : > { %2859 = vst [vmem:[#allocation2 + $0x20] sm:$0xf0] %v2853_v1  ;;  %v2890_v11 = vmul.f32 %v2878_v63, %v2870_v7  ;;  %v2621_v7 = vrot.slane %v5704_v35, %v4855_v12 }
 0x4c5   : > { %2893 = vst [vmem:[#allocation2 + $0xd8] sm:$0xf] %v2890_v11  ;;  %v5691_v17 = vpop.permute.xlu0 %2263  ;;  %v5693_v21 = vpop.permute.xlu1 %2746  ;;  %v2683_v11 = vrot.slane %v5709_v9, %v4849_v10 }
 0x4c6   : > { %v2751_v22 = vsel %vm676_vm8, %v5526_v47, %v5693_v21 }
 0x4c7   : > { %v2771_v23 = vmul.f32 %v2759_v15, %v2751_v22  ;;  %v5726_v15 = vld [vmem:[%s6385_s1 + $0xa9] ss:$8 sm:$0x7] }
 0x4c9   : > { %v2777_v53 = vrot.slane %v2771_v23, 4  ;;  %v5711_v28 = vpop.permute.xlu0 %2187  ;;  %v5713_v27 = vpop.permute.xlu1 %2788 }
 0x4ca   : > { %6458 = vst [vmem:[#allocation17_spill] sm:$0xff] %v5711_v28  ;;  %v2793_v63 = vsel %vm6424_vm1, %v5524_v46, %v5713_v27  ;;  %vm2716_vm1 = vcmp.lt.s32.totalorder %v4910_v25, 126 }
 0x4cb   : > { %2783 = vst [vmem:[#allocation2 + $0xe8] sm:$0xf0] %v2777_v53  ;;  %v2813_v1 = vmul.f32 %v2801_v32, %v2793_v63  ;;  %v2726_v63 = vrot.slane %v5726_v15, %v4849_v10 }
 0x4cd   : > { %2816 = vst [vmem:[#allocation2 + $0x20] sm:$0xf] %v2813_v1  ;;  %v5728_v22 = vpop.permute.xlu0 %2604  ;;  %v5730_v23 = vpop.permute.xlu1 %2670  ;;  %v5746_v1 = vld [vmem:[%s6385_s1 + $0x94] ss:$8 sm:$0x7] }
 0x4ce   : > { %6459 = vst [vmem:[#allocation18_spill] sm:$0xff] %v5728_v22  ;;  %6460 = vst [vmem:[#allocation19_spill] sm:$0xff] %v5730_v23  ;;  %v2609_v32 = vsel %vm575_vm5, %v5547_v52, %v5728_v22  ;;  %v2675_v53 = vsel %vm622_vm2, %v5534_v49, %v5730_v23  ;;  %v2545_v49 = vrot.slane %v5746_v1, %v4855_v12 }
 0x4cf   : > { %6461 = vst [vmem:[#allocation20_spill] sm:$0xff] %v5746_v1  ;;  %v2630_v0 = vmul.f32 %v2621_v7, %v2609_v32  ;;  %v2695_v44 = vmul.f32 %v2683_v11, %v2675_v53  ;;  %v2588_v23 = vrot.slane %v5771_v50, %v4855_v12 }
 0x4d1   : > { %v2636_v26 = vrot.slane %v2630_v0, 4  ;;  %v2701_v28 = vrot.slane %v2695_v44, 4  ;;  %v5752_v52 = vpop.permute.xlu1 %2712  ;;  %v3054_v22 = vpop.permute.xlu0 %3053  ;;  %v3111_v44 = vrot.slane %v5564_v55, %v4855_v12 }
 0x4d2   : > { %6462 = vst [vmem:[#allocation21_spill] sm:$0xff] %v5752_v52  ;;  %v2718_v7 = vsel %vm2716_vm1, %v5532_v48, %v5752_v52  ;;  %v3056_v11 = vsel %vm3055_vm14, %v5568_v57, %v3054_v22  ;;  %v3058_v0 = vsel %vm3055_vm14, %v3054_v22, %v5494_v37  ;;  %v3115_v57 = vrot.slane %v5564_v55, %v5411_v31  ;;  %v5795_v55 = vld [vmem:[%s6385_s1 + $0x92] ss:$8 sm:$0x7] }
 0x4d3   : > { %2642 = vst [vmem:[#allocation2 + $0x38] sm:$0xf0] %v2636_v26  ;;  %2707 = vst [vmem:[#allocation2 + $0x120] sm:$0xf0] %v2701_v28  ;;  %v2738_v32 = vmul.f32 %v2726_v63, %v2718_v7  ;;  %v3078_v53 = vmul.f32 %v3069_v42, %v3056_v11  ;;  %v3079_v48 = vmul.f32 %v3073_v30, %v3058_v0  ;;  %vm2574_vm14 = vcmp.lt.s32.totalorder %v4910_v25, 2 }
 0x4d5   : > { %2741 = vst [vmem:[#allocation2 + $0xe8] sm:$0xf] %v2738_v32  ;;  %v3084_v52 = vrot.slane %v3078_v53, 4  ;;  %v3085_v1 = vrot.slane %v3079_v48, 4  ;;  %v5775_v37 = vpop.permute.xlu1 %2528  ;;  %v3097_v22 = vpop.permute.xlu0 %3096  ;;  %v2992_v48 = vrot.slane %v5579_v60, %v4855_v12  ;;  %v2470_v32 = vrot.slane %v5795_v55, %v4855_v12 }
 0x4d6   : > { %v2533_v42 = vsel %vm521_vm6, %v5545_v51, %v5775_v37  ;;  %v3098_v26 = vsel %vm6436_vm11, %v5583_v62, %v3097_v22  ;;  %v3100_v30 = vsel %vm6436_vm11, %v3097_v22, %v5492_v36  ;;  %v2996_v62 = vrot.slane %v5579_v60, %v5411_v31 }
 0x4d7   : > { %3090 = vst [vmem:[#allocation2 + $0x110] sm:$0xf0] %v3084_v52  ;;  %3091 = vst [vmem:[#allocation2] sm:$0xf0] %v3085_v1  ;;  %v2554_v28 = vmul.f32 %v2545_v49, %v2533_v42  ;;  %v3120_v63 = vmul.f32 %v3111_v44, %v3098_v26  ;;  %v3121_v7 = vmul.f32 %v3115_v57, %v3100_v30  ;;  %vm2456_vm11 = vcmp.lt.s32.totalorder %v4910_v25, 18 }
 0x4d8   : > { %v3035_v1 = vrot.slane %v5594_v2, %v4855_v12  ;;  %v5819_v44 = vld [vmem:[%s6385_s1 + $0x93] ss:$8 sm:$0x7]  ;;  %v3039_v42 = vrot.slane %v5594_v2, %v5411_v31 }
 0x4d9   : > { %v2560_v11 = vrot.slane %v2554_v28, 4  ;;  %3123 = vst [vmem:[#allocation2 + $0x8] sm:$0xf] %v3120_v63  ;;  %3124 = vst [vmem:[#allocation2 + $0x80] sm:$0xf] %v3121_v7  ;;  %v5799_v36 = vpop.permute.xlu1 %2570  ;;  %v2978_v0 = vpop.permute.xlu0 %2977  ;;  %v2512_v28 = vrot.slane %v5819_v44, %v4855_v12 }
 0x4da   : > { %v2576_v49 = vsel %vm2574_vm14, %v5566_v56, %v5799_v36  ;;  %v2979_v52 = vsel %vm1244_vm7, %v5598_v4, %v2978_v0  ;;  %v2981_v60 = vsel %vm1244_vm7, %v2978_v0, %v5502_v39  ;;  %v5842_v7 = vld [vmem:[%s6385_s1 + $0x90] ss:$8 sm:$0x7]  ;;  %vm2379_vm7 = vcmp.lt.s32.totalorder %v4910_v25, 20 }
 0x4db   : > { %2566 = vst [vmem:[#allocation2 + $0xb8] sm:$0xf0] %v2560_v11  ;;  %v2597_v53 = vmul.f32 %v2588_v23, %v2576_v49  ;;  %v3001_v57 = vmul.f32 %v2992_v48, %v2979_v52  ;;  %v3002_v22 = vmul.f32 %v2996_v62, %v2981_v60  ;;  %v2916_v48 = vrot.slane %v5610_v8, %v4855_v12 }
 0x4dd   : > { %2600 = vst [vmem:[#allocation2 + $0x38] sm:$0xf] %v2597_v53  ;;  %v3007_v4 = vrot.slane %v3001_v57, 4  ;;  %v3008_v26 = vrot.slane %v3002_v22, 4  ;;  %v5823_v30 = vpop.permute.xlu1 %2452  ;;  %v3020_v39 = vpop.permute.xlu0 %3019  ;;  %v3163_v57 = vld [vmem:[#allocation2 + $0xd0] sm:$0xf] }
 0x4de   : > { %v2458_v63 = vsel %vm2456_vm11, %v5581_v61, %v5823_v30  ;;  %v3022_v23 = vsel %vm3021_vm15, %v5614_v14, %v3020_v39  ;;  %v3024_v2 = vsel %vm3021_vm15, %v3020_v39, %v5500_v38  ;;  %v2920_v14 = vrot.slane %v5610_v8, %v5411_v31 }
 0x4df   : > { %3013 = vst [vmem:[#allocation2 + $0x28] sm:$0xf0] %v3007_v4  ;;  %3014 = vst [vmem:[#allocation2 + $0xf8] sm:$0xf0] %v3008_v26  ;;  %v2479_v62 = vmul.f32 %v2470_v32, %v2458_v63  ;;  %v3044_v11 = vmul.f32 %v3035_v1, %v3022_v23  ;;  %v3045_v0 = vmul.f32 %v3039_v42, %v3024_v2  ;;  %v6463_v4 = vmov 0.0  }
 0x4e0   : > { %v3164_v49 = vld [vmem:[#allocation2 + $0x8] sm:$0xf]  ;;  %v3165_v52 = vld [vmem:[#allocation2 + $0x80] sm:$0xf]  ;;  %v2393_v32 = vrot.slane %v5842_v7, %v4855_v12  ;;  %v2959_v1 = vrot.slane %v5626_v18, %v4855_v12 }
 0x4e1   : > { %v2485_v60 = vrot.slane %v2479_v62, 4  ;;  %3047 = vst [vmem:[#allocation2 + $0x110] sm:$0xf] %v3044_v11  ;;  %3048 = vst [vmem:[#allocation2] sm:$0xf] %v3045_v0  ;;  %v5846_v38 = vpop.permute.xlu1 %2495  ;;  %4366 = vmatprep.subr.msk.mxu1 %vm747_vm4, %v3164_v49  ;;  %4450 = vmatpush3.msk.msra.mxu0 %vm747_vm4, %v3165_v52  ;;  %v2901_v53 = vpop.permute.xlu0 %2900 }
 0x4e2   : > { %v2500_v8 = vsel %vm498_vm9, %v5596_v3, %v5846_v38  ;;  %v2903_v22 = vsel %vm2902_vm10, %v5630_v20, %v2901_v53  ;;  %v2905_v42 = vsel %vm2902_vm10, %v2901_v53, %v5510_v41  ;;  %4367 = vmatpush1.msk.msra.mxu1 %vm747_vm4, %v3163_v57  ;;  %4451 = vmatprep.subr.mxu0 %v6463_v4  ;;  %v5870_v26 = vld [vmem:[%s6385_s1 + $0x91] ss:$8 sm:$0x7]  ;;  %vm2422_vm10 = vcmp.lt.s32.totalorder %v4910_v25, 19 }
 0x4e3   : > { %2491 = vst [vmem:[#allocation2 + $0xa0] sm:$0xf0] %v2485_v60  ;;  %v2521_v39 = vmul.f32 %v2512_v28, %v2500_v8  ;;  %v2925_v63 = vmul.f32 %v2916_v48, %v2903_v22  ;;  %v2926_v23 = vmul.f32 %v2920_v14, %v2905_v42  ;;  %v2963_v20 = vrot.slane %v5626_v18, %v5411_v31  ;;  %v5894_v49 = vld [vmem:[%s6385_s1 + $0x7e] ss:$8 sm:$0x7] }
 0x4e4   : > { %v2436_v0 = vrot.slane %v5870_v26, %v4855_v12  ;;  %v2839_v14 = vrot.slane %v5642_v24, %v4855_v12 }
 0x4e5   : > { %2524 = vst [vmem:[#allocation2 + $0xb8] sm:$0xf] %v2521_v39  ;;  %v2931_v41 = vrot.slane %v2925_v63, 4  ;;  %v2932_v2 = vrot.slane %v2926_v23, 4  ;;  %v5874_v62 = vpop.permute.xlu1 %2375  ;;  %v2944_v11 = vpop.permute.xlu0 %2943  ;;  %v3160_v39 = vld [vmem:[#allocation2 + $0x60] sm:$0xff]  ;;  %v2316_v63 = vrot.slane %v5894_v49, %v4855_v12 }
 0x4e6   : > { %v2381_v28 = vsel %vm2379_vm7, %v5612_v13, %v5874_v62  ;;  %v2946_v18 = vsel %vm2945_vm12, %v5646_v34, %v2944_v11  ;;  %v2948_v48 = vsel %vm2945_vm12, %v2944_v11, %v5508_v40  ;;  %v2843_v34 = vrot.slane %v5642_v24, %v5411_v31 }
 0x4e7   : > { %2937 = vst [vmem:[#allocation2 + $0xf0] sm:$0xf0] %v2931_v41  ;;  %2938 = vst [vmem:[#allocation2 + $0x48] sm:$0xf0] %v2932_v2  ;;  %v2402_v52 = vmul.f32 %v2393_v32, %v2381_v28  ;;  %v2968_v60 = vmul.f32 %v2959_v1, %v2946_v18  ;;  %v2969_v53 = vmul.f32 %v2963_v20, %v2948_v48  ;;  %vm6464_vm12 = vcmp.lt.s32.totalorder %v4910_v25, 111 }
 0x4e8   : > { %v3161_v57 = vld [vmem:[#allocation2 + $0x110] sm:$0xff]  ;;  %v3162_v8 = vld [vmem:[#allocation2] sm:$0xff]  ;;  %v2882_v32 = vrot.slane %v5658_v54, %v4855_v12  ;;  %v2886_v28 = vrot.slane %v5658_v54, %v5411_v31  ;;  %vm6465_vm15 = vmmov %vm6464_vm12 }
 0x4e9   : > { %v2408_v22 = vrot.slane %v2402_v52, 4  ;;  %2971 = vst [vmem:[#allocation2 + $0x28] sm:$0xf] %v2968_v60  ;;  %2972 = vst [vmem:[#allocation2 + $0xf8] sm:$0xf] %v2969_v53  ;;  %v5898_v40 = vpop.permute.xlu1 %2418  ;;  %3192 = vmatprep.subr.mxu1 %v3161_v57  ;;  %4452 = vmatpush3.msra.mxu0 %v3162_v8  ;;  %v2824_v42 = vpop.permute.xlu0 %2823  ;;  %v2763_v60 = vrot.slane %v5674_v29, %v4855_v12 }
 0x4ea   : > { %v2424_v24 = vsel %vm2422_vm10, %v5628_v19, %v5898_v40  ;;  %v2826_v1 = vsel %vm2825_vm3, %v5662_v59, %v2824_v42  ;;  %v2828_v23 = vsel %vm2825_vm3, %v2824_v42, %v5518_v45  ;;  %3193 = vmatpush1.msra.mxu1 %v3160_v39  ;;  %4453 = vmatprep.subr.mxu0 %v6463_v4  ;;  %v5918_v20 = vld [vmem:[%s6385_s1 + $0x7f] ss:$8 sm:$0x7]  ;;  %vm2345_vm3 = vcmp.lt.s32.totalorder %v4910_v25, 34 }
 0x4eb   : > { %2414 = vst [vmem:[#allocation2 + $0x50] sm:$0xf0] %v2408_v22  ;;  %v2445_v41 = vmul.f32 %v2436_v0, %v2424_v24  ;;  %v2848_v2 = vmul.f32 %v2839_v14, %v2826_v1  ;;  %v2849_v11 = vmul.f32 %v2843_v34, %v2828_v23  ;;  %v2359_v52 = vrot.slane %v5918_v20, %v4855_v12  ;;  %v5942_v53 = vld [vmem:[%s6385_s1 + $0x7c] ss:$8 sm:$0x7] }
 0x4ec   : > { %v3157_v1 = vld [vmem:[#allocation2 + $0xc8] sm:$0xff]  ;;  %v2240_v23 = vrot.slane %v5942_v53, %v4855_v12 }
 0x4ed   : > { %2448 = vst [vmem:[#allocation2 + $0xa0] sm:$0xf] %v2445_v41  ;;  %v2854_v59 = vrot.slane %v2848_v2, 4  ;;  %v2855_v18 = vrot.slane %v2849_v11, 4  ;;  %v5922_v48 = vpop.permute.xlu1 %2299  ;;  %v2867_v45 = vpop.permute.xlu0 %2866 }
 0x4ee   : > { %v2304_v0 = vsel %vm1723_vm13, %v5644_v33, %v5922_v48  ;;  %v2869_v54 = vsel %vm2868_vm0, %v5678_v6, %v2867_v45  ;;  %v2871_v14 = vsel %vm2868_vm0, %v2867_v45, %v5516_v43  ;;  %v2767_v6 = vrot.slane %v5674_v29, %v5411_v31  ;;  %v5967_v2 = vld [vmem:[%s6385_s1 + $0x7d] ss:$8 sm:$0x7] }
 0x4ef   : > { %2860 = vst [vmem:[#allocation2 + $0x128] sm:$0xf0] %v2854_v59  ;;  %2861 = vst [vmem:[#allocation2 + $0xb0] sm:$0xf0] %v2855_v18  ;;  %v2325_v34 = vmul.f32 %v2316_v63, %v2304_v0  ;;  %v2891_v57 = vmul.f32 %v2882_v32, %v2869_v54  ;;  %v2892_v8 = vmul.f32 %v2886_v28, %v2871_v14  ;;  %vm2226_vm0 = vcmp.lt.s32.totalorder %v4910_v25, 37 }
 0x4f0   : > { %v3158_v22 = vld [vmem:[#allocation2 + $0x28] sm:$0xff]  ;;  %v3159_v42 = vld [vmem:[#allocation2 + $0xf8] sm:$0xff]  ;;  %v2805_v63 = vrot.slane %v5689_v16, %v4855_v12  ;;  %v2283_v54 = vrot.slane %v5967_v2, %v4855_v12 }
 0x4f1   : > { %v2331_v39 = vrot.slane %v2325_v34, 4  ;;  %2894 = vst [vmem:[#allocation2 + $0xf0] sm:$0xf] %v2891_v57  ;;  %2895 = vst [vmem:[#allocation2 + $0x48] sm:$0xf] %v2892_v8  ;;  %v5946_v43 = vpop.permute.xlu1 %2341  ;;  %3194 = vmatprep.subr.mxu1 %v3158_v22  ;;  %4454 = vmatpush3.msra.mxu0 %v3159_v42  ;;  %v2749_v24 = vpop.permute.xlu0 %2748 }
 0x4f2   : > { %v2347_v29 = vsel %vm2345_vm3, %v5660_v58, %v5946_v43  ;;  %v2750_v32 = vsel %vm676_vm8, %v5693_v21, %v2749_v24  ;;  %v2752_v41 = vsel %vm676_vm8, %v2749_v24, %v5526_v47  ;;  %3195 = vmatpush1.msra.mxu1 %v3157_v1  ;;  %4455 = vmatprep.subr.mxu0 %v6463_v4  ;;  %vm2269_vm8 = vcmp.lt.s32.totalorder %v4910_v25, 36  ;;  %v3154_v24 = vld [vmem:[#allocation2 + $0xd8] sm:$0xff] }
 0x4f3   : > { %2337 = vst [vmem:[#allocation2 + $0x68] sm:$0xf0] %v2331_v39  ;;  %v2368_v11 = vmul.f32 %v2359_v52, %v2347_v29  ;;  %v2772_v28 = vmul.f32 %v2763_v60, %v2750_v32  ;;  %v2773_v59 = vmul.f32 %v2767_v6, %v2752_v41  ;;  %v2809_v21 = vrot.slane %v5689_v16, %v5411_v31  ;;  %v6466_v29 = vld [vmem:[#allocation19_spill] sm:$0xff] }
 0x4f4   : > { %v2687_v60 = vrot.slane %v5709_v9, %v4855_v12  ;;  %v2691_v6 = vrot.slane %v5709_v9, %v5411_v31  ;;  %v2617_v1 = vrot.slane %v5704_v35, %v4849_v10  ;;  %v2730_v9 = vrot.slane %v5726_v15, %v4855_v12  ;;  %v6467_v41 = vld [vmem:[#allocation15_spill] sm:$0xff] }
 0x4f5   : > { %2371 = vst [vmem:[#allocation2 + $0x50] sm:$0xf] %v2368_v11  ;;  %v2778_v18 = vrot.slane %v2772_v28, 4  ;;  %v2779_v47 = vrot.slane %v2773_v59, 4  ;;  %v5971_v45 = vpop.permute.xlu1 %2222  ;;  %v2791_v0 = vpop.permute.xlu0 %2790 }
 0x4f6   : > { %v2228_v52 = vsel %vm2226_vm0, %v5676_v5, %v5971_v45  ;;  %v2792_v16 = vsel %vm6464_vm12, %v5713_v27, %v2791_v0  ;;  %v2794_v14 = vsel %vm6465_vm15, %v2791_v0, %v5524_v46  ;;  %vm6484_vm12 = vcmp.lt.s32.totalorder %v4910_v25, 90 }
 0x4f7   : > { %2784 = vst [vmem:[#allocation2 + $0x30] sm:$0xf0] %v2778_v18  ;;  %2785 = vst [vmem:[#allocation2 + $0x70] sm:$0xf0] %v2779_v47  ;;  %v2249_v34 = vmul.f32 %v2240_v23, %v2228_v52  ;;  %v2814_v57 = vmul.f32 %v2805_v63, %v2792_v16  ;;  %v2815_v8 = vmul.f32 %v2809_v21, %v2794_v14  ;;  %vm3407_vm15 = vcmp.lt.s32.totalorder %v4910_v25, 85 }
 0x4f8   : > { %v3155_v22 = vld [vmem:[#allocation2 + $0xf0] sm:$0xff]  ;;  %v3156_v42 = vld [vmem:[#allocation2 + $0x48] sm:$0xff]  ;;  %v2625_v23 = vrot.slane %v5704_v35, %v5411_v31  ;;  %v2734_v21 = vrot.slane %v5726_v15, %v5411_v31  ;;  %v2584_v18 = vrot.slane %v5771_v50, %v4849_v10  ;;  %v2592_v47 = vrot.slane %v5771_v50, %v5411_v31 }
 0x4f9   : > { %v2255_v39 = vrot.slane %v2249_v34, 4  ;;  %2817 = vst [vmem:[#allocation2 + $0x128] sm:$0xf] %v2814_v57  ;;  %2818 = vst [vmem:[#allocation2 + $0xb0] sm:$0xf] %v2815_v8  ;;  %v5990_v27 = vpop.permute.xlu1 %2265  ;;  %3196 = vmatprep.subr.mxu1 %v3155_v22  ;;  %4456 = vmatpush3.msra.mxu0 %v3156_v42  ;;  %v2673_v46 = vpop.permute.xlu0 %2672  ;;  %v6468_v34 = vld [vmem:[#allocation20_spill] sm:$0xff] }
 0x4fa   : > { %v2271_v63 = vsel %vm2269_vm8, %v5691_v17, %v5990_v27  ;;  %v2674_v32 = vsel %vm622_vm2, %v6466_v29, %v2673_v46  ;;  %v2676_v11 = vsel %vm622_vm2, %v2673_v46, %v6467_v41  ;;  %3197 = vmatpush1.msra.mxu1 %v3154_v24  ;;  %4457 = vmatprep.subr.mxu0 %v6463_v4  ;;  %v6470_v8 = vld [vmem:[#allocation16_spill] sm:$0xff]  ;;  %v6471_v50 = vld [vmem:[#allocation21_spill] sm:$0xff]  ;;  %v6472_v42 = vld [vmem:[#allocation14_spill] sm:$0xff] }
 0x4fb   : > { %2261 = vst [vmem:[#allocation2 + $0x10] sm:$0xf0] %v2255_v39  ;;  %v2292_v35 = vmul.f32 %v2283_v54, %v2271_v63  ;;  %v2696_v28 = vmul.f32 %v2687_v60, %v2674_v32  ;;  %v2697_v59 = vmul.f32 %v2691_v6, %v2676_v11  ;;  %v2541_v57 = vrot.slane %v6468_v34, %v4849_v10  ;;  %v6469_v60 = vld [vmem:[#allocation18_spill] sm:$0xff] }
 0x4fc   : > { %v2549_v54 = vrot.slane %v6468_v34, %v5411_v31  ;;  %v2508_v11 = vrot.slane %v5819_v44, %v4849_v10 }
 0x4fd   : > { %2295 = vst [vmem:[#allocation2 + $0x68] sm:$0xf] %v2292_v35  ;;  %v2702_v0 = vrot.slane %v2696_v28, 4  ;;  %v2703_v52 = vrot.slane %v2697_v59, 4  ;;  %v2607_v16 = vpop.permute.xlu1 %2606  ;;  %v2715_v14 = vpop.permute.xlu0 %2714  ;;  %v2516_v35 = vrot.slane %v5819_v44, %v5411_v31 }
 0x4fe   : > { %v2608_v15 = vsel %vm575_vm5, %v6469_v60, %v2607_v16  ;;  %v2610_v6 = vsel %vm575_vm5, %v2607_v16, %v6470_v8  ;;  %v2717_v22 = vsel %vm2716_vm1, %v6471_v50, %v2715_v14  ;;  %v2719_v39 = vsel %vm2716_vm1, %v2715_v14, %v6472_v42 }
 0x4ff   : > { %2708 = vst [vmem:[#allocation2 + $0x98] sm:$0xf0] %v2702_v0  ;;  %2709 = vst [vmem:[#allocation2 + $0xa8] sm:$0xf0] %v2703_v52  ;;  %v2629_v46 = vmul.f32 %v2617_v1, %v2610_v6  ;;  %v2631_v24 = vmul.f32 %v2625_v23, %v2608_v15  ;;  %v2739_v63 = vmul.f32 %v2730_v9, %v2717_v22  ;;  %v3151_v1 = vld [vmem:[#allocation2 + $0x20] sm:$0xff]  ;;  %vm6474_vm1 = vcmp.lt.s32.totalorder %v4910_v25, 38 }
 0x500   : > { %v2740_v29 = vmul.f32 %v2734_v21, %v2719_v39  ;;  %v3152_v32 = vld [vmem:[#allocation2 + $0x128] sm:$0xff]  ;;  %v3153_v41 = vld [vmem:[#allocation2 + $0xb0] sm:$0xff]  ;;  %v2466_v23 = vrot.slane %v5795_v55, %v4849_v10  ;;  %v2474_v9 = vrot.slane %v5795_v55, %v5411_v31  ;;  %vm6475_vm2 = vmmov %vm6474_vm1 }
 0x501   : > { %v2635_v28 = vrot.slane %v2629_v46, 4  ;;  %v2637_v59 = vrot.slane %v2631_v24, 4  ;;  %2742 = vst [vmem:[#allocation2 + $0x30] sm:$0xf] %v2739_v63  ;;  %v2573_v16 = vpop.permute.xlu1 %2572  ;;  %3198 = vmatprep.subr.mxu1 %v3152_v32  ;;  %4458 = vmatpush3.msra.mxu0 %v3153_v41  ;;  %v2531_v0 = vpop.permute.xlu0 %2530  ;;  %v2355_v24 = vrot.slane %v5918_v20, %v4849_v10  ;;  %v3148_v32 = vld [vmem:[#allocation2 + $0xe8] sm:$0xff]  ;;  %v2312_v41 = vrot.slane %v5894_v49, %v4849_v10  ;;  %vm6476_vm5 = vmmov %vm6474_vm1 }
 0x502   : > { %2743 = vst [vmem:[#allocation2 + $0x70] sm:$0xf] %v2740_v29  ;;  %v2575_v21 = vsel %vm2574_vm14, %v5799_v36, %v2573_v16  ;;  %v2577_v44 = vsel %vm2574_vm14, %v2573_v16, %v5566_v56  ;;  %v2532_v52 = vsel %vm521_vm6, %v5775_v37, %v2531_v0  ;;  %v2534_v14 = vsel %vm521_vm6, %v2531_v0, %v5545_v51 }
 0x503   : > { %3199 = vmatpush1.msra.mxu1 %v3151_v1  ;;  %2641 = vst [vmem:[#allocation2 + $0x58] sm:$0xf0] %v2635_v28  ;;  %2643 = vst [vmem:[#allocation2 + $0x78] sm:$0xf0] %v2637_v59  ;;  %v2596_v55 = vmul.f32 %v2584_v18, %v2577_v44  ;;  %v2598_v34 = vmul.f32 %v2592_v47, %v2575_v21  ;;  %v2553_v60 = vmul.f32 %v2541_v57, %v2534_v14  ;;  %vm6477_vm6 = vcmask 818176  }
 0x504   : > { %v2555_v15 = vmul.f32 %v2549_v54, %v2532_v52  ;;  %4459 = vmatprep.subr.mxu0 %v6463_v4  ;;  %v2432_v56 = vrot.slane %v5870_v26, %v4849_v10  ;;  %v2440_v36 = vrot.slane %v5870_v26, %v5411_v31  ;;  %v2389_v18 = vrot.slane %v5842_v7, %v4849_v10  ;;  %v6100_v21 = vld [vmem:[%s6385_s1 + $0x7b] ss:$8 sm:$0x7] }
 0x505   : > { %2599 = vst [vmem:[#allocation2 + $0x58] sm:$0xf] %v2596_v55  ;;  %2601 = vst [vmem:[#allocation2 + $0x78] sm:$0xf] %v2598_v34  ;;  %v2559_v37 = vrot.slane %v2553_v60, 4  ;;  %v2498_v51 = vpop.permute.xlu1 %2497  ;;  %v2455_v6 = vpop.permute.xlu0 %2454  ;;  %v2397_v47 = vrot.slane %v5842_v7, %v5411_v31  ;;  %v3143_v55 = vld [vmem:[#allocation2 + $0x38] sm:$0xff] }
 0x506   : > { %v2561_v8 = vrot.slane %v2555_v15, 4  ;;  %v2499_v57 = vsel %vm498_vm9, %v5846_v38, %v2498_v51  ;;  %v2501_v26 = vsel %vm498_vm9, %v2498_v51, %v5596_v3  ;;  %v2457_v54 = vsel %vm2456_vm11, %v5823_v30, %v2455_v6  ;;  %vm6478_vm9 = vmmov %vm6477_vm6 }
 0x507   : > { %v2459_v50 = vsel %vm2456_vm11, %v2455_v6, %v5581_v61  ;;  %2565 = vst [vmem:[#allocation2 + $0xc0] sm:$0xf0] %v2559_v37  ;;  %v2520_v22 = vmul.f32 %v2508_v11, %v2501_v26  ;;  %v2522_v7 = vmul.f32 %v2516_v35, %v2499_v57  ;;  %v2480_v39 = vmul.f32 %v2474_v9, %v2457_v54  ;;  %vm6481_vm11 = vmmov %vm6474_vm1 }
 0x508   : > { %2567 = vst [vmem:[#allocation2 + $0x40] sm:$0xf0] %v2561_v8  ;;  %v2478_v42 = vmul.f32 %v2466_v23, %v2459_v50  ;;  %v3149_v46 = vld [vmem:[#allocation2 + $0x30] sm:$0xff]  ;;  %v2363_v3 = vrot.slane %v5918_v20, %v5411_v31  ;;  %v2320_v11 = vrot.slane %v5894_v49, %v5411_v31  ;;  %v3147_v23 = vld [vmem:[#allocation2 + $0xa8] sm:$0xff]  ;;  %v2236_v15 = vrot.slane %v5942_v53, %v4849_v10 }
 0x509   : > { %v3150_v38 = vld [vmem:[#allocation2 + $0x70] sm:$0xff]  ;;  %2523 = vst [vmem:[#allocation2 + $0xc0] sm:$0xf] %v2520_v22  ;;  %2525 = vst [vmem:[#allocation2 + $0x40] sm:$0xf] %v2522_v7  ;;  %v2486_v63 = vrot.slane %v2480_v39, 4  ;;  %v2421_v29 = vpop.permute.xlu1 %2420  ;;  %3200 = vmatprep.subr.mxu1 %v3149_v46  ;;  %v2378_v61 = vpop.permute.xlu0 %2377  ;;  %v2202_v50 = vrot.slane %v6100_v21, %v4849_v10  ;;  %v2210_v22 = vrot.slane %v6100_v21, %v5411_v31 }
 0x50a   : > { %v2484_v30 = vrot.slane %v2478_v42, 4  ;;  %4460 = vmatpush3.msra.mxu0 %v3150_v38  ;;  %v2423_v35 = vsel %vm2422_vm10, %v5898_v40, %v2421_v29  ;;  %v2425_v20 = vsel %vm2422_vm10, %v2421_v29, %v5628_v19  ;;  %v2380_v28 = vsel %vm2379_vm7, %v5874_v62, %v2378_v61  ;;  %3201 = vmatpush1.msra.mxu1 %v3148_v32  ;;  %v3146_v40 = vld [vmem:[#allocation2 + $0x98] sm:$0xff]  ;;  %v3145_v19 = vld [vmem:[#allocation2 + $0x120] sm:$0xff] }
 0x50b   : > { %v2382_v59 = vsel %vm2379_vm7, %v2378_v61, %v5612_v13  ;;  %2492 = vst [vmem:[#allocation2 + $0x130] sm:$0xf0] %v2486_v63  ;;  %v2444_v49 = vmul.f32 %v2432_v56, %v2425_v20  ;;  %v2446_v16 = vmul.f32 %v2440_v36, %v2423_v35  ;;  %v2403_v1 = vmul.f32 %v2397_v47, %v2380_v28  ;;  %v3137_v38 = vld [vmem:[#allocation2 + $0xa0] sm:$0xff] }
 0x50c   : > { %2490 = vst [vmem:[#allocation2 + $0x88] sm:$0xf0] %v2484_v30  ;;  %v2401_v0 = vmul.f32 %v2389_v18, %v2382_v59  ;;  %4461 = vmatprep.subr.mxu0 %v6463_v4  ;;  %3202 = vmatprep.subr.mxu1 %v3146_v40  ;;  %v3144_v9 = vld [vmem:[#allocation2 + $0x78] sm:$0xff]  ;;  %v2279_v62 = vrot.slane %v5967_v2, %v4849_v10  ;;  %vm3508_vm14 = vcmp.lt.s32.totalorder %v4910_v25, 123  ;;  %vm3441_vm7 = vcmp.lt.s32.totalorder %v4910_v25, 5 }
 0x50d   : > { %4462 = vmatpush3.msra.mxu0 %v3147_v23  ;;  %v2287_v13 = vrot.slane %v5967_v2, %v5411_v31  ;;  %2447 = vst [vmem:[#allocation2 + $0x88] sm:$0xf] %v2444_v49  ;;  %2449 = vst [vmem:[#allocation2 + $0x130] sm:$0xf] %v2446_v16  ;;  %v2409_v52 = vrot.slane %v2403_v1, 4  ;;  %3203 = vmatpush1.msra.mxu1 %v3145_v19  ;;  %v2344_v14 = vpop.permute.xlu1 %2343  ;;  %v2302_v34 = vpop.permute.xlu0 %2301  ;;  %v3142_v60 = vld [vmem:[#allocation2 + $0x58] sm:$0xff]  ;;  %v2244_v2 = vrot.slane %v5942_v53, %v5411_v31 }
 0x50e   : > { %v2407_v44 = vrot.slane %v2401_v0, 4  ;;  %4463 = vmatprep.subr.mxu0 %v6463_v4  ;;  %v2346_v56 = vsel %vm2345_vm3, %v5946_v43, %v2344_v14  ;;  %v2348_v36 = vsel %vm2345_vm3, %v2344_v14, %v5660_v58  ;;  %3204 = vmatprep.subr.mxu1 %v3143_v55  ;;  %v2303_v37 = vsel %vm1723_vm13, %v5922_v48, %v2302_v34  ;;  %v3140_v43 = vld [vmem:[#allocation2 + $0xb8] sm:$0xff]  ;;  %v3131_v1 = vld [vmem:[#allocation2 + $0x68] sm:$0xff]  ;;  %vm6482_vm3 = vmmov %vm6474_vm1 }
 0x50f   : > { %v2305_v8 = vsel %vm1723_vm13, %v2302_v34, %v5644_v33  ;;  %2415 = vst [vmem:[#allocation2 + $0x118] sm:$0xf0] %v2409_v52  ;;  %v2367_v53 = vmul.f32 %v2355_v24, %v2348_v36  ;;  %v2369_v51 = vmul.f32 %v2363_v3, %v2346_v56  ;;  %v2326_v18 = vmul.f32 %v2320_v11, %v2303_v37  ;;  %v4365_v19 = vld [vmem:[%s6388_s4 + $0xc] sm:$0xf] }
 0x510   : > { %2413 = vst [vmem:[#allocation2 + $0x100] sm:$0xf0] %v2407_v44  ;;  %v2324_v6 = vmul.f32 %v2312_v41, %v2305_v8  ;;  %4464 = vmatpush3.msra.mxu0 %v3144_v9  ;;  %3205 = vmatpush1.msra.mxu1 %v3142_v60  ;;  %v3139_v58 = vld [vmem:[#allocation2 + $0xc0] sm:$0xff]  ;;  %v2206_v48 = vrot.slane %v6100_v21, %v4855_v12  ;;  %v6473_v41 = vld [vmem:[#allocation17_spill] sm:$0xff]  ;;  %vm6479_vm13 = vmmov 0   ;;  %vm3627_vm10 = vcmp.lt.s32.totalorder %v4910_v25, 33 }
 0x511   : > { %4465 = vmatprep.subr.mxu0 %v6463_v4  ;;  %v3141_v47 = vld [vmem:[#allocation2 + $0x40] sm:$0xff]  ;;  %2370 = vst [vmem:[#allocation2 + $0x100] sm:$0xf] %v2367_v53  ;;  %2372 = vst [vmem:[#allocation2 + $0x118] sm:$0xf] %v2369_v51  ;;  %v2332_v33 = vrot.slane %v2326_v18, 4  ;;  %3206 = vmatprep.subr.mxu1 %v3140_v43  ;;  %v2268_v26 = vpop.permute.xlu1 %2267  ;;  %v2225_v54 = vpop.permute.xlu0 %2224 }
 0x512   : > { %v2330_v57 = vrot.slane %v2324_v6, 4  ;;  %4466 = vmatpush3.msra.mxu0 %v3141_v47  ;;  %v2270_v7 = vsel %vm2269_vm8, %v5990_v27, %v2268_v26  ;;  %v2272_v42 = vsel %vm2269_vm8, %v2268_v26, %v5691_v17  ;;  %3207 = vmatpush1.msra.mxu1 %v3139_v58  ;;  %v2227_v39 = vsel %vm2226_vm0, %v5971_v45, %v2225_v54  ;;  %v4375_v21 = vld [vmem:[%s6385_s1 + $0xd8] ss:$8 sm:$0x7]  ;;  %v3672_v6 = vld [vmem:[%s6389_s5 + $0x10] sm:$0xf] }
 0x513   : > { %v2229_v46 = vsel %vm2226_vm0, %v2225_v54, %v5676_v5  ;;  %2338 = vst [vmem:[#allocation2 + $0x90] sm:$0xf0] %v2332_v33  ;;  %v2291_v24 = vmul.f32 %v2279_v62, %v2272_v42  ;;  %v2293_v3 = vmul.f32 %v2287_v13, %v2270_v7  ;;  %v2250_v27 = vmul.f32 %v2244_v2, %v2227_v39  ;;  %v3134_v5 = vld [vmem:[#allocation2 + $0x50] sm:$0xff]  ;;  %v1855_v18 = vld [vmem:[%s6389_s5 + $0x8] sm:$0xf]  ;;  %v4077_v58 = vld [vmem:[%s6391_s7] sm:$0xff] }
 0x514   : > { %2336 = vst [vmem:[#allocation2 + $0x18] sm:$0xf0] %v2330_v57  ;;  %v2248_v30 = vmul.f32 %v2236_v15, %v2229_v46  ;;  %3208 = vmatprep.subr.mxu1 %v3137_v38  ;;  %4467 = vmatprep.subr.mxu0 %v6463_v4  ;;  %v3136_v17 = vld [vmem:[#allocation2 + $0x88] sm:$0xff]  ;;  %v3138_v63 = vld [vmem:[#allocation2 + $0x130] sm:$0xff]  ;;  %v3492_v44 = vrot.slane %v4375_v21, %v5411_v31  ;;  %v737_v43 = vld [vmem:[%s6389_s5] sm:$0xf] }
 0x515   : > { %2294 = vst [vmem:[#allocation2 + $0x18] sm:$0xf] %v2291_v24  ;;  %2296 = vst [vmem:[#allocation2 + $0x90] sm:$0xf] %v2293_v3  ;;  %v2256_v45 = vrot.slane %v2250_v27, 4  ;;  %v2190_v61 = vpop.permute.xlu1 %2189  ;;  %3209 = vmatpush1.msra.mxu1 %v3136_v17  ;;  %v2192_v32 = vpop.permute.xlu0 %2191  ;;  %4468 = vmatpush3.msra.mxu0 %v3138_v63  ;;  %v3484_v55 = vrot.slane %v4375_v21, %v4849_v10  ;;  %v3488_v56 = vrot.slane %v4375_v21, %v4855_v12  ;;  %v4078_v47 = vld [vmem:[%s6391_s7 + $0x8] sm:$0xff] }
 0x516   : > { %v2254_v29 = vrot.slane %v2248_v30, 4  ;;  %v2194_v11 = vsel %vm6474_vm1, %v6473_v41, %v2190_v61  ;;  %v2193_v35 = vsel %vm6475_vm2, %v2190_v61, %v2192_v32  ;;  %v2195_v20 = vsel %vm6476_vm5, %v2192_v32, %v6473_v41  ;;  %3210 = vmatprep.subr.mxu1 %v3134_v5  ;;  %4469 = vmatprep.subr.mxu0 %v6463_v4  ;;  %v4378_v33 = vld [vmem:[%s6385_s1 + $0xdb] ss:$8 sm:$0x7]  ;;  %vm6483_vm0 = vmmov %vm6474_vm1 }
 0x517   : > { %2262 = vst [vmem:[#allocation2 + $0xe0] sm:$0xf0] %v2256_v45  ;;  %v2215_v28 = vmul.f32 %v2206_v48, %v2194_v11  ;;  %v2214_v59 = vmul.f32 %v2202_v50, %v2195_v20  ;;  %v2216_v49 = vmul.f32 %v2210_v22, %v2193_v35  ;;  %v3602_v50 = vrot.slane %v4378_v33, %v5411_v31  ;;  %v6200_v22 = vld [vmem:[%s6385_s1 + $0xd9] ss:$8 sm:$0x7]  ;;  %vm6485_vm1 = vmmov %vm6484_vm12 }
 0x518   : > { %2260 = vst [vmem:[#allocation2 + $0x108] sm:$0xf0] %v2254_v29  ;;  %v3133_v16 = vld [vmem:[#allocation2 + $0x100] sm:$0xff]  ;;  %v3135_v0 = vld [vmem:[#allocation2 + $0x118] sm:$0xff]  ;;  %v3526_v38 = vrot.slane %v6200_v22, %v5411_v31  ;;  %v3594_v11 = vrot.slane %v4378_v33, %v4849_v10  ;;  %v3598_v20 = vrot.slane %v4378_v33, %v4855_v12  ;;  %vm3551_vm8 = vcmp.lt.s32.totalorder %v4910_v25, 43  ;;  %vm6486_vm2 = vmmov %vm6485_vm1 }
 0x519   : > { %2218 = vst [vmem:[#allocation2 + $0x10] sm:$0xf] %v2215_v28  ;;  %2217 = vst [vmem:[#allocation2 + $0x108] sm:$0xf] %v2214_v59  ;;  %3211 = vmatpush1.msra.mxu1 %v3133_v16  ;;  %4470 = vmatpush3.msra.mxu0 %v3135_v0  ;;  %vm3331_vm5 = vcmp.lt.s32.totalorder %v4910_v25, 95 }
 0x51a   : > { %2219 = vst [vmem:[#allocation2 + $0xe0] sm:$0xf] %v2216_v49  ;;  %3212 = vmatprep.subr.mxu1 %v3131_v1  ;;  %4471 = vmatprep.subr.mxu0 %v6463_v4  ;;  %v6212_v24 = vld [vmem:[%s6385_s1 + $0xc7] ss:$8 sm:$0x7] }
 0x51b   : > { %v3451_v29 = vrot.slane %v6212_v24, %v4849_v10  ;;  %v4379_v45 = vld [vmem:[%s6385_s1 + $0xdc] ss:$8 sm:$0x7]  ;;  %v6240_v59 = vld [vmem:[%s6385_s1 + $0xda] ss:$8 sm:$0x7] }
 0x51c   : > { %v3130_v40 = vld [vmem:[#allocation2 + $0x18] sm:$0xff]  ;;  %v3132_v23 = vld [vmem:[#allocation2 + $0x90] sm:$0xff]  ;;  %v3645_v28 = vrot.slane %v4379_v45, %v5411_v31  ;;  %v3637_v1 = vrot.slane %v4379_v45, %v4849_v10 }
 0x51d   : > { %3213 = vmatpush1.msra.mxu1 %v3130_v40  ;;  %4472 = vmatpush3.msra.mxu0 %v3132_v23  ;;  %v3641_v40 = vrot.slane %v4379_v45, %v4855_v12  ;;  %v4380_v25 = vld [vmem:[%s6388_s4 + $0x10] sm:$0xf] }
 0x51e   : > { %4473 = vmatprep.subr.mxu0 %v6463_v4 }
 0x520   : > { %v3128_v9 = vld [vmem:[#allocation2 + $0x10] sm:$0xff]  ;;  %v3127_v13 = vld [vmem:[#allocation2 + $0x108] sm:$0xff] }
 0x521   : > { %v3129_v62 = vld [vmem:[#allocation2 + $0xe0] sm:$0xff]  ;;  %3214 = vmatprep.subr.mxu1 %v3128_v9 }
 0x522   : > { %4474 = vmatpush3.msra.mxu0 %v3129_v62  ;;  %3215 = vmatpush1.msra.mxu1 %v3127_v13  ;;  %v3170_v52 = vpop.permute.xlu1 %3169 }
 0x523   : > { %4476 = vmatmul.mubr.msk.f32.vlgmr.msra.gmra.mxu0 %vm6477_vm6, %v4365_v19  ;;  %4368 = vmatmul.mubr.msk.f32.vlgmr.msra.gmra.mxu1 %vm6478_vm9, %v4365_v19  ;;  %vm6487_vm6 = vcmask 293888  }
 0x524   : > { %4478 = vmatprep.subr.mxu0 %v6463_v4  ;;  %4488 = vmatprep.mubr.msk.f32.mxu0 %vm6479_vm13, %v6463_v4  ;;  %vm6490_vm9 = vmmov %vm6487_vm6  ;;  %vm4089_vm13 = vcmask 97280  }
 0x525   : > { %3754 = vmatprep.mubr.f32.mxu1 %v6463_v4 }
 0x5e3   : > { %v3321_v14 = vpop.f32.mrf.mxu0  ;;  %v3250_v60 = vpop.f32.mrf.mxu1 }
 0x5e4   : > { %v3322_v34 = vadd.f32 %v3321_v14, %v3170_v52  ;;  %v3251_v15 = vadd.f32 %v3250_v60, %v3170_v52 }
 0x5e5   : > { %v4477_v2 = vpop.f32.mrf.mxu0  ;;  %v3252_v37 = vpop.f32.mrf.mxu1 }
 0x5e6   : > { %v3498_v36 = vmul.f32 %v3492_v44, %v3322_v34  ;;  %3439 = vrot.lane.b32.xlu0 %v3322_v34, %s4708_s30  ;;  %3583 = vrot.lane.b32.xlu1 %v3322_v34, %s6443_s21  ;;  %v3496_v8 = vmul.f32 %v3484_v55, %v3251_v15  ;;  %v3253_v53 = vadd.f32 %v3252_v37, %v3170_v52  ;;  %v6256_v52 = vld [vmem:[%s6385_s1 + $0xc5] ss:$8 sm:$0x7] }
 0x5e7   : > { %v3569_v44 = vrot.slane %v6240_v59, %v5411_v31  ;;  %v3522_v37 = vrot.slane %v6200_v22, %v4855_v12  ;;  %v3382_v45 = vrot.slane %v6256_v52, %v5411_v31 }
 0x5e8   : > { %3501 = vst [vmem:[#allocation2 + $0x118] sm:$0xf] %v3498_v36  ;;  %3499 = vst [vmem:[#allocation2 + $0x100] sm:$0xf] %v3496_v8  ;;  %v3497_v51 = vmul.f32 %v3488_v56, %v3253_v53 }
 0x5ea   : > { %3405 = vrot.lane.b32.xlu0 %v3322_v34, %s4709_s29  ;;  %3625 = vrot.lane.b32.xlu1 %v3322_v34, %s4710_s22  ;;  %3500 = vst [vmem:[#allocation2 + $0x50] sm:$0xf] %v3497_v51 }
 0x5ee   : > { %3579 = vrot.lane.b32.xlu0 %v3251_v15, %s6443_s21  ;;  %3506 = vrot.lane.b32.xlu1 %v3322_v34, %s4711_s17 }
 0x5f2   : > { %3502 = vrot.lane.b32.xlu0 %v3251_v15, %s4711_s17  ;;  %3549 = vrot.lane.b32.xlu1 %v3322_v34, %s4712_s14 }
 0x5f6   : > { %3435 = vrot.lane.b32.xlu0 %v3251_v15, %s4708_s30  ;;  %3363 = vrot.lane.b32.xlu1 %v3322_v34, %s6480_s20 }
 0x5fa   : > { %3581 = vrot.lane.b32.xlu0 %v3253_v53, %s6443_s21  ;;  %3621 = vrot.lane.b32.xlu1 %v3251_v15, %s4710_s22 }
 0x5fe   : > { %3623 = vrot.lane.b32.xlu0 %v3253_v53, %s4710_s22  ;;  %3545 = vrot.lane.b32.xlu1 %v3251_v15, %s4712_s14 }
 0x602   : > { %3504 = vrot.lane.b32.xlu0 %v3253_v53, %s4711_s17  ;;  %3359 = vrot.lane.b32.xlu1 %v3251_v15, %s6480_s20 }
 0x606   : > { %3547 = vrot.lane.b32.xlu0 %v3253_v53, %s4712_s14  ;;  %3401 = vrot.lane.b32.xlu1 %v3251_v15, %s4709_s29 }
 0x60a   : > { %3361 = vrot.lane.b32.xlu0 %v3253_v53, %s6480_s20  ;;  %3437 = vrot.lane.b32.xlu1 %v3253_v53, %s4708_s30  ;;  %s6493_s20 = sshll.u32 %s6495_s16, 5 }
 0x60b   : > { %s389_s26 = scalar_lea.vmem %s6394_s10, %s6493_s20 }
 0x60e   : > { %3403 = vrot.lane.b32.xlu0 %v3253_v53, %s4709_s29  ;;  %3325 = vrot.lane.b32.xlu1 %v3251_v15, %s4713_s18  ;;  %v3518_v15 = vrot.slane %v6200_v22, %v4849_v10 }
 0x612   : > { %3327 = vrot.lane.b32.xlu0 %v3253_v53, %s4713_s18  ;;  %3329 = vrot.lane.b32.xlu1 %v3322_v34, %s4713_s18 }
 0x616   : > { %3675 = vperm.xlu0 %4579, %v3672_v6   ;;  %1858 = vperm.xlu1 %4580, %v1855_v18   ;;  %v3374_v6 = vrot.slane %v6256_v52, %v4849_v10  ;;  %v6274_v18 = vld [vmem:[%s6385_s1 + $0xc6] ss:$8 sm:$0x7] }
 0x61a   : > { %740 = vperm.xlu0 %4579, %v737_v43   ;;  %4081 = vperm.xlu1 %4580, %v4077_v58  }
 0x61e   : > { %4086 = vperm.xlu0 %4579, %v4078_v47   ;;  %v3561_v47 = vrot.slane %v6240_v59, %v4849_v10 }
 0x658   : > { %v6189_v48 = vpop.permute.xlu0 %3439  ;;  %v3584_v57 = vpop.permute.xlu1 %3583 }
 0x65c   : > { %v6194_v26 = vpop.permute.xlu0 %3405  ;;  %v3626_v54 = vpop.permute.xlu1 %3625 }
 0x660   : > { %v3580_v7 = vpop.permute.xlu0 %3579  ;;  %v6202_v42 = vpop.permute.xlu1 %3506 }
 0x661   : > { %v3587_v39 = vsel %vm6481_vm11, %v3584_v57, %v3580_v7 }
 0x662   : > { %v3608_v46 = vmul.f32 %v3602_v50, %v3587_v39 }
 0x664   : > { %v3614_v3 = vrot.slane %v3608_v46, 4  ;;  %v3503_v30 = vpop.permute.xlu0 %3502  ;;  %v6214_v27 = vpop.permute.xlu1 %3549  ;;  %v3417_v46 = vrot.slane %v6274_v18, %v4849_v10 }
 0x665   : > { %v3511_v17 = vsel %vm3508_vm14, %v6202_v42, %v3503_v30 }
 0x666   : > { %3620 = vst [vmem:[#allocation2 + $0x130] sm:$0xf0] %v3614_v3  ;;  %v3532_v63 = vmul.f32 %v3526_v38, %v3511_v17  ;;  %v3378_v3 = vrot.slane %v6256_v52, %v4855_v12 }
 0x668   : > { %v3538_v61 = vrot.slane %v3532_v63, 4  ;;  %v6225_v32 = vpop.permute.xlu0 %3435  ;;  %v6227_v5 = vpop.permute.xlu1 %3363 }
 0x669   : > { %v3444_v41 = vsel %vm3441_vm7, %v6189_v48, %v6225_v32 }
 0x66a   : > { %3544 = vst [vmem:[#allocation2 + $0x118] sm:$0xf0] %v3538_v61  ;;  %v3463_v35 = vmul.f32 %v3451_v29, %v3444_v41 }
 0x66c   : > { %v3469_v49 = vrot.slane %v3463_v35, 4  ;;  %v3582_v16 = vpop.permute.xlu0 %3581  ;;  %v3622_v0 = vpop.permute.xlu1 %3621  ;;  %v3455_v35 = vrot.slane %v6212_v24, %v4855_v12 }
 0x66d   : > { %v3585_v23 = vsel %vm6482_vm3, %v3582_v16, %v3584_v57  ;;  %v3586_v19 = vsel %vm6483_vm0, %v3580_v7, %v3582_v16  ;;  %v3630_v9 = vsel %vm3627_vm10, %v3626_v54, %v3622_v0  ;;  %v3565_v57 = vrot.slane %v6240_v59, %v4855_v12 }
 0x66e   : > { %3475 = vst [vmem:[#allocation2 + $0x18] sm:$0xf0] %v3469_v49  ;;  %v3606_v62 = vmul.f32 %v3594_v11, %v3586_v19  ;;  %v3607_v13 = vmul.f32 %v3598_v20, %v3585_v23  ;;  %v3651_v21 = vmul.f32 %v3645_v28, %v3630_v9  ;;  %v3421_v23 = vrot.slane %v6274_v18, %v4855_v12 }
 0x66f   : > { %v3425_v19 = vrot.slane %v6274_v18, %v5411_v31 }
 0x670   : > { %v3612_v14 = vrot.slane %v3606_v62, 4  ;;  %v3613_v55 = vrot.slane %v3607_v13, 4  ;;  %3654 = vst [vmem:[#allocation2 + $0x40] sm:$0xf] %v3651_v21  ;;  %v3624_v34 = vpop.permute.xlu0 %3623  ;;  %v3546_v60 = vpop.permute.xlu1 %3545 }
 0x671   : > { %v3628_v2 = vsel %vm3627_vm10, %v3624_v34, %v3626_v54  ;;  %v3629_v56 = vsel %vm3627_vm10, %v3622_v0, %v3624_v34  ;;  %v3554_v36 = vsel %vm3551_vm8, %v6214_v27, %v3546_v60 }
 0x672   : > { %3618 = vst [vmem:[#allocation2 + $0x88] sm:$0xf0] %v3612_v14  ;;  %3619 = vst [vmem:[#allocation2 + $0xa0] sm:$0xf0] %v3613_v55  ;;  %v3649_v8 = vmul.f32 %v3637_v1, %v3629_v56  ;;  %v3650_v53 = vmul.f32 %v3641_v40, %v3628_v2  ;;  %v3575_v51 = vmul.f32 %v3569_v44, %v3554_v36 }
 0x673   : > { %v4371_v55 = vld [vmem:[%s6385_s1 + $0xc4] ss:$8 sm:$0x7] }
 0x674   : > { %3652 = vst [vmem:[#allocation2 + $0xc0] sm:$0xf] %v3649_v8  ;;  %3653 = vst [vmem:[#allocation2 + $0xb8] sm:$0xf] %v3650_v53  ;;  %v3505_v43 = vpop.permute.xlu0 %3504  ;;  %v3360_v58 = vpop.permute.xlu1 %3359 }
 0x675   : > { %3578 = vst [vmem:[#allocation2 + $0x130] sm:$0xf] %v3575_v51  ;;  %v3509_v33 = vsel %vm3508_vm14, %v3505_v43, %v6202_v42  ;;  %v3510_v54 = vsel %vm3508_vm14, %v3503_v30, %v3505_v43  ;;  %v3367_v50 = vsel %vm6484_vm12, %v6227_v5, %v3360_v58  ;;  %v3341_v51 = vrot.slane %v4371_v55, %v4849_v10 }
 0x676   : > { %v3530_v22 = vmul.f32 %v3518_v15, %v3510_v54  ;;  %v3531_v7 = vmul.f32 %v3522_v37, %v3509_v33  ;;  %v3386_v39 = vmul.f32 %v3374_v6, %v3367_v50  ;;  %v3345_v37 = vrot.slane %v4371_v55, %v4855_v12 }
 0x677   : > { %v3671_v38 = vld [vmem:[#allocation2 + $0x40] sm:$0xf]  ;;  %v3349_v6 = vrot.slane %v4371_v55, %v5411_v31  ;;  %v3853_v55 = vld [vmem:[#allocation6 + $0xb0] sm:$0xff] }
 0x678   : > { %v3536_v42 = vrot.slane %v3530_v22, 4  ;;  %v3537_v17 = vrot.slane %v3531_v7, 4  ;;  %v3392_v63 = vrot.slane %v3386_v39, 4  ;;  %v3548_v30 = vpop.permute.xlu0 %3547  ;;  %4479 = vmatpush3.msk.msra.mxu0 %vm747_vm4, %v3671_v38  ;;  %v3402_v29 = vpop.permute.xlu1 %3401 }
 0x679   : > { %v3552_v61 = vsel %vm3551_vm8, %v3548_v30, %v6214_v27  ;;  %v3553_v41 = vsel %vm3551_vm8, %v3546_v60, %v3548_v30  ;;  %v3410_v11 = vsel %vm3407_vm15, %v6194_v26, %v3402_v29  ;;  %4480 = vmatprep.subr.mxu0 %v6463_v4  ;;  %v3459_v27 = vrot.slane %v6212_v24, %v5411_v31 }
 0x67a   : > { %3542 = vst [vmem:[#allocation2 + $0x100] sm:$0xf0] %v3536_v42  ;;  %3543 = vst [vmem:[#allocation2 + $0x50] sm:$0xf0] %v3537_v17  ;;  %v3573_v20 = vmul.f32 %v3561_v47, %v3553_v41  ;;  %v3574_v28 = vmul.f32 %v3565_v57, %v3552_v61  ;;  %v3429_v59 = vmul.f32 %v3417_v46, %v3410_v11  ;;  %v3862_v46 = vld [vmem:[#allocation6 + $0xf8] sm:$0xff]  ;;  %v3861_v17 = vld [vmem:[#allocation6 + $0xf0] sm:$0xff] }
 0x67b   : > { %3398 = vst [vmem:[#allocation2 + $0x108] sm:$0xf0] %v3392_v63  ;;  %v3670_v49 = vld [vmem:[#allocation2 + $0xb8] sm:$0xf]  ;;  %v3669_v0 = vld [vmem:[#allocation2 + $0xc0] sm:$0xf] }
 0x67c   : > { %v3668_v16 = vld [vmem:[#allocation2 + $0x130] sm:$0xff]  ;;  %3576 = vst [vmem:[#allocation2 + $0x88] sm:$0xf] %v3573_v20  ;;  %3577 = vst [vmem:[#allocation2 + $0xa0] sm:$0xf] %v3574_v28  ;;  %v3362_v1 = vpop.permute.xlu0 %3361  ;;  %4381 = vmatprep.subr.msk.mxu1 %vm747_vm4, %v3670_v49  ;;  %v3438_v40 = vpop.permute.xlu1 %3437  ;;  %v3925_v61 = vld [vmem:[#allocation6 + $0x2f0] sm:$0xff] }
 0x67d   : > { %3432 = vst [vmem:[#allocation2 + $0x18] sm:$0xf] %v3429_v59  ;;  %4481 = vmatpush3.msra.mxu0 %v3668_v16  ;;  %v3365_v24 = vsel %vm6485_vm1, %v3362_v1, %v6227_v5  ;;  %v3366_v9 = vsel %vm6486_vm2, %v3360_v58, %v3362_v1  ;;  %v3442_v62 = vsel %vm3441_vm7, %v3438_v40, %v6189_v48  ;;  %v3665_v5 = vld [vmem:[#allocation2 + $0x118] sm:$0xff]  ;;  %v3926_v63 = vld [vmem:[#allocation6 + $0x2f8] sm:$0xff]  ;;  %v6488_v41 = vld [vmem:[#allocation12_spill] sm:$0xff] }
 0x67e   : > { %v3443_v13 = vsel %vm3441_vm7, %v6225_v32, %v3438_v40  ;;  %4382 = vmatpush1.msk.msra.mxu1 %vm747_vm4, %v3669_v0  ;;  %v3387_v21 = vmul.f32 %v3378_v3, %v3366_v9  ;;  %v3388_v44 = vmul.f32 %v3382_v45, %v3365_v24  ;;  %v3465_v14 = vmul.f32 %v3459_v27, %v3442_v62  ;;  %v3860_v45 = vld [vmem:[#allocation6 + $0xe8] sm:$0xff]  ;;  %v3859_v28 = vld [vmem:[#allocation6 + $0xe0] sm:$0xff]  ;;  %v3858_v27 = vld [vmem:[#allocation6 + $0xd8] sm:$0xff] }
 0x67f   : > { %v3464_v52 = vmul.f32 %v3455_v35, %v3443_v13  ;;  %4482 = vmatprep.subr.mxu0 %v6463_v4  ;;  %v6489_v35 = vld [vmem:[#allocation13_spill] sm:$0xff]  ;;  %v3924_v59 = vld [vmem:[#allocation6 + $0x2e8] sm:$0xff]  ;;  %v3923_v49 = vld [vmem:[#allocation6 + $0x2e0] sm:$0xff] }
 0x680   : > { %4483 = vmatpush3.msra.mxu0 %v3665_v5  ;;  %v3393_v34 = vrot.slane %v3387_v21, 4  ;;  %v3394_v48 = vrot.slane %v3388_v44, 4  ;;  %v3471_v15 = vrot.slane %v3465_v14, 4  ;;  %v3404_v2 = vpop.permute.xlu0 %3403  ;;  %v3326_v32 = vpop.permute.xlu1 %3325  ;;  %v3857_v1 = vld [vmem:[#allocation6 + $0xd0] sm:$0xff]  ;;  %v3922_v40 = vld [vmem:[#allocation6 + $0x2d8] sm:$0xff]  ;;  %v6491_v9 = vld [vmem:[#allocation10_spill] sm:$0xff] }
 0x681   : > { %v3470_v60 = vrot.slane %v3464_v52, 4  ;;  %4484 = vmatprep.subr.mxu0 %v6463_v4  ;;  %v3408_v56 = vsel %vm3407_vm15, %v3404_v2, %v6194_v26  ;;  %v3409_v36 = vsel %vm3407_vm15, %v3402_v29, %v3404_v2  ;;  %v3664_v10 = vld [vmem:[#allocation2 + $0x50] sm:$0xff]  ;;  %v3663_v50 = vld [vmem:[#allocation2 + $0x100] sm:$0xff]  ;;  %v3921_v24 = vld [vmem:[#allocation6 + $0x2d0] sm:$0xff] }
 0x682   : > { %3399 = vst [vmem:[#allocation2 + $0x10] sm:$0xf0] %v3393_v34  ;;  %3400 = vst [vmem:[#allocation2 + $0xe0] sm:$0xf0] %v3394_v48  ;;  %v3430_v8 = vmul.f32 %v3421_v23, %v3409_v36  ;;  %v3431_v53 = vmul.f32 %v3425_v19, %v3408_v56  ;;  %v3856_v19 = vld [vmem:[#allocation6 + $0xc8] sm:$0xff]  ;;  %v3855_v44 = vld [vmem:[#allocation6 + $0xc0] sm:$0xff] }
 0x683   : > { %3476 = vst [vmem:[#allocation2 + $0x68] sm:$0xf0] %v3470_v60  ;;  %3477 = vst [vmem:[#allocation2 + $0x90] sm:$0xf0] %v3471_v15  ;;  %v3667_v18 = vld [vmem:[#allocation2 + $0xa0] sm:$0xff]  ;;  %v3666_v43 = vld [vmem:[#allocation2 + $0x88] sm:$0xff] }
 0x684   : > { %3433 = vst [vmem:[#allocation2 + $0x68] sm:$0xf] %v3430_v8  ;;  %3434 = vst [vmem:[#allocation2 + $0x90] sm:$0xf] %v3431_v53  ;;  %v3328_v26 = vpop.permute.xlu0 %3327  ;;  %3714 = vmatprep.subr.mxu1 %v3667_v18  ;;  %v3330_v58 = vpop.permute.xlu1 %3329  ;;  %v3660_v39 = vld [vmem:[#allocation2 + $0x18] sm:$0xff]  ;;  %v6492_v13 = vld [vmem:[#allocation11_spill] sm:$0xff] }
 0x685   : > { %v3333_v12 = vsel %vm3331_vm5, %v3326_v32, %v3328_v26  ;;  %v3332_v47 = vsel %vm3331_vm5, %v3328_v26, %v3330_v58  ;;  %v3334_v57 = vsel %vm3331_vm5, %v3330_v58, %v3326_v32  ;;  %3715 = vmatpush1.msra.mxu1 %v3666_v43  ;;  %v3920_v52 = vld [vmem:[#allocation6 + $0x2c8] sm:$0xff]  ;;  %v3854_v14 = vld [vmem:[#allocation6 + $0xb8] sm:$0xff]  ;;  %v3919_v5 = vld [vmem:[#allocation6 + $0x2c0] sm:$0xff] }
 0x686   : > { %v3354_v33 = vmul.f32 %v3345_v37, %v3333_v12  ;;  %v3353_v31 = vmul.f32 %v3341_v51, %v3334_v57  ;;  %v3355_v54 = vmul.f32 %v3349_v6, %v3332_v47  ;;  %3716 = vmatprep.subr.mxu1 %v3664_v10  ;;  %v3918_v34 = vld [vmem:[#allocation6 + $0x2b8] sm:$0xff]  ;;  %v3852_v48 = vld [vmem:[#allocation6 + $0xa8] sm:$0xff]  ;;  %v3917_v60 = vld [vmem:[#allocation6 + $0x2b0] sm:$0xff] }
 0x687   : > { %3717 = vmatpush1.msra.mxu1 %v3663_v50  ;;  %v3851_v15 = vld [vmem:[#allocation6 + $0xa0] sm:$0xff]  ;;  %v3916_v2 = vld [vmem:[#allocation6 + $0x2a8] sm:$0xff]  ;;  %v3850_v32 = vld [vmem:[#allocation6 + $0x98] sm:$0xff] }
 0x688   : > { %3357 = vst [vmem:[#allocation2 + $0x10] sm:$0xf] %v3354_v33  ;;  %3356 = vst [vmem:[#allocation2 + $0x108] sm:$0xf] %v3353_v31  ;;  %v3915_v56 = vld [vmem:[#allocation6 + $0x2a0] sm:$0xff]  ;;  %v3849_v36 = vld [vmem:[#allocation6 + $0x90] sm:$0xff] }
 0x689   : > { %3358 = vst [vmem:[#allocation2 + $0xe0] sm:$0xf] %v3355_v54  ;;  %v3914_v37 = vld [vmem:[#allocation6 + $0x298] sm:$0xff]  ;;  %v3848_v8 = vld [vmem:[#allocation6 + $0x88] sm:$0xff]  ;;  %v3913_v53 = vld [vmem:[#allocation6 + $0x290] sm:$0xff] }
 0x68a   : > { %v3847_v51 = vld [vmem:[#allocation6 + $0x80] sm:$0xff]  ;;  %v3912_v6 = vld [vmem:[#allocation6 + $0x288] sm:$0xff]  ;;  %v3846_v18 = vld [vmem:[#allocation6 + $0x78] sm:$0xff] }
 0x68b   : > { %v3661_v22 = vld [vmem:[#allocation2 + $0x68] sm:$0xff]  ;;  %v3662_v7 = vld [vmem:[#allocation2 + $0x90] sm:$0xff]  ;;  %v3911_v43 = vld [vmem:[#allocation6 + $0x280] sm:$0xff] }
 0x68c   : > { %3718 = vmatprep.subr.mxu1 %v3661_v22  ;;  %4485 = vmatpush3.msra.mxu0 %v3662_v7  ;;  %v3845_v26 = vld [vmem:[#allocation6 + $0x70] sm:$0xff]  ;;  %v3910_v58 = vld [vmem:[#allocation6 + $0x278] sm:$0xff]  ;;  %v3844_v12 = vld [vmem:[#allocation6 + $0x68] sm:$0xff] }
 0x68d   : > { %3719 = vmatpush1.msra.mxu1 %v3660_v39  ;;  %4486 = vmatprep.subr.mxu0 %v6463_v4  ;;  %v3909_v47 = vld [vmem:[#allocation6 + $0x270] sm:$0xff]  ;;  %v3843_v57 = vld [vmem:[#allocation6 + $0x60] sm:$0xff]  ;;  %v3908_v10 = vld [vmem:[#allocation6 + $0x268] sm:$0xff] }
 0x68e   : > { %v3842_v33 = vld [vmem:[#allocation6 + $0x58] sm:$0xff]  ;;  %v3907_v31 = vld [vmem:[#allocation6 + $0x260] sm:$0xff]  ;;  %v3841_v54 = vld [vmem:[#allocation6 + $0x50] sm:$0xff] }
 0x68f   : > { %v3658_v38 = vld [vmem:[#allocation2 + $0x10] sm:$0xff]  ;;  %v3657_v42 = vld [vmem:[#allocation2 + $0x108] sm:$0xff]  ;;  %v3840_v22 = vld [vmem:[#allocation6 + $0x48] sm:$0xff] }
 0x690   : > { %v3659_v3 = vld [vmem:[#allocation2 + $0xe0] sm:$0xff]  ;;  %3720 = vmatprep.subr.mxu1 %v3658_v38  ;;  %v3906_v50 = vld [vmem:[#allocation6 + $0x258] sm:$0xff]  ;;  %v3905_v7 = vld [vmem:[#allocation6 + $0x250] sm:$0xff] }
 0x691   : > { %4487 = vmatpush3.msra.mxu0 %v3659_v3  ;;  %v6350_v30 = vpop.permute.xlu0 %3675  ;;  %3721 = vmatpush1.msra.mxu1 %v3657_v42  ;;  %v1859_v29 = vpop.permute.xlu1 %1858  ;;  %v3839_v39 = vld [vmem:[#allocation6 + $0x40] sm:$0xff]  ;;  %v3837_v3 = vld [vmem:[#allocation6 + $0x30] sm:$0xff]  ;;  %v3902_v42 = vld [vmem:[#allocation6 + $0x238] sm:$0xff] }
 0x692   : > { %4489 = vmatmul.mubr.msk.f32.vlgmr.msra.gmra.mxu0 %vm6487_vm6, %v4380_v25  ;;  %v1938_v11 = vadd.f32 %v6488_v41, %v1859_v29  ;;  %v1940_v20 = vadd.f32 %v6489_v35, %v1859_v29  ;;  %4383 = vmatmul.mubr.msk.f32.vlgmr.msra.gmra.mxu1 %vm6490_vm9, %v4380_v25  ;;  %v3904_v25 = vld [vmem:[#allocation6 + $0x248] sm:$0xff]  ;;  %v3903_v38 = vld [vmem:[#allocation6 + $0x240] sm:$0xff]  ;;  %v3898_v35 = vld [vmem:[#allocation6 + $0x218] sm:$0xff] }
 0x693   : > { %3927 = vmatprep.subr.mxu1 %v3862_v46  ;;  %3998 = vmatprep.subr.mxu0 %v3926_v63  ;;  %v3838_v46 = vld [vmem:[#allocation6 + $0x38] sm:$0xff]  ;;  %v3901_v63 = vld [vmem:[#allocation6 + $0x230] sm:$0xff]  ;;  %v3835_v29 = vld [vmem:[#allocation6 + $0x20] sm:$0xff] }
 0x694   : > { %3928 = vmatpush1.msra.mxu1 %v3861_v17  ;;  %v1944_v16 = vrot.slane %v1938_v11, 4  ;;  %v1945_v0 = vrot.slane %v1940_v20, 4  ;;  %3999 = vmatpush1.msra.mxu0 %v3925_v61  ;;  %v3836_v17 = vld [vmem:[#allocation6 + $0x28] sm:$0xff]  ;;  %v3834_v61 = vld [vmem:[#allocation6 + $0x18] sm:$0xff]  ;;  %v3899_v41 = vld [vmem:[#allocation6 + $0x220] sm:$0xff] }
 0x695   : > { %3929 = vmatprep.subr.mxu1 %v3860_v45  ;;  %v741_v23 = vpop.permute.xlu0 %740  ;;  %4000 = vmatprep.subr.mxu0 %v3924_v59  ;;  %v3900_v45 = vld [vmem:[#allocation6 + $0x228] sm:$0xff]  ;;  %v3833_v11 = vld [vmem:[#allocation6 + $0x10] sm:$0xff]  ;;  %v3894_v59 = vld [vmem:[#allocation6 + $0x1f8] sm:$0xff] }
 0x696   : > { %3930 = vmatpush1.msra.mxu1 %v3859_v28  ;;  %1948 = vst [vmem:[#allocation3 + $0x18] sm:$0xf0] %v1944_v16  ;;  %1949 = vst [vmem:[#allocation3 + $0x8] sm:$0xf0] %v1945_v0  ;;  %v821_v62 = vadd.f32 %v6491_v9, %v741_v23  ;;  %v823_v21 = vadd.f32 %v6492_v13, %v741_v23  ;;  %4001 = vmatpush1.msra.mxu0 %v3923_v49  ;;  %v3832_v20 = vld [vmem:[#allocation6 + $0x8] sm:$0xff]  ;;  %v3831_v28 = vld [vmem:[#allocation6] sm:$0xff] }
 0x697   : > { %3931 = vmatprep.subr.mxu1 %v3858_v27  ;;  %4002 = vmatprep.subr.mxu0 %v3922_v40  ;;  %v3893_v27 = vld [vmem:[#allocation6 + $0x1f0] sm:$0xff]  ;;  %v3892_v49 = vld [vmem:[#allocation6 + $0x1e8] sm:$0xff]  ;;  %v3891_v16 = vld [vmem:[#allocation6 + $0x1e0] sm:$0xff] }
 0x698   : > { %3932 = vmatpush1.msra.mxu1 %v3857_v1  ;;  %825 = vst [vmem:[#allocation3 + $0x18] sm:$0xf] %v821_v62  ;;  %826 = vst [vmem:[#allocation3 + $0x8] sm:$0xf] %v823_v21  ;;  %4003 = vmatpush1.msra.mxu0 %v3921_v24  ;;  %v3890_v0 = vld [vmem:[#allocation6 + $0x1d8] sm:$0xff]  ;;  %v3889_v1 = vld [vmem:[#allocation6 + $0x1d0] sm:$0xff] }
 0x699   : > { %3933 = vmatprep.subr.mxu1 %v3856_v19  ;;  %4004 = vmatprep.subr.mxu0 %v3920_v52  ;;  %v3888_v40 = vld [vmem:[#allocation6 + $0x1c8] sm:$0xff]  ;;  %v3887_v23 = vld [vmem:[#allocation6 + $0x1c0] sm:$0xff]  ;;  %v3886_v19 = vld [vmem:[#allocation6 + $0x1b8] sm:$0xff] }
 0x69a   : > { %3934 = vmatpush1.msra.mxu1 %v3855_v44  ;;  %4005 = vmatpush1.msra.mxu0 %v3919_v5  ;;  %v3885_v24 = vld [vmem:[#allocation6 + $0x1b0] sm:$0xff]  ;;  %v3884_v9 = vld [vmem:[#allocation6 + $0x1a8] sm:$0xff]  ;;  %v3883_v62 = vld [vmem:[#allocation6 + $0x1a0] sm:$0xff] }
 0x69b   : > { %3935 = vmatprep.subr.mxu1 %v3854_v14  ;;  %4006 = vmatprep.subr.mxu0 %v3918_v34  ;;  %v3882_v13 = vld [vmem:[#allocation6 + $0x198] sm:$0xff]  ;;  %v3881_v21 = vld [vmem:[#allocation6 + $0x190] sm:$0xff]  ;;  %v3880_v44 = vld [vmem:[#allocation6 + $0x188] sm:$0xff] }
 0x69c   : > { %3936 = vmatpush1.msra.mxu1 %v3853_v55  ;;  %4007 = vmatpush1.msra.mxu0 %v3917_v60  ;;  %v3879_v52 = vld [vmem:[#allocation6 + $0x180] sm:$0xff]  ;;  %v3878_v14 = vld [vmem:[#allocation6 + $0x178] sm:$0xff]  ;;  %v3877_v5 = vld [vmem:[#allocation6 + $0x170] sm:$0xff] }
 0x69d   : > { %3937 = vmatprep.subr.mxu1 %v3852_v48  ;;  %4008 = vmatprep.subr.mxu0 %v3916_v2  ;;  %v3876_v55 = vld [vmem:[#allocation6 + $0x168] sm:$0xff]  ;;  %v3875_v34 = vld [vmem:[#allocation6 + $0x160] sm:$0xff]  ;;  %v3874_v48 = vld [vmem:[#allocation6 + $0x158] sm:$0xff] }
 0x69e   : > { %3938 = vmatpush1.msra.mxu1 %v3851_v15  ;;  %4009 = vmatpush1.msra.mxu0 %v3915_v56  ;;  %v3873_v60 = vld [vmem:[#allocation6 + $0x150] sm:$0xff]  ;;  %v3872_v15 = vld [vmem:[#allocation6 + $0x148] sm:$0xff]  ;;  %v3871_v2 = vld [vmem:[#allocation6 + $0x140] sm:$0xff] }
 0x69f   : > { %3939 = vmatprep.subr.mxu1 %v3850_v32  ;;  %4010 = vmatprep.subr.mxu0 %v3914_v37  ;;  %v3870_v32 = vld [vmem:[#allocation6 + $0x138] sm:$0xff]  ;;  %v3869_v56 = vld [vmem:[#allocation6 + $0x130] sm:$0xff]  ;;  %v3868_v37 = vld [vmem:[#allocation6 + $0x128] sm:$0xff] }
 0x6a0   : > { %3940 = vmatpush1.msra.mxu1 %v3849_v36  ;;  %4011 = vmatpush1.msra.mxu0 %v3913_v53  ;;  %v3897_v36 = vld [vmem:[#allocation6 + $0x210] sm:$0xff]  ;;  %v3867_v53 = vld [vmem:[#allocation6 + $0x120] sm:$0xff] }
 0x6a1   : > { %3941 = vmatprep.subr.mxu1 %v3848_v8  ;;  %4012 = vmatprep.subr.mxu0 %v3912_v6  ;;  %v3896_v8 = vld [vmem:[#allocation6 + $0x208] sm:$0xff]  ;;  %v3866_v6 = vld [vmem:[#allocation6 + $0x118] sm:$0xff] }
 0x6a2   : > { %3942 = vmatpush1.msra.mxu1 %v3847_v51  ;;  %4013 = vmatpush1.msra.mxu0 %v3911_v43  ;;  %v3895_v51 = vld [vmem:[#allocation6 + $0x200] sm:$0xff]  ;;  %v3864_v43 = vld [vmem:[#allocation6 + $0x108] sm:$0xff] }
 0x6a3   : > { %3943 = vmatprep.subr.mxu1 %v3846_v18  ;;  %4014 = vmatprep.subr.mxu0 %v3910_v58  ;;  %v3865_v18 = vld [vmem:[#allocation6 + $0x110] sm:$0xff] }
 0x6a4   : > { %3944 = vmatpush1.msra.mxu1 %v3845_v26  ;;  %4015 = vmatpush1.msra.mxu0 %v3909_v47  ;;  %v3863_v26 = vld [vmem:[#allocation6 + $0x100] sm:$0xff] }
 0x6a5   : > { %3945 = vmatprep.subr.mxu1 %v3844_v12  ;;  %4016 = vmatprep.subr.mxu0 %v3908_v10 }
 0x6a6   : > { %3946 = vmatpush1.msra.mxu1 %v3843_v57  ;;  %4017 = vmatpush1.msra.mxu0 %v3907_v31 }
 0x6a7   : > { %3947 = vmatprep.subr.mxu1 %v3842_v33  ;;  %4018 = vmatprep.subr.mxu0 %v3906_v50 }
 0x6a8   : > { %3948 = vmatpush1.msra.mxu1 %v3841_v54  ;;  %4019 = vmatpush1.msra.mxu0 %v3905_v7 }
 0x6a9   : > { %3949 = vmatprep.subr.mxu1 %v3840_v22  ;;  %4020 = vmatprep.subr.mxu0 %v3904_v25 }
 0x6aa   : > { %3950 = vmatpush1.msra.mxu1 %v3839_v39  ;;  %4021 = vmatpush1.msra.mxu0 %v3903_v38 }
 0x6ab   : > { %3951 = vmatprep.subr.mxu1 %v3838_v46  ;;  %4022 = vmatprep.subr.mxu0 %v3902_v42  ;;  %v4073_v42 = vld [vmem:[#allocation3 + $0x18] sm:$0xff] }
 0x6ac   : > { %3952 = vmatpush1.msra.mxu1 %v3837_v3  ;;  %4023 = vmatpush1.msra.mxu0 %v3901_v63  ;;  %v4074_v3 = vld [vmem:[#allocation3 + $0x8] sm:$0xff]  ;;  %v4082_v63 = vpop.permute.xlu1 %4081 }
 0x6ad   : > { %3953 = vmatprep.subr.mxu1 %v3836_v17  ;;  %4024 = vmatprep.subr.mxu0 %v3900_v45  ;;  %v4072_v17 = vld [vmem:[%s6390_s6 + $0x8] sm:$0xff] }
 0x6ae   : > { %3954 = vmatpush1.msra.mxu1 %v3835_v29  ;;  %4025 = vmatpush1.msra.mxu0 %v3899_v41 }
 0x6af   : > { %3955 = vmatprep.subr.mxu1 %v3834_v61  ;;  %4026 = vmatprep.subr.mxu0 %v3898_v35  ;;  %v4087_v35 = vpop.permute.xlu0 %4086 }
 0x6b0   : > { %3956 = vmatpush1.msra.mxu1 %v3833_v11  ;;  %4062 = vmatprep.mubr.f32.mxu0 %v6463_v4 }
 0x6b1   : > { %3957 = vmatprep.subr.mxu1 %v3832_v20  ;;  %4027 = vmatpush1.msra.mxu0 %v3897_v36 }
 0x6b2   : > { %3958 = vmatpush1.msra.mxu1 %v3831_v28  ;;  %4028 = vmatprep.subr.mxu0 %v3896_v8  ;;  %v4581_v28 = vld [vmem:[%s4832_s15] sm:$0xff] }
 0x6b3   : > { %3959 = vmatprep.subr.mxu1 %v3894_v59  ;;  %4029 = vmatpush1.msra.mxu0 %v3895_v51 }
 0x6b4   : > { %3960 = vmatpush2.msra.mxu1 %v3893_v27 }
 0x6b5   : > { %3961 = vmatprep.subr.mxu1 %v3892_v49 }
 0x6b6   : > { %3962 = vmatpush2.msra.mxu1 %v3891_v16 }
 0x6b7   : > { %3963 = vmatprep.subr.mxu1 %v3890_v0  ;;  %v4582_v0 = vld [vmem:[%s4832_s15 + $0x8] sm:$0xff] }
 0x6b8   : > { %3964 = vmatpush2.msra.mxu1 %v3889_v1 }
 0x6b9   : > { %3965 = vmatprep.subr.mxu1 %v3888_v40 }
 0x6ba   : > { %3966 = vmatpush2.msra.mxu1 %v3887_v23 }
 0x6bb   : > { %3967 = vmatprep.subr.mxu1 %v3886_v19 }
 0x6bc   : > { %3968 = vmatpush2.msra.mxu1 %v3885_v24  ;;  %v4583_v24 = vld [vmem:[%s4832_s15 + $0x10] sm:$0xff] }
 0x6bd   : > { %3969 = vmatprep.subr.mxu1 %v3884_v9 }
 0x6be   : > { %3970 = vmatpush2.msra.mxu1 %v3883_v62 }
 0x6bf   : > { %3971 = vmatprep.subr.mxu1 %v3882_v13 }
 0x6c0   : > { %3972 = vmatpush2.msra.mxu1 %v3881_v21  ;;  %v4584_v21 = vld [vmem:[%s4832_s15 + $0x18] sm:$0xff] }
 0x6c1   : > { %3973 = vmatprep.subr.mxu1 %v3880_v44 }
 0x6c2   : > { %3974 = vmatpush2.msra.mxu1 %v3879_v52 }
 0x6c3   : > { %3975 = vmatprep.subr.mxu1 %v3878_v14 }
 0x6c4   : > { %3976 = vmatpush2.msra.mxu1 %v3877_v5 }
 0x6c5   : > { %3977 = vmatprep.subr.mxu1 %v3876_v55 }
 0x6c6   : > { %3978 = vmatpush2.msra.mxu1 %v3875_v34 }
 0x6c7   : > { %3979 = vmatprep.subr.mxu1 %v3874_v48 }
 0x6c8   : > { %3980 = vmatpush2.msra.mxu1 %v3873_v60 }
 0x6c9   : > { %3981 = vmatprep.subr.mxu1 %v3872_v15 }
 0x6ca   : > { %3982 = vmatpush2.msra.mxu1 %v3871_v2 }
 0x6cb   : > { %3983 = vmatprep.subr.mxu1 %v3870_v32 }
 0x6cc   : > { %3984 = vmatpush2.msra.mxu1 %v3869_v56 }
 0x6cd   : > { %3985 = vmatprep.subr.mxu1 %v3868_v37 }
 0x6ce   : > { %3986 = vmatpush2.msra.mxu1 %v3867_v53 }
 0x6cf   : > { %3987 = vmatprep.subr.mxu1 %v3866_v6 }
 0x6d0   : > { %3988 = vmatpush2.msra.mxu1 %v3865_v18 }
 0x6d1   : > { %3989 = vmatprep.subr.mxu1 %v3864_v43 }
 0x6d2   : > { %3990 = vmatpush2.msra.mxu1 %v3863_v26 }
 0x752   : > { %v3827_v58 = vpop.f32.mrf.mxu0  ;;  %v3756_v47 = vpop.f32.mrf.mxu1 }
 0x753   : > { %v3828_v12 = vadd.f32 %v3827_v58, %v6350_v30  ;;  %v3757_v31 = vadd.f32 %v3756_v47, %v6350_v30 }
 0x754   : > { %v4490_v57 = vpop.f32.mrf.mxu0  ;;  %v3758_v10 = vpop.f32.mrf.mxu1 }
 0x755   : > { %4063 = vmatmul.mubr.f32.vlgmr.msra.gmra.mxu0 %v3828_v12  ;;  %v3759_v33 = vadd.f32 %v3758_v10, %v6350_v30  ;;  %v4071_v30 = vld [vmem:[%s6390_s6] sm:$0xff] }
 0x756   : > { %4166 = vmatprep.mubr.f32.mxu0 %v6463_v4 }
 0x757   : > { %3991 = vmatprep.mubr.f32.mxu1 %v3759_v33 }
 0x758   : > { %3992 = vmatmul.mubr.f32.vlgmr.msra.gmra.mxu1 %v3757_v31 }
 0x815   : > { %v4064_v54 = vpop.f32.mrf.mxu0 }
 0x817   : > { %v4066_v7 = vpop.f32.mrf.mxu0 }
 0x818   : > { %v3993_v50 = vpop.f32.mrf.mxu1 }
 0x819   : > { %v4065_v22 = vadd.f32 %v4064_v54, %v3993_v50 }
 0x81a   : > { %v3995_v39 = vpop.f32.mrf.mxu1 }
 0x81b   : > { %4069 = vst [vmem:[#allocation3] sm:$0xf] %v4065_v22  ;;  %v4067_v25 = vadd.f32 %v4066_v7, %v3995_v39 }
 0x81d   : > { %4070 = vst [vmem:[#allocation3 + $0x10] sm:$0xf] %v4067_v25 }
 0x822   : > { %v4075_v38 = vld [vmem:[#allocation3] sm:$0xf] }
 0x824   : > { %v4076_v46 = vld [vmem:[#allocation3 + $0x10] sm:$0xf] }
 0x825   : > { %4386 = vmatprep.subr.msk.mxu0 %vm747_vm4, %v4076_v46 }
 0x826   : > { %4387 = vmatpush1.msk.msra.mxu0 %vm747_vm4, %v4075_v38 }
 0x827   : > { %4132 = vmatprep.subr.mxu0 %v4074_v3 }
 0x828   : > { %4133 = vmatpush1.msra.mxu0 %v4073_v42 }
 0x829   : > { %4388 = vmatmul.mubr.msk.f32.vlgmr.msra.gmra.mxu0 %vm4089_vm13, %v4071_v30 }
 0x82a   : > { %4172 = vmatprep.mubr.f32.mxu0 %v6463_v4 }
 0x82d   : > { %4389 = vmatmul.mubr.msk.f32.gmra.mxu0 %vm4089_vm13, %v4072_v17 }
 0x8e9   : > { %v4168_v29 = vpop.f32.mrf.mxu0 }
 0x8ea   : > { %v4169_v45 = vadd.f32 %v4168_v29, %v4082_v63 }
 0x8eb   : > { %v4170_v61 = vpop.f32.mrf.mxu0 }
 0x8ec   : > { %v4179_v41 = vmul.f32 0.5, %v4169_v45  ;;  %v4171_v11 = vadd.f32 %v4170_v61, %v4082_v63 }
 0x8ed   : > { %v4174_v20 = vpop.f32.mrf.mxu0 }
 0x8ee   : > { %v4183_v59 = vadd.f32 %v4581_v28, %v4179_v41  ;;  %v4180_v27 = vmul.f32 0.5, %v4171_v11  ;;  %v4175_v4 = vadd.f32 %v4174_v20, %v4087_v35 }
 0x8ef   : > { %v4176_v49 = vpop.f32.mrf.mxu0 }
 0x8f0   : > { %v4187_v16 = vmax.f32 %v4183_v59, 0.0  ;;  %v4184_v1 = vadd.f32 %v4582_v0, %v4180_v27  ;;  %v4181_v40 = vmul.f32 0.5, %v4175_v4  ;;  %v4177_v23 = vadd.f32 %v4176_v49, %v4087_v35 }
 0x8f2   : > { %4191 = vst [vmem:[%s389_s26] sm:$0xff] %v4187_v16  ;;  %v4188_v19 = vmax.f32 %v4184_v1, 0.0  ;;  %v4185_v9 = vadd.f32 %v4583_v24, %v4181_v40  ;;  %v4182_v62 = vmul.f32 0.5, %v4177_v23 }
 0x8f4   : > { %4192 = vst [vmem:[%s389_s26 + $0x8] sm:$0xff] %v4188_v19  ;;  %v4189_v13 = vmax.f32 %v4185_v9, 0.0  ;;  %v4186_v44 = vadd.f32 %v4584_v21, %v4182_v62 }
 0x8f6   : > { %4193 = vst [vmem:[%s389_s26 + $0x10] sm:$0xff] %v4189_v13  ;;  %v4190_v52 = vmax.f32 %v4186_v44, 0.0 }
 0x8f8   : > { %4194 = vst [vmem:[%s389_s26 + $0x18] sm:$0xff] %v4190_v52 }
 0x8f9 PF: > { %s22_s13 = sadd.s32 1, %s4651_s13  }
 0x8fa   : > { %p19_p2 = scmp.ge.s32.totalorder %s22_s13, 4  }
 0x8fc   :  { %21 = sbr.rel (!%p19_p2) target bundleno = 2 (0x2), region = 179 }
 0x901   :  { %4216 = vsyncpa [#allocation5], 1 }
 0x902   :  { %4218 = vsyncpa [#allocation5 + $0x1], 1 }
 0x903   :  { %4219 = vsyncpa [#allocation7], 1 }

</bundles_post_ra>
